<compile_context>
chip_gen: v5e
topology: v5e:2x2
jax: 0.10.0
libtpu: 0.0.40
codegen_flags: <defaults>
</compile_context>

<pallas_src>
import functools

import jax
import jax.numpy as jnp
from jax.experimental import pallas as pl
from jax.experimental.pallas import tpu as pltpu

_LANE = 128


def _conv1d_kernel(x_ref, wc_ref, bc_ref, wl_ref, bl_ref, out_ref, *,
                   C, K, pool_size, L_pool):
    # x_ref : (L_in, TB)      VMEM  positions on sublanes, batch on lanes
    # wc_ref: (C*K,)          SMEM  conv taps, wc[c, k] at index c*K + k
    # bc_ref: (C,)            SMEM  conv bias
    # wl_ref: (C, L_pool, 1)  VMEM  linear weight, Flatten order pre-folded
    # bl_ref: (1,)            SMEM  linear bias
    # out_ref: (1, TB)        VMEM  lane-dense output row
    ps = pool_size

    # Strided sublane views of the input, hoisted once:
    #   xs[s][l, b] = x[l*ps + s, b]
    # Only ps + K - 1 distinct offsets cover every (pool-offset, tap) pair.
    xs = [x_ref[pl.ds(s, L_pool, stride=ps), :] for s in range(ps + K - 1)]

    acc = None  # (L_pool, TB): linear-weighted pooled activations, summed over C
    for c in range(C):
        # Conv1d(1 -> C) restricted to pooled-window offset p; taps unrolled
        # as SMEM-scalar splat MACs on lane-dense (L_pool, TB) slabs.
        m_c = None
        for p in range(ps):
            z_p = xs[p] * wc_ref[c * K]
            for k in range(1, K):
                z_p = z_p + xs[p + k] * wc_ref[c * K + k]
            m_c = z_p if m_c is None else jnp.maximum(m_c, z_p)  # MaxPool1d(ps)
        # Per-channel bias and ReLU commute with the max (bias is constant
        # across the window, ReLU is monotone) -> apply once after pooling.
        m_c = jnp.maximum(m_c + bc_ref[c], 0.0)                   # (L_pool, TB)
        # Flatten + Linear folded in: channel-c weight column, lane-broadcast.
        term = m_c * wl_ref[c]                                    # (L_pool,1) bcast
        acc = term if acc is None else acc + term

    out = jnp.sum(acc, axis=0, keepdims=True) + bl_ref[0]         # (1, TB)
    out_ref[...] = out.astype(out_ref.dtype)


def _choose_batch_tiling(B, batch_tile):
    """Pick (TB, B_pad): TB a multiple of 128; >=2 grid steps once B > 128."""
    batch_tile = max(_LANE, (batch_tile // _LANE) * _LANE)
    if B <= _LANE:
        return _LANE, _LANE
    n_blocks = max(2, pl.cdiv(B, batch_tile))   # give v7x's 2nd TC work
    tb = pl.cdiv(pl.cdiv(B, n_blocks), _LANE) * _LANE
    return tb, n_blocks * tb


def conv1d_forward(x_ncw, wc, bc, wl, bl, *, pool_size, batch_tile=256):
    """x_ncw: (B, 1, in_size); wc: (C, K); bc: (C,); wl: (1, conv_out); bl: (1,)."""
    B, in_ch, L_in = x_ncw.shape
    assert in_ch == 1
    C, K = wc.shape
    L_conv = L_in - K + 1
    L_pool = L_conv // pool_size
    assert L_pool >= 1

    TB, B_pad = _choose_batch_tiling(B, batch_tile)

    # Batch on the lane axis: (L_in, B_pad); padded batch columns are zeros
    # (they compute garbage that is sliced off below).
    x_lb = jnp.transpose(x_ncw[:, 0, :].astype(jnp.float32))      # (L_in, B)
    if B_pad != B:
        x_lb = jnp.pad(x_lb, ((0, 0), (0, B_pad - B)))

    wc_flat = wc.reshape(C * K).astype(jnp.float32)               # SMEM scalars
    bc_flat = bc.reshape(C).astype(jnp.float32)
    # Fold the PyTorch Flatten order (index = c * L_pool + l) into a
    # (C, L_pool, 1) weight so the kernel contracts in (channel, sublane) order.
    wl_cl1 = wl.reshape(C, L_pool, 1).astype(jnp.float32)
    bl_flat = bl.reshape(1).astype(jnp.float32)

    kernel = functools.partial(_conv1d_kernel, C=C, K=K,
                               pool_size=pool_size, L_pool=L_pool)
    smem = pl.BlockSpec(memory_space=pltpu.MemorySpace.SMEM)

    # Per-step VMEM: x block (L_in*TB*4 B) + folded linear weight (~C*4 KiB)
    # + a handful of (L_pool, TB) temporaries -- well under 1 MiB, so the
    # default scoped-VMEM limit is fine on v5e/v6e/v7x.
    out = pl.pallas_call(
        kernel,
        out_shape=jax.ShapeDtypeStruct((1, B_pad), jnp.float32),
        grid=(B_pad // TB,),
        in_specs=[
            pl.BlockSpec((L_in, TB), lambda i: (0, i)),
            smem,                                                  # conv weight
            smem,                                                  # conv bias
            pl.BlockSpec((C, L_pool, 1), lambda i: (0, 0, 0)),     # linear weight
            smem,                                                  # linear bias
        ],
        out_specs=pl.BlockSpec((1, TB), lambda i: (0, i)),         # lane-dense
        compiler_params=pltpu.CompilerParams(
            dimension_semantics=("parallel",)),
    )(x_lb, wc_flat, bc_flat, wl_cl1, bl_flat)
    return out[0, :B].reshape(B, 1)


def _reference(x_ncw, wc, bc, wl, bl, *, pool_size):
    """Pure-JAX reference mirroring the PyTorch forward (in float32)."""
    B, _, L_in = x_ncw.shape
    C, K = wc.shape
    L_conv = L_in - K + 1
    L_pool = L_conv // pool_size
    x = x_ncw[:, 0, :].astype(jnp.float32)
    patches = jnp.stack([x[:, k:k + L_conv] for k in range(K)], axis=-1)  # (B,L,K)
    y = jnp.einsum("blk,ck->bcl", patches, wc) + bc[None, :, None]
    y = jnp.maximum(y, 0.0)
    y = y[:, :, :L_pool * pool_size].reshape(B, C, L_pool, pool_size).max(-1)
    z = y.reshape(B, C * L_pool)
    return z @ wl.reshape(1, -1).T + bl.reshape(1, 1)


if __name__ == "__main__":
    # Module hyper-parameters (small, consistent with the PyTorch __init__).
    B = 2
    in_size = 16
    out_channels = 32
    kernel_size = 5
    pool_size = 2
    L_conv = in_size - kernel_size + 1               # 12
    conv_out = (L_conv // pool_size) * out_channels  # 192

    key = jax.random.PRNGKey(0)
    k_x, k_wc, k_bc, k_wl, k_bl = jax.random.split(key, 5)

    # Deterministic synthetic parameters (shapes match nn.Conv1d / nn.Linear).
    wc = 0.1 * jax.random.normal(k_wc, (out_channels, kernel_size), jnp.float32)
    bc = 0.1 * jax.random.normal(k_bc, (out_channels,), jnp.float32)
    wl = 0.1 * jax.random.normal(k_wl, (1, conv_out), jnp.float32)
    bl = 0.1 * jax.random.normal(k_bl, (1,), jnp.float32)

    # Input: NCW with a single channel, as nn.Conv1d expects.
    x = jax.random.normal(k_x, (B, 1, in_size), jnp.float32)

    out = jax.block_until_ready(
        conv1d_forward(x, wc, bc, wl, bl, pool_size=pool_size))
    ref = _reference(x, wc, bc, wl, bl, pool_size=pool_size)
    assert out.shape == (B, 1), out.shape
    assert jnp.allclose(out, ref, atol=1e-4, rtol=1e-4), (out, ref)

    # Multi-block + padded path: B=300 -> TB=256, grid=(2,), 212 padded
    # lane columns sliced off.
    B2 = 300
    x2 = jax.random.normal(jax.random.PRNGKey(1), (B2, 1, in_size), jnp.float32)
    out2 = jax.block_until_ready(
        conv1d_forward(x2, wc, bc, wl, bl, pool_size=pool_size))
    ref2 = _reference(x2, wc, bc, wl, bl, pool_size=pool_size)
    assert out2.shape == (B2, 1), out2.shape
    assert jnp.allclose(out2, ref2, atol=1e-4, rtol=1e-4), (out2, ref2)

    print("KERNEL_OK")
</pallas_src>

<mosaic_0001>
module attributes {stable_mosaic.version = 11 : i64} {
  func.func @_conv1d_kernel(%arg0: i32, %arg1: memref<16x128xf32, #tpu.memory_space<vmem>>, %arg2: memref<160xf32, #tpu.memory_space<smem>>, %arg3: memref<32xf32, #tpu.memory_space<smem>>, %arg4: memref<32x6x1xf32, #tpu.memory_space<vmem>>, %arg5: memref<1xf32, #tpu.memory_space<smem>>, %arg6: memref<1x128xf32, #tpu.memory_space<vmem>>) attributes {dimension_semantics = [#tpu.dimension_semantics<parallel>], iteration_bounds = array<i64: 1>, scalar_prefetch = 0 : i64, scratch_operands = 0 : i64, tpu.core_type = #tpu.core_type<tc>, window_params = [{transform_indices = @transform_0, window_bounds = array<i64: 16, 128>}, {transform_indices = @transform_1, window_bounds = array<i64: 160>}, {transform_indices = @transform_2, window_bounds = array<i64: 32>}, {pipeline_mode = #tpu.pipeline_mode<synchronous>, transform_indices = @transform_3, window_bounds = array<i64: 32, 6, 1>}, {transform_indices = @transform_4, window_bounds = array<i64: 1>}, {transform_indices = @transform_5, window_bounds = array<i64: 1, 128>}]} {
    %c0 = arith.constant 0 : index
    %c0_0 = arith.constant 0 : index
    %0 = tpu.strided_load %arg1[%c0, %c0_0] {strides = array<i32: 2, 1>} : memref<16x128xf32, #tpu.memory_space<vmem>>, vector<6x128xf32>
    %c1 = arith.constant 1 : index
    %c0_1 = arith.constant 0 : index
    %1 = tpu.strided_load %arg1[%c1, %c0_1] {strides = array<i32: 2, 1>} : memref<16x128xf32, #tpu.memory_space<vmem>>, vector<6x128xf32>
    %c2 = arith.constant 2 : index
    %c0_2 = arith.constant 0 : index
    %2 = tpu.strided_load %arg1[%c2, %c0_2] {strides = array<i32: 2, 1>} : memref<16x128xf32, #tpu.memory_space<vmem>>, vector<6x128xf32>
    %c3 = arith.constant 3 : index
    %c0_3 = arith.constant 0 : index
    %3 = tpu.strided_load %arg1[%c3, %c0_3] {strides = array<i32: 2, 1>} : memref<16x128xf32, #tpu.memory_space<vmem>>, vector<6x128xf32>
    %c4 = arith.constant 4 : index
    %c0_4 = arith.constant 0 : index
    %4 = tpu.strided_load %arg1[%c4, %c0_4] {strides = array<i32: 2, 1>} : memref<16x128xf32, #tpu.memory_space<vmem>>, vector<6x128xf32>
    %c5 = arith.constant 5 : index
    %c0_5 = arith.constant 0 : index
    %5 = tpu.strided_load %arg1[%c5, %c0_5] {strides = array<i32: 2, 1>} : memref<16x128xf32, #tpu.memory_space<vmem>>, vector<6x128xf32>
    %c0_6 = arith.constant 0 : index
    %6 = memref.load %arg2[%c0_6] : memref<160xf32, #tpu.memory_space<smem>>
    %7 = vector.broadcast %6 : f32 to vector<6x128xf32>
    %8 = arith.mulf %0, %7 : vector<6x128xf32>
    %c1_7 = arith.constant 1 : index
    %9 = memref.load %arg2[%c1_7] : memref<160xf32, #tpu.memory_space<smem>>
    %10 = vector.broadcast %9 : f32 to vector<6x128xf32>
    %11 = arith.mulf %1, %10 : vector<6x128xf32>
    %12 = arith.addf %8, %11 : vector<6x128xf32>
    %c2_8 = arith.constant 2 : index
    %13 = memref.load %arg2[%c2_8] : memref<160xf32, #tpu.memory_space<smem>>
    %14 = vector.broadcast %13 : f32 to vector<6x128xf32>
    %15 = arith.mulf %2, %14 : vector<6x128xf32>
    %16 = arith.addf %12, %15 : vector<6x128xf32>
    %c3_9 = arith.constant 3 : index
    %17 = memref.load %arg2[%c3_9] : memref<160xf32, #tpu.memory_space<smem>>
    %18 = vector.broadcast %17 : f32 to vector<6x128xf32>
    %19 = arith.mulf %3, %18 : vector<6x128xf32>
    %20 = arith.addf %16, %19 : vector<6x128xf32>
    %c4_10 = arith.constant 4 : index
    %21 = memref.load %arg2[%c4_10] : memref<160xf32, #tpu.memory_space<smem>>
    %22 = vector.broadcast %21 : f32 to vector<6x128xf32>
    %23 = arith.mulf %4, %22 : vector<6x128xf32>
    %24 = arith.addf %20, %23 : vector<6x128xf32>
    %c0_11 = arith.constant 0 : index
    %25 = memref.load %arg2[%c0_11] : memref<160xf32, #tpu.memory_space<smem>>
    %26 = vector.broadcast %25 : f32 to vector<6x128xf32>
    %27 = arith.mulf %1, %26 : vector<6x128xf32>
    %c1_12 = arith.constant 1 : index
    %28 = memref.load %arg2[%c1_12] : memref<160xf32, #tpu.memory_space<smem>>
    %29 = vector.broadcast %28 : f32 to vector<6x128xf32>
    %30 = arith.mulf %2, %29 : vector<6x128xf32>
    %31 = arith.addf %27, %30 : vector<6x128xf32>
    %c2_13 = arith.constant 2 : index
    %32 = memref.load %arg2[%c2_13] : memref<160xf32, #tpu.memory_space<smem>>
    %33 = vector.broadcast %32 : f32 to vector<6x128xf32>
    %34 = arith.mulf %3, %33 : vector<6x128xf32>
    %35 = arith.addf %31, %34 : vector<6x128xf32>
    %c3_14 = arith.constant 3 : index
    %36 = memref.load %arg2[%c3_14] : memref<160xf32, #tpu.memory_space<smem>>
    %37 = vector.broadcast %36 : f32 to vector<6x128xf32>
    %38 = arith.mulf %4, %37 : vector<6x128xf32>
    %39 = arith.addf %35, %38 : vector<6x128xf32>
    %c4_15 = arith.constant 4 : index
    %40 = memref.load %arg2[%c4_15] : memref<160xf32, #tpu.memory_space<smem>>
    %41 = vector.broadcast %40 : f32 to vector<6x128xf32>
    %42 = arith.mulf %5, %41 : vector<6x128xf32>
    %43 = arith.addf %39, %42 : vector<6x128xf32>
    %44 = arith.maximumf %24, %43 : vector<6x128xf32>
    %c0_16 = arith.constant 0 : index
    %45 = memref.load %arg3[%c0_16] : memref<32xf32, #tpu.memory_space<smem>>
    %46 = vector.broadcast %45 : f32 to vector<6x128xf32>
    %47 = arith.addf %44, %46 : vector<6x128xf32>
    %cst = arith.constant 0.000000e+00 : f32
    %48 = vector.broadcast %cst : f32 to vector<6x128xf32>
    %49 = arith.maximumf %47, %48 : vector<6x128xf32>
    %c0_17 = arith.constant 0 : index
    %c0_18 = arith.constant 0 : index
    %c0_19 = arith.constant 0 : index
    %50 = vector.load %arg4[%c0_17, %c0_18, %c0_19] : memref<32x6x1xf32, #tpu.memory_space<vmem>>, vector<1x6x1xf32>
    %51 = vector.shape_cast %50 : vector<1x6x1xf32> to vector<6x1xf32>
    %52 = vector.broadcast %51 : vector<6x1xf32> to vector<6x128xf32>
    %53 = arith.mulf %49, %52 : vector<6x128xf32>
    %c5_20 = arith.constant 5 : index
    %54 = memref.load %arg2[%c5_20] : memref<160xf32, #tpu.memory_space<smem>>
    %55 = vector.broadcast %54 : f32 to vector<6x128xf32>
    %56 = arith.mulf %0, %55 : vector<6x128xf32>
    %c6 = arith.constant 6 : index
    %57 = memref.load %arg2[%c6] : memref<160xf32, #tpu.memory_space<smem>>
    %58 = vector.broadcast %57 : f32 to vector<6x128xf32>
    %59 = arith.mulf %1, %58 : vector<6x128xf32>
    %60 = arith.addf %56, %59 : vector<6x128xf32>
    %c7 = arith.constant 7 : index
    %61 = memref.load %arg2[%c7] : memref<160xf32, #tpu.memory_space<smem>>
    %62 = vector.broadcast %61 : f32 to vector<6x128xf32>
    %63 = arith.mulf %2, %62 : vector<6x128xf32>
    %64 = arith.addf %60, %63 : vector<6x128xf32>
    %c8 = arith.constant 8 : index
    %65 = memref.load %arg2[%c8] : memref<160xf32, #tpu.memory_space<smem>>
    %66 = vector.broadcast %65 : f32 to vector<6x128xf32>
    %67 = arith.mulf %3, %66 : vector<6x128xf32>
    %68 = arith.addf %64, %67 : vector<6x128xf32>
    %c9 = arith.constant 9 : index
    %69 = memref.load %arg2[%c9] : memref<160xf32, #tpu.memory_space<smem>>
    %70 = vector.broadcast %69 : f32 to vector<6x128xf32>
    %71 = arith.mulf %4, %70 : vector<6x128xf32>
    %72 = arith.addf %68, %71 : vector<6x128xf32>
    %c5_21 = arith.constant 5 : index
    %73 = memref.load %arg2[%c5_21] : memref<160xf32, #tpu.memory_space<smem>>
    %74 = vector.broadcast %73 : f32 to vector<6x128xf32>
    %75 = arith.mulf %1, %74 : vector<6x128xf32>
    %c6_22 = arith.constant 6 : index
    %76 = memref.load %arg2[%c6_22] : memref<160xf32, #tpu.memory_space<smem>>
    %77 = vector.broadcast %76 : f32 to vector<6x128xf32>
    %78 = arith.mulf %2, %77 : vector<6x128xf32>
    %79 = arith.addf %75, %78 : vector<6x128xf32>
    %c7_23 = arith.constant 7 : index
    %80 = memref.load %arg2[%c7_23] : memref<160xf32, #tpu.memory_space<smem>>
    %81 = vector.broadcast %80 : f32 to vector<6x128xf32>
    %82 = arith.mulf %3, %81 : vector<6x128xf32>
    %83 = arith.addf %79, %82 : vector<6x128xf32>
    %c8_24 = arith.constant 8 : index
    %84 = memref.load %arg2[%c8_24] : memref<160xf32, #tpu.memory_space<smem>>
    %85 = vector.broadcast %84 : f32 to vector<6x128xf32>
    %86 = arith.mulf %4, %85 : vector<6x128xf32>
    %87 = arith.addf %83, %86 : vector<6x128xf32>
    %c9_25 = arith.constant 9 : index
    %88 = memref.load %arg2[%c9_25] : memref<160xf32, #tpu.memory_space<smem>>
    %89 = vector.broadcast %88 : f32 to vector<6x128xf32>
    %90 = arith.mulf %5, %89 : vector<6x128xf32>
    %91 = arith.addf %87, %90 : vector<6x128xf32>
    %92 = arith.maximumf %72, %91 : vector<6x128xf32>
    %c1_26 = arith.constant 1 : index
    %93 = memref.load %arg3[%c1_26] : memref<32xf32, #tpu.memory_space<smem>>
    %94 = vector.broadcast %93 : f32 to vector<6x128xf32>
    %95 = arith.addf %92, %94 : vector<6x128xf32>
    %cst_27 = arith.constant 0.000000e+00 : f32
    %96 = vector.broadcast %cst_27 : f32 to vector<6x128xf32>
    %97 = arith.maximumf %95, %96 : vector<6x128xf32>
    %c1_28 = arith.constant 1 : index
    %c0_29 = arith.constant 0 : index
    %c0_30 = arith.constant 0 : index
    %98 = vector.load %arg4[%c1_28, %c0_29, %c0_30] : memref<32x6x1xf32, #tpu.memory_space<vmem>>, vector<1x6x1xf32>
    %99 = vector.shape_cast %98 : vector<1x6x1xf32> to vector<6x1xf32>
    %100 = vector.broadcast %99 : vector<6x1xf32> to vector<6x128xf32>
    %101 = arith.mulf %97, %100 : vector<6x128xf32>
    %102 = arith.addf %53, %101 : vector<6x128xf32>
    %c10 = arith.constant 10 : index
    %103 = memref.load %arg2[%c10] : memref<160xf32, #tpu.memory_space<smem>>
    %104 = vector.broadcast %103 : f32 to vector<6x128xf32>
    %105 = arith.mulf %0, %104 : vector<6x128xf32>
    %c11 = arith.constant 11 : index
    %106 = memref.load %arg2[%c11] : memref<160xf32, #tpu.memory_space<smem>>
    %107 = vector.broadcast %106 : f32 to vector<6x128xf32>
    %108 = arith.mulf %1, %107 : vector<6x128xf32>
    %109 = arith.addf %105, %108 : vector<6x128xf32>
    %c12 = arith.constant 12 : index
    %110 = memref.load %arg2[%c12] : memref<160xf32, #tpu.memory_space<smem>>
    %111 = vector.broadcast %110 : f32 to vector<6x128xf32>
    %112 = arith.mulf %2, %111 : vector<6x128xf32>
    %113 = arith.addf %109, %112 : vector<6x128xf32>
    %c13 = arith.constant 13 : index
    %114 = memref.load %arg2[%c13] : memref<160xf32, #tpu.memory_space<smem>>
    %115 = vector.broadcast %114 : f32 to vector<6x128xf32>
    %116 = arith.mulf %3, %115 : vector<6x128xf32>
    %117 = arith.addf %113, %116 : vector<6x128xf32>
    %c14 = arith.constant 14 : index
    %118 = memref.load %arg2[%c14] : memref<160xf32, #tpu.memory_space<smem>>
    %119 = vector.broadcast %118 : f32 to vector<6x128xf32>
    %120 = arith.mulf %4, %119 : vector<6x128xf32>
    %121 = arith.addf %117, %120 : vector<6x128xf32>
    %c10_31 = arith.constant 10 : index
    %122 = memref.load %arg2[%c10_31] : memref<160xf32, #tpu.memory_space<smem>>
    %123 = vector.broadcast %122 : f32 to vector<6x128xf32>
    %124 = arith.mulf %1, %123 : vector<6x128xf32>
    %c11_32 = arith.constant 11 : index
    %125 = memref.load %arg2[%c11_32] : memref<160xf32, #tpu.memory_space<smem>>
    %126 = vector.broadcast %125 : f32 to vector<6x128xf32>
    %127 = arith.mulf %2, %126 : vector<6x128xf32>
    %128 = arith.addf %124, %127 : vector<6x128xf32>
    %c12_33 = arith.constant 12 : index
    %129 = memref.load %arg2[%c12_33] : memref<160xf32, #tpu.memory_space<smem>>
    %130 = vector.broadcast %129 : f32 to vector<6x128xf32>
    %131 = arith.mulf %3, %130 : vector<6x128xf32>
    %132 = arith.addf %128, %131 : vector<6x128xf32>
    %c13_34 = arith.constant 13 : index
    %133 = memref.load %arg2[%c13_34] : memref<160xf32, #tpu.memory_space<smem>>
    %134 = vector.broadcast %133 : f32 to vector<6x128xf32>
    %135 = arith.mulf %4, %134 : vector<6x128xf32>
    %136 = arith.addf %132, %135 : vector<6x128xf32>
    %c14_35 = arith.constant 14 : index
    %137 = memref.load %arg2[%c14_35] : memref<160xf32, #tpu.memory_space<smem>>
    %138 = vector.broadcast %137 : f32 to vector<6x128xf32>
    %139 = arith.mulf %5, %138 : vector<6x128xf32>
    %140 = arith.addf %136, %139 : vector<6x128xf32>
    %141 = arith.maximumf %121, %140 : vector<6x128xf32>
    %c2_36 = arith.constant 2 : index
    %142 = memref.load %arg3[%c2_36] : memref<32xf32, #tpu.memory_space<smem>>
    %143 = vector.broadcast %142 : f32 to vector<6x128xf32>
    %144 = arith.addf %141, %143 : vector<6x128xf32>
    %cst_37 = arith.constant 0.000000e+00 : f32
    %145 = vector.broadcast %cst_37 : f32 to vector<6x128xf32>
    %146 = arith.maximumf %144, %145 : vector<6x128xf32>
    %c2_38 = arith.constant 2 : index
    %c0_39 = arith.constant 0 : index
    %c0_40 = arith.constant 0 : index
    %147 = vector.load %arg4[%c2_38, %c0_39, %c0_40] : memref<32x6x1xf32, #tpu.memory_space<vmem>>, vector<1x6x1xf32>
    %148 = vector.shape_cast %147 : vector<1x6x1xf32> to vector<6x1xf32>
    %149 = vector.broadcast %148 : vector<6x1xf32> to vector<6x128xf32>
    %150 = arith.mulf %146, %149 : vector<6x128xf32>
    %151 = arith.addf %102, %150 : vector<6x128xf32>
    %c15 = arith.constant 15 : index
    %152 = memref.load %arg2[%c15] : memref<160xf32, #tpu.memory_space<smem>>
    %153 = vector.broadcast %152 : f32 to vector<6x128xf32>
    %154 = arith.mulf %0, %153 : vector<6x128xf32>
    %c16 = arith.constant 16 : index
    %155 = memref.load %arg2[%c16] : memref<160xf32, #tpu.memory_space<smem>>
    %156 = vector.broadcast %155 : f32 to vector<6x128xf32>
    %157 = arith.mulf %1, %156 : vector<6x128xf32>
    %158 = arith.addf %154, %157 : vector<6x128xf32>
    %c17 = arith.constant 17 : index
    %159 = memref.load %arg2[%c17] : memref<160xf32, #tpu.memory_space<smem>>
    %160 = vector.broadcast %159 : f32 to vector<6x128xf32>
    %161 = arith.mulf %2, %160 : vector<6x128xf32>
    %162 = arith.addf %158, %161 : vector<6x128xf32>
    %c18 = arith.constant 18 : index
    %163 = memref.load %arg2[%c18] : memref<160xf32, #tpu.memory_space<smem>>
    %164 = vector.broadcast %163 : f32 to vector<6x128xf32>
    %165 = arith.mulf %3, %164 : vector<6x128xf32>
    %166 = arith.addf %162, %165 : vector<6x128xf32>
    %c19 = arith.constant 19 : index
    %167 = memref.load %arg2[%c19] : memref<160xf32, #tpu.memory_space<smem>>
    %168 = vector.broadcast %167 : f32 to vector<6x128xf32>
    %169 = arith.mulf %4, %168 : vector<6x128xf32>
    %170 = arith.addf %166, %169 : vector<6x128xf32>
    %c15_41 = arith.constant 15 : index
    %171 = memref.load %arg2[%c15_41] : memref<160xf32, #tpu.memory_space<smem>>
    %172 = vector.broadcast %171 : f32 to vector<6x128xf32>
    %173 = arith.mulf %1, %172 : vector<6x128xf32>
    %c16_42 = arith.constant 16 : index
    %174 = memref.load %arg2[%c16_42] : memref<160xf32, #tpu.memory_space<smem>>
    %175 = vector.broadcast %174 : f32 to vector<6x128xf32>
    %176 = arith.mulf %2, %175 : vector<6x128xf32>
    %177 = arith.addf %173, %176 : vector<6x128xf32>
    %c17_43 = arith.constant 17 : index
    %178 = memref.load %arg2[%c17_43] : memref<160xf32, #tpu.memory_space<smem>>
    %179 = vector.broadcast %178 : f32 to vector<6x128xf32>
    %180 = arith.mulf %3, %179 : vector<6x128xf32>
    %181 = arith.addf %177, %180 : vector<6x128xf32>
    %c18_44 = arith.constant 18 : index
    %182 = memref.load %arg2[%c18_44] : memref<160xf32, #tpu.memory_space<smem>>
    %183 = vector.broadcast %182 : f32 to vector<6x128xf32>
    %184 = arith.mulf %4, %183 : vector<6x128xf32>
    %185 = arith.addf %181, %184 : vector<6x128xf32>
    %c19_45 = arith.constant 19 : index
    %186 = memref.load %arg2[%c19_45] : memref<160xf32, #tpu.memory_space<smem>>
    %187 = vector.broadcast %186 : f32 to vector<6x128xf32>
    %188 = arith.mulf %5, %187 : vector<6x128xf32>
    %189 = arith.addf %185, %188 : vector<6x128xf32>
    %190 = arith.maximumf %170, %189 : vector<6x128xf32>
    %c3_46 = arith.constant 3 : index
    %191 = memref.load %arg3[%c3_46] : memref<32xf32, #tpu.memory_space<smem>>
    %192 = vector.broadcast %191 : f32 to vector<6x128xf32>
    %193 = arith.addf %190, %192 : vector<6x128xf32>
    %cst_47 = arith.constant 0.000000e+00 : f32
    %194 = vector.broadcast %cst_47 : f32 to vector<6x128xf32>
    %195 = arith.maximumf %193, %194 : vector<6x128xf32>
    %c3_48 = arith.constant 3 : index
    %c0_49 = arith.constant 0 : index
    %c0_50 = arith.constant 0 : index
    %196 = vector.load %arg4[%c3_48, %c0_49, %c0_50] : memref<32x6x1xf32, #tpu.memory_space<vmem>>, vector<1x6x1xf32>
    %197 = vector.shape_cast %196 : vector<1x6x1xf32> to vector<6x1xf32>
    %198 = vector.broadcast %197 : vector<6x1xf32> to vector<6x128xf32>
    %199 = arith.mulf %195, %198 : vector<6x128xf32>
    %200 = arith.addf %151, %199 : vector<6x128xf32>
    %c20 = arith.constant 20 : index
    %201 = memref.load %arg2[%c20] : memref<160xf32, #tpu.memory_space<smem>>
    %202 = vector.broadcast %201 : f32 to vector<6x128xf32>
    %203 = arith.mulf %0, %202 : vector<6x128xf32>
    %c21 = arith.constant 21 : index
    %204 = memref.load %arg2[%c21] : memref<160xf32, #tpu.memory_space<smem>>
    %205 = vector.broadcast %204 : f32 to vector<6x128xf32>
    %206 = arith.mulf %1, %205 : vector<6x128xf32>
    %207 = arith.addf %203, %206 : vector<6x128xf32>
    %c22 = arith.constant 22 : index
    %208 = memref.load %arg2[%c22] : memref<160xf32, #tpu.memory_space<smem>>
    %209 = vector.broadcast %208 : f32 to vector<6x128xf32>
    %210 = arith.mulf %2, %209 : vector<6x128xf32>
    %211 = arith.addf %207, %210 : vector<6x128xf32>
    %c23 = arith.constant 23 : index
    %212 = memref.load %arg2[%c23] : memref<160xf32, #tpu.memory_space<smem>>
    %213 = vector.broadcast %212 : f32 to vector<6x128xf32>
    %214 = arith.mulf %3, %213 : vector<6x128xf32>
    %215 = arith.addf %211, %214 : vector<6x128xf32>
    %c24 = arith.constant 24 : index
    %216 = memref.load %arg2[%c24] : memref<160xf32, #tpu.memory_space<smem>>
    %217 = vector.broadcast %216 : f32 to vector<6x128xf32>
    %218 = arith.mulf %4, %217 : vector<6x128xf32>
    %219 = arith.addf %215, %218 : vector<6x128xf32>
    %c20_51 = arith.constant 20 : index
    %220 = memref.load %arg2[%c20_51] : memref<160xf32, #tpu.memory_space<smem>>
    %221 = vector.broadcast %220 : f32 to vector<6x128xf32>
    %222 = arith.mulf %1, %221 : vector<6x128xf32>
    %c21_52 = arith.constant 21 : index
    %223 = memref.load %arg2[%c21_52] : memref<160xf32, #tpu.memory_space<smem>>
    %224 = vector.broadcast %223 : f32 to vector<6x128xf32>
    %225 = arith.mulf %2, %224 : vector<6x128xf32>
    %226 = arith.addf %222, %225 : vector<6x128xf32>
    %c22_53 = arith.constant 22 : index
    %227 = memref.load %arg2[%c22_53] : memref<160xf32, #tpu.memory_space<smem>>
    %228 = vector.broadcast %227 : f32 to vector<6x128xf32>
    %229 = arith.mulf %3, %228 : vector<6x128xf32>
    %230 = arith.addf %226, %229 : vector<6x128xf32>
    %c23_54 = arith.constant 23 : index
    %231 = memref.load %arg2[%c23_54] : memref<160xf32, #tpu.memory_space<smem>>
    %232 = vector.broadcast %231 : f32 to vector<6x128xf32>
    %233 = arith.mulf %4, %232 : vector<6x128xf32>
    %234 = arith.addf %230, %233 : vector<6x128xf32>
    %c24_55 = arith.constant 24 : index
    %235 = memref.load %arg2[%c24_55] : memref<160xf32, #tpu.memory_space<smem>>
    %236 = vector.broadcast %235 : f32 to vector<6x128xf32>
    %237 = arith.mulf %5, %236 : vector<6x128xf32>
    %238 = arith.addf %234, %237 : vector<6x128xf32>
    %239 = arith.maximumf %219, %238 : vector<6x128xf32>
    %c4_56 = arith.constant 4 : index
    %240 = memref.load %arg3[%c4_56] : memref<32xf32, #tpu.memory_space<smem>>
    %241 = vector.broadcast %240 : f32 to vector<6x128xf32>
    %242 = arith.addf %239, %241 : vector<6x128xf32>
    %cst_57 = arith.constant 0.000000e+00 : f32
    %243 = vector.broadcast %cst_57 : f32 to vector<6x128xf32>
    %244 = arith.maximumf %242, %243 : vector<6x128xf32>
    %c4_58 = arith.constant 4 : index
    %c0_59 = arith.constant 0 : index
    %c0_60 = arith.constant 0 : index
    %245 = vector.load %arg4[%c4_58, %c0_59, %c0_60] : memref<32x6x1xf32, #tpu.memory_space<vmem>>, vector<1x6x1xf32>
    %246 = vector.shape_cast %245 : vector<1x6x1xf32> to vector<6x1xf32>
    %247 = vector.broadcast %246 : vector<6x1xf32> to vector<6x128xf32>
    %248 = arith.mulf %244, %247 : vector<6x128xf32>
    %249 = arith.addf %200, %248 : vector<6x128xf32>
    %c25 = arith.constant 25 : index
    %250 = memref.load %arg2[%c25] : memref<160xf32, #tpu.memory_space<smem>>
    %251 = vector.broadcast %250 : f32 to vector<6x128xf32>
    %252 = arith.mulf %0, %251 : vector<6x128xf32>
    %c26 = arith.constant 26 : index
    %253 = memref.load %arg2[%c26] : memref<160xf32, #tpu.memory_space<smem>>
    %254 = vector.broadcast %253 : f32 to vector<6x128xf32>
    %255 = arith.mulf %1, %254 : vector<6x128xf32>
    %256 = arith.addf %252, %255 : vector<6x128xf32>
    %c27 = arith.constant 27 : index
    %257 = memref.load %arg2[%c27] : memref<160xf32, #tpu.memory_space<smem>>
    %258 = vector.broadcast %257 : f32 to vector<6x128xf32>
    %259 = arith.mulf %2, %258 : vector<6x128xf32>
    %260 = arith.addf %256, %259 : vector<6x128xf32>
    %c28 = arith.constant 28 : index
    %261 = memref.load %arg2[%c28] : memref<160xf32, #tpu.memory_space<smem>>
    %262 = vector.broadcast %261 : f32 to vector<6x128xf32>
    %263 = arith.mulf %3, %262 : vector<6x128xf32>
    %264 = arith.addf %260, %263 : vector<6x128xf32>
    %c29 = arith.constant 29 : index
    %265 = memref.load %arg2[%c29] : memref<160xf32, #tpu.memory_space<smem>>
    %266 = vector.broadcast %265 : f32 to vector<6x128xf32>
    %267 = arith.mulf %4, %266 : vector<6x128xf32>
    %268 = arith.addf %264, %267 : vector<6x128xf32>
    %c25_61 = arith.constant 25 : index
    %269 = memref.load %arg2[%c25_61] : memref<160xf32, #tpu.memory_space<smem>>
    %270 = vector.broadcast %269 : f32 to vector<6x128xf32>
    %271 = arith.mulf %1, %270 : vector<6x128xf32>
    %c26_62 = arith.constant 26 : index
    %272 = memref.load %arg2[%c26_62] : memref<160xf32, #tpu.memory_space<smem>>
    %273 = vector.broadcast %272 : f32 to vector<6x128xf32>
    %274 = arith.mulf %2, %273 : vector<6x128xf32>
    %275 = arith.addf %271, %274 : vector<6x128xf32>
    %c27_63 = arith.constant 27 : index
    %276 = memref.load %arg2[%c27_63] : memref<160xf32, #tpu.memory_space<smem>>
    %277 = vector.broadcast %276 : f32 to vector<6x128xf32>
    %278 = arith.mulf %3, %277 : vector<6x128xf32>
    %279 = arith.addf %275, %278 : vector<6x128xf32>
    %c28_64 = arith.constant 28 : index
    %280 = memref.load %arg2[%c28_64] : memref<160xf32, #tpu.memory_space<smem>>
    %281 = vector.broadcast %280 : f32 to vector<6x128xf32>
    %282 = arith.mulf %4, %281 : vector<6x128xf32>
    %283 = arith.addf %279, %282 : vector<6x128xf32>
    %c29_65 = arith.constant 29 : index
    %284 = memref.load %arg2[%c29_65] : memref<160xf32, #tpu.memory_space<smem>>
    %285 = vector.broadcast %284 : f32 to vector<6x128xf32>
    %286 = arith.mulf %5, %285 : vector<6x128xf32>
    %287 = arith.addf %283, %286 : vector<6x128xf32>
    %288 = arith.maximumf %268, %287 : vector<6x128xf32>
    %c5_66 = arith.constant 5 : index
    %289 = memref.load %arg3[%c5_66] : memref<32xf32, #tpu.memory_space<smem>>
    %290 = vector.broadcast %289 : f32 to vector<6x128xf32>
    %291 = arith.addf %288, %290 : vector<6x128xf32>
    %cst_67 = arith.constant 0.000000e+00 : f32
    %292 = vector.broadcast %cst_67 : f32 to vector<6x128xf32>
    %293 = arith.maximumf %291, %292 : vector<6x128xf32>
    %c5_68 = arith.constant 5 : index
    %c0_69 = arith.constant 0 : index
    %c0_70 = arith.constant 0 : index
    %294 = vector.load %arg4[%c5_68, %c0_69, %c0_70] : memref<32x6x1xf32, #tpu.memory_space<vmem>>, vector<1x6x1xf32>
    %295 = vector.shape_cast %294 : vector<1x6x1xf32> to vector<6x1xf32>
    %296 = vector.broadcast %295 : vector<6x1xf32> to vector<6x128xf32>
    %297 = arith.mulf %293, %296 : vector<6x128xf32>
    %298 = arith.addf %249, %297 : vector<6x128xf32>
    %c30 = arith.constant 30 : index
    %299 = memref.load %arg2[%c30] : memref<160xf32, #tpu.memory_space<smem>>
    %300 = vector.broadcast %299 : f32 to vector<6x128xf32>
    %301 = arith.mulf %0, %300 : vector<6x128xf32>
    %c31 = arith.constant 31 : index
    %302 = memref.load %arg2[%c31] : memref<160xf32, #tpu.memory_space<smem>>
    %303 = vector.broadcast %302 : f32 to vector<6x128xf32>
    %304 = arith.mulf %1, %303 : vector<6x128xf32>
    %305 = arith.addf %301, %304 : vector<6x128xf32>
    %c32 = arith.constant 32 : index
    %306 = memref.load %arg2[%c32] : memref<160xf32, #tpu.memory_space<smem>>
    %307 = vector.broadcast %306 : f32 to vector<6x128xf32>
    %308 = arith.mulf %2, %307 : vector<6x128xf32>
    %309 = arith.addf %305, %308 : vector<6x128xf32>
    %c33 = arith.constant 33 : index
    %310 = memref.load %arg2[%c33] : memref<160xf32, #tpu.memory_space<smem>>
    %311 = vector.broadcast %310 : f32 to vector<6x128xf32>
    %312 = arith.mulf %3, %311 : vector<6x128xf32>
    %313 = arith.addf %309, %312 : vector<6x128xf32>
    %c34 = arith.constant 34 : index
    %314 = memref.load %arg2[%c34] : memref<160xf32, #tpu.memory_space<smem>>
    %315 = vector.broadcast %314 : f32 to vector<6x128xf32>
    %316 = arith.mulf %4, %315 : vector<6x128xf32>
    %317 = arith.addf %313, %316 : vector<6x128xf32>
    %c30_71 = arith.constant 30 : index
    %318 = memref.load %arg2[%c30_71] : memref<160xf32, #tpu.memory_space<smem>>
    %319 = vector.broadcast %318 : f32 to vector<6x128xf32>
    %320 = arith.mulf %1, %319 : vector<6x128xf32>
    %c31_72 = arith.constant 31 : index
    %321 = memref.load %arg2[%c31_72] : memref<160xf32, #tpu.memory_space<smem>>
    %322 = vector.broadcast %321 : f32 to vector<6x128xf32>
    %323 = arith.mulf %2, %322 : vector<6x128xf32>
    %324 = arith.addf %320, %323 : vector<6x128xf32>
    %c32_73 = arith.constant 32 : index
    %325 = memref.load %arg2[%c32_73] : memref<160xf32, #tpu.memory_space<smem>>
    %326 = vector.broadcast %325 : f32 to vector<6x128xf32>
    %327 = arith.mulf %3, %326 : vector<6x128xf32>
    %328 = arith.addf %324, %327 : vector<6x128xf32>
    %c33_74 = arith.constant 33 : index
    %329 = memref.load %arg2[%c33_74] : memref<160xf32, #tpu.memory_space<smem>>
    %330 = vector.broadcast %329 : f32 to vector<6x128xf32>
    %331 = arith.mulf %4, %330 : vector<6x128xf32>
    %332 = arith.addf %328, %331 : vector<6x128xf32>
    %c34_75 = arith.constant 34 : index
    %333 = memref.load %arg2[%c34_75] : memref<160xf32, #tpu.memory_space<smem>>
    %334 = vector.broadcast %333 : f32 to vector<6x128xf32>
    %335 = arith.mulf %5, %334 : vector<6x128xf32>
    %336 = arith.addf %332, %335 : vector<6x128xf32>
    %337 = arith.maximumf %317, %336 : vector<6x128xf32>
    %c6_76 = arith.constant 6 : index
    %338 = memref.load %arg3[%c6_76] : memref<32xf32, #tpu.memory_space<smem>>
    %339 = vector.broadcast %338 : f32 to vector<6x128xf32>
    %340 = arith.addf %337, %339 : vector<6x128xf32>
    %cst_77 = arith.constant 0.000000e+00 : f32
    %341 = vector.broadcast %cst_77 : f32 to vector<6x128xf32>
    %342 = arith.maximumf %340, %341 : vector<6x128xf32>
    %c6_78 = arith.constant 6 : index
    %c0_79 = arith.constant 0 : index
    %c0_80 = arith.constant 0 : index
    %343 = vector.load %arg4[%c6_78, %c0_79, %c0_80] : memref<32x6x1xf32, #tpu.memory_space<vmem>>, vector<1x6x1xf32>
    %344 = vector.shape_cast %343 : vector<1x6x1xf32> to vector<6x1xf32>
    %345 = vector.broadcast %344 : vector<6x1xf32> to vector<6x128xf32>
    %346 = arith.mulf %342, %345 : vector<6x128xf32>
    %347 = arith.addf %298, %346 : vector<6x128xf32>
    %c35 = arith.constant 35 : index
    %348 = memref.load %arg2[%c35] : memref<160xf32, #tpu.memory_space<smem>>
    %349 = vector.broadcast %348 : f32 to vector<6x128xf32>
    %350 = arith.mulf %0, %349 : vector<6x128xf32>
    %c36 = arith.constant 36 : index
    %351 = memref.load %arg2[%c36] : memref<160xf32, #tpu.memory_space<smem>>
    %352 = vector.broadcast %351 : f32 to vector<6x128xf32>
    %353 = arith.mulf %1, %352 : vector<6x128xf32>
    %354 = arith.addf %350, %353 : vector<6x128xf32>
    %c37 = arith.constant 37 : index
    %355 = memref.load %arg2[%c37] : memref<160xf32, #tpu.memory_space<smem>>
    %356 = vector.broadcast %355 : f32 to vector<6x128xf32>
    %357 = arith.mulf %2, %356 : vector<6x128xf32>
    %358 = arith.addf %354, %357 : vector<6x128xf32>
    %c38 = arith.constant 38 : index
    %359 = memref.load %arg2[%c38] : memref<160xf32, #tpu.memory_space<smem>>
    %360 = vector.broadcast %359 : f32 to vector<6x128xf32>
    %361 = arith.mulf %3, %360 : vector<6x128xf32>
    %362 = arith.addf %358, %361 : vector<6x128xf32>
    %c39 = arith.constant 39 : index
    %363 = memref.load %arg2[%c39] : memref<160xf32, #tpu.memory_space<smem>>
    %364 = vector.broadcast %363 : f32 to vector<6x128xf32>
    %365 = arith.mulf %4, %364 : vector<6x128xf32>
    %366 = arith.addf %362, %365 : vector<6x128xf32>
    %c35_81 = arith.constant 35 : index
    %367 = memref.load %arg2[%c35_81] : memref<160xf32, #tpu.memory_space<smem>>
    %368 = vector.broadcast %367 : f32 to vector<6x128xf32>
    %369 = arith.mulf %1, %368 : vector<6x128xf32>
    %c36_82 = arith.constant 36 : index
    %370 = memref.load %arg2[%c36_82] : memref<160xf32, #tpu.memory_space<smem>>
    %371 = vector.broadcast %370 : f32 to vector<6x128xf32>
    %372 = arith.mulf %2, %371 : vector<6x128xf32>
    %373 = arith.addf %369, %372 : vector<6x128xf32>
    %c37_83 = arith.constant 37 : index
    %374 = memref.load %arg2[%c37_83] : memref<160xf32, #tpu.memory_space<smem>>
    %375 = vector.broadcast %374 : f32 to vector<6x128xf32>
    %376 = arith.mulf %3, %375 : vector<6x128xf32>
    %377 = arith.addf %373, %376 : vector<6x128xf32>
    %c38_84 = arith.constant 38 : index
    %378 = memref.load %arg2[%c38_84] : memref<160xf32, #tpu.memory_space<smem>>
    %379 = vector.broadcast %378 : f32 to vector<6x128xf32>
    %380 = arith.mulf %4, %379 : vector<6x128xf32>
    %381 = arith.addf %377, %380 : vector<6x128xf32>
    %c39_85 = arith.constant 39 : index
    %382 = memref.load %arg2[%c39_85] : memref<160xf32, #tpu.memory_space<smem>>
    %383 = vector.broadcast %382 : f32 to vector<6x128xf32>
    %384 = arith.mulf %5, %383 : vector<6x128xf32>
    %385 = arith.addf %381, %384 : vector<6x128xf32>
    %386 = arith.maximumf %366, %385 : vector<6x128xf32>
    %c7_86 = arith.constant 7 : index
    %387 = memref.load %arg3[%c7_86] : memref<32xf32, #tpu.memory_space<smem>>
    %388 = vector.broadcast %387 : f32 to vector<6x128xf32>
    %389 = arith.addf %386, %388 : vector<6x128xf32>
    %cst_87 = arith.constant 0.000000e+00 : f32
    %390 = vector.broadcast %cst_87 : f32 to vector<6x128xf32>
    %391 = arith.maximumf %389, %390 : vector<6x128xf32>
    %c7_88 = arith.constant 7 : index
    %c0_89 = arith.constant 0 : index
    %c0_90 = arith.constant 0 : index
    %392 = vector.load %arg4[%c7_88, %c0_89, %c0_90] : memref<32x6x1xf32, #tpu.memory_space<vmem>>, vector<1x6x1xf32>
    %393 = vector.shape_cast %392 : vector<1x6x1xf32> to vector<6x1xf32>
    %394 = vector.broadcast %393 : vector<6x1xf32> to vector<6x128xf32>
    %395 = arith.mulf %391, %394 : vector<6x128xf32>
    %396 = arith.addf %347, %395 : vector<6x128xf32>
    %c40 = arith.constant 40 : index
    %397 = memref.load %arg2[%c40] : memref<160xf32, #tpu.memory_space<smem>>
    %398 = vector.broadcast %397 : f32 to vector<6x128xf32>
    %399 = arith.mulf %0, %398 : vector<6x128xf32>
    %c41 = arith.constant 41 : index
    %400 = memref.load %arg2[%c41] : memref<160xf32, #tpu.memory_space<smem>>
    %401 = vector.broadcast %400 : f32 to vector<6x128xf32>
    %402 = arith.mulf %1, %401 : vector<6x128xf32>
    %403 = arith.addf %399, %402 : vector<6x128xf32>
    %c42 = arith.constant 42 : index
    %404 = memref.load %arg2[%c42] : memref<160xf32, #tpu.memory_space<smem>>
    %405 = vector.broadcast %404 : f32 to vector<6x128xf32>
    %406 = arith.mulf %2, %405 : vector<6x128xf32>
    %407 = arith.addf %403, %406 : vector<6x128xf32>
    %c43 = arith.constant 43 : index
    %408 = memref.load %arg2[%c43] : memref<160xf32, #tpu.memory_space<smem>>
    %409 = vector.broadcast %408 : f32 to vector<6x128xf32>
    %410 = arith.mulf %3, %409 : vector<6x128xf32>
    %411 = arith.addf %407, %410 : vector<6x128xf32>
    %c44 = arith.constant 44 : index
    %412 = memref.load %arg2[%c44] : memref<160xf32, #tpu.memory_space<smem>>
    %413 = vector.broadcast %412 : f32 to vector<6x128xf32>
    %414 = arith.mulf %4, %413 : vector<6x128xf32>
    %415 = arith.addf %411, %414 : vector<6x128xf32>
    %c40_91 = arith.constant 40 : index
    %416 = memref.load %arg2[%c40_91] : memref<160xf32, #tpu.memory_space<smem>>
    %417 = vector.broadcast %416 : f32 to vector<6x128xf32>
    %418 = arith.mulf %1, %417 : vector<6x128xf32>
    %c41_92 = arith.constant 41 : index
    %419 = memref.load %arg2[%c41_92] : memref<160xf32, #tpu.memory_space<smem>>
    %420 = vector.broadcast %419 : f32 to vector<6x128xf32>
    %421 = arith.mulf %2, %420 : vector<6x128xf32>
    %422 = arith.addf %418, %421 : vector<6x128xf32>
    %c42_93 = arith.constant 42 : index
    %423 = memref.load %arg2[%c42_93] : memref<160xf32, #tpu.memory_space<smem>>
    %424 = vector.broadcast %423 : f32 to vector<6x128xf32>
    %425 = arith.mulf %3, %424 : vector<6x128xf32>
    %426 = arith.addf %422, %425 : vector<6x128xf32>
    %c43_94 = arith.constant 43 : index
    %427 = memref.load %arg2[%c43_94] : memref<160xf32, #tpu.memory_space<smem>>
    %428 = vector.broadcast %427 : f32 to vector<6x128xf32>
    %429 = arith.mulf %4, %428 : vector<6x128xf32>
    %430 = arith.addf %426, %429 : vector<6x128xf32>
    %c44_95 = arith.constant 44 : index
    %431 = memref.load %arg2[%c44_95] : memref<160xf32, #tpu.memory_space<smem>>
    %432 = vector.broadcast %431 : f32 to vector<6x128xf32>
    %433 = arith.mulf %5, %432 : vector<6x128xf32>
    %434 = arith.addf %430, %433 : vector<6x128xf32>
    %435 = arith.maximumf %415, %434 : vector<6x128xf32>
    %c8_96 = arith.constant 8 : index
    %436 = memref.load %arg3[%c8_96] : memref<32xf32, #tpu.memory_space<smem>>
    %437 = vector.broadcast %436 : f32 to vector<6x128xf32>
    %438 = arith.addf %435, %437 : vector<6x128xf32>
    %cst_97 = arith.constant 0.000000e+00 : f32
    %439 = vector.broadcast %cst_97 : f32 to vector<6x128xf32>
    %440 = arith.maximumf %438, %439 : vector<6x128xf32>
    %c8_98 = arith.constant 8 : index
    %c0_99 = arith.constant 0 : index
    %c0_100 = arith.constant 0 : index
    %441 = vector.load %arg4[%c8_98, %c0_99, %c0_100] : memref<32x6x1xf32, #tpu.memory_space<vmem>>, vector<1x6x1xf32>
    %442 = vector.shape_cast %441 : vector<1x6x1xf32> to vector<6x1xf32>
    %443 = vector.broadcast %442 : vector<6x1xf32> to vector<6x128xf32>
    %444 = arith.mulf %440, %443 : vector<6x128xf32>
    %445 = arith.addf %396, %444 : vector<6x128xf32>
    %c45 = arith.constant 45 : index
    %446 = memref.load %arg2[%c45] : memref<160xf32, #tpu.memory_space<smem>>
    %447 = vector.broadcast %446 : f32 to vector<6x128xf32>
    %448 = arith.mulf %0, %447 : vector<6x128xf32>
    %c46 = arith.constant 46 : index
    %449 = memref.load %arg2[%c46] : memref<160xf32, #tpu.memory_space<smem>>
    %450 = vector.broadcast %449 : f32 to vector<6x128xf32>
    %451 = arith.mulf %1, %450 : vector<6x128xf32>
    %452 = arith.addf %448, %451 : vector<6x128xf32>
    %c47 = arith.constant 47 : index
    %453 = memref.load %arg2[%c47] : memref<160xf32, #tpu.memory_space<smem>>
    %454 = vector.broadcast %453 : f32 to vector<6x128xf32>
    %455 = arith.mulf %2, %454 : vector<6x128xf32>
    %456 = arith.addf %452, %455 : vector<6x128xf32>
    %c48 = arith.constant 48 : index
    %457 = memref.load %arg2[%c48] : memref<160xf32, #tpu.memory_space<smem>>
    %458 = vector.broadcast %457 : f32 to vector<6x128xf32>
    %459 = arith.mulf %3, %458 : vector<6x128xf32>
    %460 = arith.addf %456, %459 : vector<6x128xf32>
    %c49 = arith.constant 49 : index
    %461 = memref.load %arg2[%c49] : memref<160xf32, #tpu.memory_space<smem>>
    %462 = vector.broadcast %461 : f32 to vector<6x128xf32>
    %463 = arith.mulf %4, %462 : vector<6x128xf32>
    %464 = arith.addf %460, %463 : vector<6x128xf32>
    %c45_101 = arith.constant 45 : index
    %465 = memref.load %arg2[%c45_101] : memref<160xf32, #tpu.memory_space<smem>>
    %466 = vector.broadcast %465 : f32 to vector<6x128xf32>
    %467 = arith.mulf %1, %466 : vector<6x128xf32>
    %c46_102 = arith.constant 46 : index
    %468 = memref.load %arg2[%c46_102] : memref<160xf32, #tpu.memory_space<smem>>
    %469 = vector.broadcast %468 : f32 to vector<6x128xf32>
    %470 = arith.mulf %2, %469 : vector<6x128xf32>
    %471 = arith.addf %467, %470 : vector<6x128xf32>
    %c47_103 = arith.constant 47 : index
    %472 = memref.load %arg2[%c47_103] : memref<160xf32, #tpu.memory_space<smem>>
    %473 = vector.broadcast %472 : f32 to vector<6x128xf32>
    %474 = arith.mulf %3, %473 : vector<6x128xf32>
    %475 = arith.addf %471, %474 : vector<6x128xf32>
    %c48_104 = arith.constant 48 : index
    %476 = memref.load %arg2[%c48_104] : memref<160xf32, #tpu.memory_space<smem>>
    %477 = vector.broadcast %476 : f32 to vector<6x128xf32>
    %478 = arith.mulf %4, %477 : vector<6x128xf32>
    %479 = arith.addf %475, %478 : vector<6x128xf32>
    %c49_105 = arith.constant 49 : index
    %480 = memref.load %arg2[%c49_105] : memref<160xf32, #tpu.memory_space<smem>>
    %481 = vector.broadcast %480 : f32 to vector<6x128xf32>
    %482 = arith.mulf %5, %481 : vector<6x128xf32>
    %483 = arith.addf %479, %482 : vector<6x128xf32>
    %484 = arith.maximumf %464, %483 : vector<6x128xf32>
    %c9_106 = arith.constant 9 : index
    %485 = memref.load %arg3[%c9_106] : memref<32xf32, #tpu.memory_space<smem>>
    %486 = vector.broadcast %485 : f32 to vector<6x128xf32>
    %487 = arith.addf %484, %486 : vector<6x128xf32>
    %cst_107 = arith.constant 0.000000e+00 : f32
    %488 = vector.broadcast %cst_107 : f32 to vector<6x128xf32>
    %489 = arith.maximumf %487, %488 : vector<6x128xf32>
    %c9_108 = arith.constant 9 : index
    %c0_109 = arith.constant 0 : index
    %c0_110 = arith.constant 0 : index
    %490 = vector.load %arg4[%c9_108, %c0_109, %c0_110] : memref<32x6x1xf32, #tpu.memory_space<vmem>>, vector<1x6x1xf32>
    %491 = vector.shape_cast %490 : vector<1x6x1xf32> to vector<6x1xf32>
    %492 = vector.broadcast %491 : vector<6x1xf32> to vector<6x128xf32>
    %493 = arith.mulf %489, %492 : vector<6x128xf32>
    %494 = arith.addf %445, %493 : vector<6x128xf32>
    %c50 = arith.constant 50 : index
    %495 = memref.load %arg2[%c50] : memref<160xf32, #tpu.memory_space<smem>>
    %496 = vector.broadcast %495 : f32 to vector<6x128xf32>
    %497 = arith.mulf %0, %496 : vector<6x128xf32>
    %c51 = arith.constant 51 : index
    %498 = memref.load %arg2[%c51] : memref<160xf32, #tpu.memory_space<smem>>
    %499 = vector.broadcast %498 : f32 to vector<6x128xf32>
    %500 = arith.mulf %1, %499 : vector<6x128xf32>
    %501 = arith.addf %497, %500 : vector<6x128xf32>
    %c52 = arith.constant 52 : index
    %502 = memref.load %arg2[%c52] : memref<160xf32, #tpu.memory_space<smem>>
    %503 = vector.broadcast %502 : f32 to vector<6x128xf32>
    %504 = arith.mulf %2, %503 : vector<6x128xf32>
    %505 = arith.addf %501, %504 : vector<6x128xf32>
    %c53 = arith.constant 53 : index
    %506 = memref.load %arg2[%c53] : memref<160xf32, #tpu.memory_space<smem>>
    %507 = vector.broadcast %506 : f32 to vector<6x128xf32>
    %508 = arith.mulf %3, %507 : vector<6x128xf32>
    %509 = arith.addf %505, %508 : vector<6x128xf32>
    %c54 = arith.constant 54 : index
    %510 = memref.load %arg2[%c54] : memref<160xf32, #tpu.memory_space<smem>>
    %511 = vector.broadcast %510 : f32 to vector<6x128xf32>
    %512 = arith.mulf %4, %511 : vector<6x128xf32>
    %513 = arith.addf %509, %512 : vector<6x128xf32>
    %c50_111 = arith.constant 50 : index
    %514 = memref.load %arg2[%c50_111] : memref<160xf32, #tpu.memory_space<smem>>
    %515 = vector.broadcast %514 : f32 to vector<6x128xf32>
    %516 = arith.mulf %1, %515 : vector<6x128xf32>
    %c51_112 = arith.constant 51 : index
    %517 = memref.load %arg2[%c51_112] : memref<160xf32, #tpu.memory_space<smem>>
    %518 = vector.broadcast %517 : f32 to vector<6x128xf32>
    %519 = arith.mulf %2, %518 : vector<6x128xf32>
    %520 = arith.addf %516, %519 : vector<6x128xf32>
    %c52_113 = arith.constant 52 : index
    %521 = memref.load %arg2[%c52_113] : memref<160xf32, #tpu.memory_space<smem>>
    %522 = vector.broadcast %521 : f32 to vector<6x128xf32>
    %523 = arith.mulf %3, %522 : vector<6x128xf32>
    %524 = arith.addf %520, %523 : vector<6x128xf32>
    %c53_114 = arith.constant 53 : index
    %525 = memref.load %arg2[%c53_114] : memref<160xf32, #tpu.memory_space<smem>>
    %526 = vector.broadcast %525 : f32 to vector<6x128xf32>
    %527 = arith.mulf %4, %526 : vector<6x128xf32>
    %528 = arith.addf %524, %527 : vector<6x128xf32>
    %c54_115 = arith.constant 54 : index
    %529 = memref.load %arg2[%c54_115] : memref<160xf32, #tpu.memory_space<smem>>
    %530 = vector.broadcast %529 : f32 to vector<6x128xf32>
    %531 = arith.mulf %5, %530 : vector<6x128xf32>
    %532 = arith.addf %528, %531 : vector<6x128xf32>
    %533 = arith.maximumf %513, %532 : vector<6x128xf32>
    %c10_116 = arith.constant 10 : index
    %534 = memref.load %arg3[%c10_116] : memref<32xf32, #tpu.memory_space<smem>>
    %535 = vector.broadcast %534 : f32 to vector<6x128xf32>
    %536 = arith.addf %533, %535 : vector<6x128xf32>
    %cst_117 = arith.constant 0.000000e+00 : f32
    %537 = vector.broadcast %cst_117 : f32 to vector<6x128xf32>
    %538 = arith.maximumf %536, %537 : vector<6x128xf32>
    %c10_118 = arith.constant 10 : index
    %c0_119 = arith.constant 0 : index
    %c0_120 = arith.constant 0 : index
    %539 = vector.load %arg4[%c10_118, %c0_119, %c0_120] : memref<32x6x1xf32, #tpu.memory_space<vmem>>, vector<1x6x1xf32>
    %540 = vector.shape_cast %539 : vector<1x6x1xf32> to vector<6x1xf32>
    %541 = vector.broadcast %540 : vector<6x1xf32> to vector<6x128xf32>
    %542 = arith.mulf %538, %541 : vector<6x128xf32>
    %543 = arith.addf %494, %542 : vector<6x128xf32>
    %c55 = arith.constant 55 : index
    %544 = memref.load %arg2[%c55] : memref<160xf32, #tpu.memory_space<smem>>
    %545 = vector.broadcast %544 : f32 to vector<6x128xf32>
    %546 = arith.mulf %0, %545 : vector<6x128xf32>
    %c56 = arith.constant 56 : index
    %547 = memref.load %arg2[%c56] : memref<160xf32, #tpu.memory_space<smem>>
    %548 = vector.broadcast %547 : f32 to vector<6x128xf32>
    %549 = arith.mulf %1, %548 : vector<6x128xf32>
    %550 = arith.addf %546, %549 : vector<6x128xf32>
    %c57 = arith.constant 57 : index
    %551 = memref.load %arg2[%c57] : memref<160xf32, #tpu.memory_space<smem>>
    %552 = vector.broadcast %551 : f32 to vector<6x128xf32>
    %553 = arith.mulf %2, %552 : vector<6x128xf32>
    %554 = arith.addf %550, %553 : vector<6x128xf32>
    %c58 = arith.constant 58 : index
    %555 = memref.load %arg2[%c58] : memref<160xf32, #tpu.memory_space<smem>>
    %556 = vector.broadcast %555 : f32 to vector<6x128xf32>
    %557 = arith.mulf %3, %556 : vector<6x128xf32>
    %558 = arith.addf %554, %557 : vector<6x128xf32>
    %c59 = arith.constant 59 : index
    %559 = memref.load %arg2[%c59] : memref<160xf32, #tpu.memory_space<smem>>
    %560 = vector.broadcast %559 : f32 to vector<6x128xf32>
    %561 = arith.mulf %4, %560 : vector<6x128xf32>
    %562 = arith.addf %558, %561 : vector<6x128xf32>
    %c55_121 = arith.constant 55 : index
    %563 = memref.load %arg2[%c55_121] : memref<160xf32, #tpu.memory_space<smem>>
    %564 = vector.broadcast %563 : f32 to vector<6x128xf32>
    %565 = arith.mulf %1, %564 : vector<6x128xf32>
    %c56_122 = arith.constant 56 : index
    %566 = memref.load %arg2[%c56_122] : memref<160xf32, #tpu.memory_space<smem>>
    %567 = vector.broadcast %566 : f32 to vector<6x128xf32>
    %568 = arith.mulf %2, %567 : vector<6x128xf32>
    %569 = arith.addf %565, %568 : vector<6x128xf32>
    %c57_123 = arith.constant 57 : index
    %570 = memref.load %arg2[%c57_123] : memref<160xf32, #tpu.memory_space<smem>>
    %571 = vector.broadcast %570 : f32 to vector<6x128xf32>
    %572 = arith.mulf %3, %571 : vector<6x128xf32>
    %573 = arith.addf %569, %572 : vector<6x128xf32>
    %c58_124 = arith.constant 58 : index
    %574 = memref.load %arg2[%c58_124] : memref<160xf32, #tpu.memory_space<smem>>
    %575 = vector.broadcast %574 : f32 to vector<6x128xf32>
    %576 = arith.mulf %4, %575 : vector<6x128xf32>
    %577 = arith.addf %573, %576 : vector<6x128xf32>
    %c59_125 = arith.constant 59 : index
    %578 = memref.load %arg2[%c59_125] : memref<160xf32, #tpu.memory_space<smem>>
    %579 = vector.broadcast %578 : f32 to vector<6x128xf32>
    %580 = arith.mulf %5, %579 : vector<6x128xf32>
    %581 = arith.addf %577, %580 : vector<6x128xf32>
    %582 = arith.maximumf %562, %581 : vector<6x128xf32>
    %c11_126 = arith.constant 11 : index
    %583 = memref.load %arg3[%c11_126] : memref<32xf32, #tpu.memory_space<smem>>
    %584 = vector.broadcast %583 : f32 to vector<6x128xf32>
    %585 = arith.addf %582, %584 : vector<6x128xf32>
    %cst_127 = arith.constant 0.000000e+00 : f32
    %586 = vector.broadcast %cst_127 : f32 to vector<6x128xf32>
    %587 = arith.maximumf %585, %586 : vector<6x128xf32>
    %c11_128 = arith.constant 11 : index
    %c0_129 = arith.constant 0 : index
    %c0_130 = arith.constant 0 : index
    %588 = vector.load %arg4[%c11_128, %c0_129, %c0_130] : memref<32x6x1xf32, #tpu.memory_space<vmem>>, vector<1x6x1xf32>
    %589 = vector.shape_cast %588 : vector<1x6x1xf32> to vector<6x1xf32>
    %590 = vector.broadcast %589 : vector<6x1xf32> to vector<6x128xf32>
    %591 = arith.mulf %587, %590 : vector<6x128xf32>
    %592 = arith.addf %543, %591 : vector<6x128xf32>
    %c60 = arith.constant 60 : index
    %593 = memref.load %arg2[%c60] : memref<160xf32, #tpu.memory_space<smem>>
    %594 = vector.broadcast %593 : f32 to vector<6x128xf32>
    %595 = arith.mulf %0, %594 : vector<6x128xf32>
    %c61 = arith.constant 61 : index
    %596 = memref.load %arg2[%c61] : memref<160xf32, #tpu.memory_space<smem>>
    %597 = vector.broadcast %596 : f32 to vector<6x128xf32>
    %598 = arith.mulf %1, %597 : vector<6x128xf32>
    %599 = arith.addf %595, %598 : vector<6x128xf32>
    %c62 = arith.constant 62 : index
    %600 = memref.load %arg2[%c62] : memref<160xf32, #tpu.memory_space<smem>>
    %601 = vector.broadcast %600 : f32 to vector<6x128xf32>
    %602 = arith.mulf %2, %601 : vector<6x128xf32>
    %603 = arith.addf %599, %602 : vector<6x128xf32>
    %c63 = arith.constant 63 : index
    %604 = memref.load %arg2[%c63] : memref<160xf32, #tpu.memory_space<smem>>
    %605 = vector.broadcast %604 : f32 to vector<6x128xf32>
    %606 = arith.mulf %3, %605 : vector<6x128xf32>
    %607 = arith.addf %603, %606 : vector<6x128xf32>
    %c64 = arith.constant 64 : index
    %608 = memref.load %arg2[%c64] : memref<160xf32, #tpu.memory_space<smem>>
    %609 = vector.broadcast %608 : f32 to vector<6x128xf32>
    %610 = arith.mulf %4, %609 : vector<6x128xf32>
    %611 = arith.addf %607, %610 : vector<6x128xf32>
    %c60_131 = arith.constant 60 : index
    %612 = memref.load %arg2[%c60_131] : memref<160xf32, #tpu.memory_space<smem>>
    %613 = vector.broadcast %612 : f32 to vector<6x128xf32>
    %614 = arith.mulf %1, %613 : vector<6x128xf32>
    %c61_132 = arith.constant 61 : index
    %615 = memref.load %arg2[%c61_132] : memref<160xf32, #tpu.memory_space<smem>>
    %616 = vector.broadcast %615 : f32 to vector<6x128xf32>
    %617 = arith.mulf %2, %616 : vector<6x128xf32>
    %618 = arith.addf %614, %617 : vector<6x128xf32>
    %c62_133 = arith.constant 62 : index
    %619 = memref.load %arg2[%c62_133] : memref<160xf32, #tpu.memory_space<smem>>
    %620 = vector.broadcast %619 : f32 to vector<6x128xf32>
    %621 = arith.mulf %3, %620 : vector<6x128xf32>
    %622 = arith.addf %618, %621 : vector<6x128xf32>
    %c63_134 = arith.constant 63 : index
    %623 = memref.load %arg2[%c63_134] : memref<160xf32, #tpu.memory_space<smem>>
    %624 = vector.broadcast %623 : f32 to vector<6x128xf32>
    %625 = arith.mulf %4, %624 : vector<6x128xf32>
    %626 = arith.addf %622, %625 : vector<6x128xf32>
    %c64_135 = arith.constant 64 : index
    %627 = memref.load %arg2[%c64_135] : memref<160xf32, #tpu.memory_space<smem>>
    %628 = vector.broadcast %627 : f32 to vector<6x128xf32>
    %629 = arith.mulf %5, %628 : vector<6x128xf32>
    %630 = arith.addf %626, %629 : vector<6x128xf32>
    %631 = arith.maximumf %611, %630 : vector<6x128xf32>
    %c12_136 = arith.constant 12 : index
    %632 = memref.load %arg3[%c12_136] : memref<32xf32, #tpu.memory_space<smem>>
    %633 = vector.broadcast %632 : f32 to vector<6x128xf32>
    %634 = arith.addf %631, %633 : vector<6x128xf32>
    %cst_137 = arith.constant 0.000000e+00 : f32
    %635 = vector.broadcast %cst_137 : f32 to vector<6x128xf32>
    %636 = arith.maximumf %634, %635 : vector<6x128xf32>
    %c12_138 = arith.constant 12 : index
    %c0_139 = arith.constant 0 : index
    %c0_140 = arith.constant 0 : index
    %637 = vector.load %arg4[%c12_138, %c0_139, %c0_140] : memref<32x6x1xf32, #tpu.memory_space<vmem>>, vector<1x6x1xf32>
    %638 = vector.shape_cast %637 : vector<1x6x1xf32> to vector<6x1xf32>
    %639 = vector.broadcast %638 : vector<6x1xf32> to vector<6x128xf32>
    %640 = arith.mulf %636, %639 : vector<6x128xf32>
    %641 = arith.addf %592, %640 : vector<6x128xf32>
    %c65 = arith.constant 65 : index
    %642 = memref.load %arg2[%c65] : memref<160xf32, #tpu.memory_space<smem>>
    %643 = vector.broadcast %642 : f32 to vector<6x128xf32>
    %644 = arith.mulf %0, %643 : vector<6x128xf32>
    %c66 = arith.constant 66 : index
    %645 = memref.load %arg2[%c66] : memref<160xf32, #tpu.memory_space<smem>>
    %646 = vector.broadcast %645 : f32 to vector<6x128xf32>
    %647 = arith.mulf %1, %646 : vector<6x128xf32>
    %648 = arith.addf %644, %647 : vector<6x128xf32>
    %c67 = arith.constant 67 : index
    %649 = memref.load %arg2[%c67] : memref<160xf32, #tpu.memory_space<smem>>
    %650 = vector.broadcast %649 : f32 to vector<6x128xf32>
    %651 = arith.mulf %2, %650 : vector<6x128xf32>
    %652 = arith.addf %648, %651 : vector<6x128xf32>
    %c68 = arith.constant 68 : index
    %653 = memref.load %arg2[%c68] : memref<160xf32, #tpu.memory_space<smem>>
    %654 = vector.broadcast %653 : f32 to vector<6x128xf32>
    %655 = arith.mulf %3, %654 : vector<6x128xf32>
    %656 = arith.addf %652, %655 : vector<6x128xf32>
    %c69 = arith.constant 69 : index
    %657 = memref.load %arg2[%c69] : memref<160xf32, #tpu.memory_space<smem>>
    %658 = vector.broadcast %657 : f32 to vector<6x128xf32>
    %659 = arith.mulf %4, %658 : vector<6x128xf32>
    %660 = arith.addf %656, %659 : vector<6x128xf32>
    %c65_141 = arith.constant 65 : index
    %661 = memref.load %arg2[%c65_141] : memref<160xf32, #tpu.memory_space<smem>>
    %662 = vector.broadcast %661 : f32 to vector<6x128xf32>
    %663 = arith.mulf %1, %662 : vector<6x128xf32>
    %c66_142 = arith.constant 66 : index
    %664 = memref.load %arg2[%c66_142] : memref<160xf32, #tpu.memory_space<smem>>
    %665 = vector.broadcast %664 : f32 to vector<6x128xf32>
    %666 = arith.mulf %2, %665 : vector<6x128xf32>
    %667 = arith.addf %663, %666 : vector<6x128xf32>
    %c67_143 = arith.constant 67 : index
    %668 = memref.load %arg2[%c67_143] : memref<160xf32, #tpu.memory_space<smem>>
    %669 = vector.broadcast %668 : f32 to vector<6x128xf32>
    %670 = arith.mulf %3, %669 : vector<6x128xf32>
    %671 = arith.addf %667, %670 : vector<6x128xf32>
    %c68_144 = arith.constant 68 : index
    %672 = memref.load %arg2[%c68_144] : memref<160xf32, #tpu.memory_space<smem>>
    %673 = vector.broadcast %672 : f32 to vector<6x128xf32>
    %674 = arith.mulf %4, %673 : vector<6x128xf32>
    %675 = arith.addf %671, %674 : vector<6x128xf32>
    %c69_145 = arith.constant 69 : index
    %676 = memref.load %arg2[%c69_145] : memref<160xf32, #tpu.memory_space<smem>>
    %677 = vector.broadcast %676 : f32 to vector<6x128xf32>
    %678 = arith.mulf %5, %677 : vector<6x128xf32>
    %679 = arith.addf %675, %678 : vector<6x128xf32>
    %680 = arith.maximumf %660, %679 : vector<6x128xf32>
    %c13_146 = arith.constant 13 : index
    %681 = memref.load %arg3[%c13_146] : memref<32xf32, #tpu.memory_space<smem>>
    %682 = vector.broadcast %681 : f32 to vector<6x128xf32>
    %683 = arith.addf %680, %682 : vector<6x128xf32>
    %cst_147 = arith.constant 0.000000e+00 : f32
    %684 = vector.broadcast %cst_147 : f32 to vector<6x128xf32>
    %685 = arith.maximumf %683, %684 : vector<6x128xf32>
    %c13_148 = arith.constant 13 : index
    %c0_149 = arith.constant 0 : index
    %c0_150 = arith.constant 0 : index
    %686 = vector.load %arg4[%c13_148, %c0_149, %c0_150] : memref<32x6x1xf32, #tpu.memory_space<vmem>>, vector<1x6x1xf32>
    %687 = vector.shape_cast %686 : vector<1x6x1xf32> to vector<6x1xf32>
    %688 = vector.broadcast %687 : vector<6x1xf32> to vector<6x128xf32>
    %689 = arith.mulf %685, %688 : vector<6x128xf32>
    %690 = arith.addf %641, %689 : vector<6x128xf32>
    %c70 = arith.constant 70 : index
    %691 = memref.load %arg2[%c70] : memref<160xf32, #tpu.memory_space<smem>>
    %692 = vector.broadcast %691 : f32 to vector<6x128xf32>
    %693 = arith.mulf %0, %692 : vector<6x128xf32>
    %c71 = arith.constant 71 : index
    %694 = memref.load %arg2[%c71] : memref<160xf32, #tpu.memory_space<smem>>
    %695 = vector.broadcast %694 : f32 to vector<6x128xf32>
    %696 = arith.mulf %1, %695 : vector<6x128xf32>
    %697 = arith.addf %693, %696 : vector<6x128xf32>
    %c72 = arith.constant 72 : index
    %698 = memref.load %arg2[%c72] : memref<160xf32, #tpu.memory_space<smem>>
    %699 = vector.broadcast %698 : f32 to vector<6x128xf32>
    %700 = arith.mulf %2, %699 : vector<6x128xf32>
    %701 = arith.addf %697, %700 : vector<6x128xf32>
    %c73 = arith.constant 73 : index
    %702 = memref.load %arg2[%c73] : memref<160xf32, #tpu.memory_space<smem>>
    %703 = vector.broadcast %702 : f32 to vector<6x128xf32>
    %704 = arith.mulf %3, %703 : vector<6x128xf32>
    %705 = arith.addf %701, %704 : vector<6x128xf32>
    %c74 = arith.constant 74 : index
    %706 = memref.load %arg2[%c74] : memref<160xf32, #tpu.memory_space<smem>>
    %707 = vector.broadcast %706 : f32 to vector<6x128xf32>
    %708 = arith.mulf %4, %707 : vector<6x128xf32>
    %709 = arith.addf %705, %708 : vector<6x128xf32>
    %c70_151 = arith.constant 70 : index
    %710 = memref.load %arg2[%c70_151] : memref<160xf32, #tpu.memory_space<smem>>
    %711 = vector.broadcast %710 : f32 to vector<6x128xf32>
    %712 = arith.mulf %1, %711 : vector<6x128xf32>
    %c71_152 = arith.constant 71 : index
    %713 = memref.load %arg2[%c71_152] : memref<160xf32, #tpu.memory_space<smem>>
    %714 = vector.broadcast %713 : f32 to vector<6x128xf32>
    %715 = arith.mulf %2, %714 : vector<6x128xf32>
    %716 = arith.addf %712, %715 : vector<6x128xf32>
    %c72_153 = arith.constant 72 : index
    %717 = memref.load %arg2[%c72_153] : memref<160xf32, #tpu.memory_space<smem>>
    %718 = vector.broadcast %717 : f32 to vector<6x128xf32>
    %719 = arith.mulf %3, %718 : vector<6x128xf32>
    %720 = arith.addf %716, %719 : vector<6x128xf32>
    %c73_154 = arith.constant 73 : index
    %721 = memref.load %arg2[%c73_154] : memref<160xf32, #tpu.memory_space<smem>>
    %722 = vector.broadcast %721 : f32 to vector<6x128xf32>
    %723 = arith.mulf %4, %722 : vector<6x128xf32>
    %724 = arith.addf %720, %723 : vector<6x128xf32>
    %c74_155 = arith.constant 74 : index
    %725 = memref.load %arg2[%c74_155] : memref<160xf32, #tpu.memory_space<smem>>
    %726 = vector.broadcast %725 : f32 to vector<6x128xf32>
    %727 = arith.mulf %5, %726 : vector<6x128xf32>
    %728 = arith.addf %724, %727 : vector<6x128xf32>
    %729 = arith.maximumf %709, %728 : vector<6x128xf32>
    %c14_156 = arith.constant 14 : index
    %730 = memref.load %arg3[%c14_156] : memref<32xf32, #tpu.memory_space<smem>>
    %731 = vector.broadcast %730 : f32 to vector<6x128xf32>
    %732 = arith.addf %729, %731 : vector<6x128xf32>
    %cst_157 = arith.constant 0.000000e+00 : f32
    %733 = vector.broadcast %cst_157 : f32 to vector<6x128xf32>
    %734 = arith.maximumf %732, %733 : vector<6x128xf32>
    %c14_158 = arith.constant 14 : index
    %c0_159 = arith.constant 0 : index
    %c0_160 = arith.constant 0 : index
    %735 = vector.load %arg4[%c14_158, %c0_159, %c0_160] : memref<32x6x1xf32, #tpu.memory_space<vmem>>, vector<1x6x1xf32>
    %736 = vector.shape_cast %735 : vector<1x6x1xf32> to vector<6x1xf32>
    %737 = vector.broadcast %736 : vector<6x1xf32> to vector<6x128xf32>
    %738 = arith.mulf %734, %737 : vector<6x128xf32>
    %739 = arith.addf %690, %738 : vector<6x128xf32>
    %c75 = arith.constant 75 : index
    %740 = memref.load %arg2[%c75] : memref<160xf32, #tpu.memory_space<smem>>
    %741 = vector.broadcast %740 : f32 to vector<6x128xf32>
    %742 = arith.mulf %0, %741 : vector<6x128xf32>
    %c76 = arith.constant 76 : index
    %743 = memref.load %arg2[%c76] : memref<160xf32, #tpu.memory_space<smem>>
    %744 = vector.broadcast %743 : f32 to vector<6x128xf32>
    %745 = arith.mulf %1, %744 : vector<6x128xf32>
    %746 = arith.addf %742, %745 : vector<6x128xf32>
    %c77 = arith.constant 77 : index
    %747 = memref.load %arg2[%c77] : memref<160xf32, #tpu.memory_space<smem>>
    %748 = vector.broadcast %747 : f32 to vector<6x128xf32>
    %749 = arith.mulf %2, %748 : vector<6x128xf32>
    %750 = arith.addf %746, %749 : vector<6x128xf32>
    %c78 = arith.constant 78 : index
    %751 = memref.load %arg2[%c78] : memref<160xf32, #tpu.memory_space<smem>>
    %752 = vector.broadcast %751 : f32 to vector<6x128xf32>
    %753 = arith.mulf %3, %752 : vector<6x128xf32>
    %754 = arith.addf %750, %753 : vector<6x128xf32>
    %c79 = arith.constant 79 : index
    %755 = memref.load %arg2[%c79] : memref<160xf32, #tpu.memory_space<smem>>
    %756 = vector.broadcast %755 : f32 to vector<6x128xf32>
    %757 = arith.mulf %4, %756 : vector<6x128xf32>
    %758 = arith.addf %754, %757 : vector<6x128xf32>
    %c75_161 = arith.constant 75 : index
    %759 = memref.load %arg2[%c75_161] : memref<160xf32, #tpu.memory_space<smem>>
    %760 = vector.broadcast %759 : f32 to vector<6x128xf32>
    %761 = arith.mulf %1, %760 : vector<6x128xf32>
    %c76_162 = arith.constant 76 : index
    %762 = memref.load %arg2[%c76_162] : memref<160xf32, #tpu.memory_space<smem>>
    %763 = vector.broadcast %762 : f32 to vector<6x128xf32>
    %764 = arith.mulf %2, %763 : vector<6x128xf32>
    %765 = arith.addf %761, %764 : vector<6x128xf32>
    %c77_163 = arith.constant 77 : index
    %766 = memref.load %arg2[%c77_163] : memref<160xf32, #tpu.memory_space<smem>>
    %767 = vector.broadcast %766 : f32 to vector<6x128xf32>
    %768 = arith.mulf %3, %767 : vector<6x128xf32>
    %769 = arith.addf %765, %768 : vector<6x128xf32>
    %c78_164 = arith.constant 78 : index
    %770 = memref.load %arg2[%c78_164] : memref<160xf32, #tpu.memory_space<smem>>
    %771 = vector.broadcast %770 : f32 to vector<6x128xf32>
    %772 = arith.mulf %4, %771 : vector<6x128xf32>
    %773 = arith.addf %769, %772 : vector<6x128xf32>
    %c79_165 = arith.constant 79 : index
    %774 = memref.load %arg2[%c79_165] : memref<160xf32, #tpu.memory_space<smem>>
    %775 = vector.broadcast %774 : f32 to vector<6x128xf32>
    %776 = arith.mulf %5, %775 : vector<6x128xf32>
    %777 = arith.addf %773, %776 : vector<6x128xf32>
    %778 = arith.maximumf %758, %777 : vector<6x128xf32>
    %c15_166 = arith.constant 15 : index
    %779 = memref.load %arg3[%c15_166] : memref<32xf32, #tpu.memory_space<smem>>
    %780 = vector.broadcast %779 : f32 to vector<6x128xf32>
    %781 = arith.addf %778, %780 : vector<6x128xf32>
    %cst_167 = arith.constant 0.000000e+00 : f32
    %782 = vector.broadcast %cst_167 : f32 to vector<6x128xf32>
    %783 = arith.maximumf %781, %782 : vector<6x128xf32>
    %c15_168 = arith.constant 15 : index
    %c0_169 = arith.constant 0 : index
    %c0_170 = arith.constant 0 : index
    %784 = vector.load %arg4[%c15_168, %c0_169, %c0_170] : memref<32x6x1xf32, #tpu.memory_space<vmem>>, vector<1x6x1xf32>
    %785 = vector.shape_cast %784 : vector<1x6x1xf32> to vector<6x1xf32>
    %786 = vector.broadcast %785 : vector<6x1xf32> to vector<6x128xf32>
    %787 = arith.mulf %783, %786 : vector<6x128xf32>
    %788 = arith.addf %739, %787 : vector<6x128xf32>
    %c80 = arith.constant 80 : index
    %789 = memref.load %arg2[%c80] : memref<160xf32, #tpu.memory_space<smem>>
    %790 = vector.broadcast %789 : f32 to vector<6x128xf32>
    %791 = arith.mulf %0, %790 : vector<6x128xf32>
    %c81 = arith.constant 81 : index
    %792 = memref.load %arg2[%c81] : memref<160xf32, #tpu.memory_space<smem>>
    %793 = vector.broadcast %792 : f32 to vector<6x128xf32>
    %794 = arith.mulf %1, %793 : vector<6x128xf32>
    %795 = arith.addf %791, %794 : vector<6x128xf32>
    %c82 = arith.constant 82 : index
    %796 = memref.load %arg2[%c82] : memref<160xf32, #tpu.memory_space<smem>>
    %797 = vector.broadcast %796 : f32 to vector<6x128xf32>
    %798 = arith.mulf %2, %797 : vector<6x128xf32>
    %799 = arith.addf %795, %798 : vector<6x128xf32>
    %c83 = arith.constant 83 : index
    %800 = memref.load %arg2[%c83] : memref<160xf32, #tpu.memory_space<smem>>
    %801 = vector.broadcast %800 : f32 to vector<6x128xf32>
    %802 = arith.mulf %3, %801 : vector<6x128xf32>
    %803 = arith.addf %799, %802 : vector<6x128xf32>
    %c84 = arith.constant 84 : index
    %804 = memref.load %arg2[%c84] : memref<160xf32, #tpu.memory_space<smem>>
    %805 = vector.broadcast %804 : f32 to vector<6x128xf32>
    %806 = arith.mulf %4, %805 : vector<6x128xf32>
    %807 = arith.addf %803, %806 : vector<6x128xf32>
    %c80_171 = arith.constant 80 : index
    %808 = memref.load %arg2[%c80_171] : memref<160xf32, #tpu.memory_space<smem>>
    %809 = vector.broadcast %808 : f32 to vector<6x128xf32>
    %810 = arith.mulf %1, %809 : vector<6x128xf32>
    %c81_172 = arith.constant 81 : index
    %811 = memref.load %arg2[%c81_172] : memref<160xf32, #tpu.memory_space<smem>>
    %812 = vector.broadcast %811 : f32 to vector<6x128xf32>
    %813 = arith.mulf %2, %812 : vector<6x128xf32>
    %814 = arith.addf %810, %813 : vector<6x128xf32>
    %c82_173 = arith.constant 82 : index
    %815 = memref.load %arg2[%c82_173] : memref<160xf32, #tpu.memory_space<smem>>
    %816 = vector.broadcast %815 : f32 to vector<6x128xf32>
    %817 = arith.mulf %3, %816 : vector<6x128xf32>
    %818 = arith.addf %814, %817 : vector<6x128xf32>
    %c83_174 = arith.constant 83 : index
    %819 = memref.load %arg2[%c83_174] : memref<160xf32, #tpu.memory_space<smem>>
    %820 = vector.broadcast %819 : f32 to vector<6x128xf32>
    %821 = arith.mulf %4, %820 : vector<6x128xf32>
    %822 = arith.addf %818, %821 : vector<6x128xf32>
    %c84_175 = arith.constant 84 : index
    %823 = memref.load %arg2[%c84_175] : memref<160xf32, #tpu.memory_space<smem>>
    %824 = vector.broadcast %823 : f32 to vector<6x128xf32>
    %825 = arith.mulf %5, %824 : vector<6x128xf32>
    %826 = arith.addf %822, %825 : vector<6x128xf32>
    %827 = arith.maximumf %807, %826 : vector<6x128xf32>
    %c16_176 = arith.constant 16 : index
    %828 = memref.load %arg3[%c16_176] : memref<32xf32, #tpu.memory_space<smem>>
    %829 = vector.broadcast %828 : f32 to vector<6x128xf32>
    %830 = arith.addf %827, %829 : vector<6x128xf32>
    %cst_177 = arith.constant 0.000000e+00 : f32
    %831 = vector.broadcast %cst_177 : f32 to vector<6x128xf32>
    %832 = arith.maximumf %830, %831 : vector<6x128xf32>
    %c16_178 = arith.constant 16 : index
    %c0_179 = arith.constant 0 : index
    %c0_180 = arith.constant 0 : index
    %833 = vector.load %arg4[%c16_178, %c0_179, %c0_180] : memref<32x6x1xf32, #tpu.memory_space<vmem>>, vector<1x6x1xf32>
    %834 = vector.shape_cast %833 : vector<1x6x1xf32> to vector<6x1xf32>
    %835 = vector.broadcast %834 : vector<6x1xf32> to vector<6x128xf32>
    %836 = arith.mulf %832, %835 : vector<6x128xf32>
    %837 = arith.addf %788, %836 : vector<6x128xf32>
    %c85 = arith.constant 85 : index
    %838 = memref.load %arg2[%c85] : memref<160xf32, #tpu.memory_space<smem>>
    %839 = vector.broadcast %838 : f32 to vector<6x128xf32>
    %840 = arith.mulf %0, %839 : vector<6x128xf32>
    %c86 = arith.constant 86 : index
    %841 = memref.load %arg2[%c86] : memref<160xf32, #tpu.memory_space<smem>>
    %842 = vector.broadcast %841 : f32 to vector<6x128xf32>
    %843 = arith.mulf %1, %842 : vector<6x128xf32>
    %844 = arith.addf %840, %843 : vector<6x128xf32>
    %c87 = arith.constant 87 : index
    %845 = memref.load %arg2[%c87] : memref<160xf32, #tpu.memory_space<smem>>
    %846 = vector.broadcast %845 : f32 to vector<6x128xf32>
    %847 = arith.mulf %2, %846 : vector<6x128xf32>
    %848 = arith.addf %844, %847 : vector<6x128xf32>
    %c88 = arith.constant 88 : index
    %849 = memref.load %arg2[%c88] : memref<160xf32, #tpu.memory_space<smem>>
    %850 = vector.broadcast %849 : f32 to vector<6x128xf32>
    %851 = arith.mulf %3, %850 : vector<6x128xf32>
    %852 = arith.addf %848, %851 : vector<6x128xf32>
    %c89 = arith.constant 89 : index
    %853 = memref.load %arg2[%c89] : memref<160xf32, #tpu.memory_space<smem>>
    %854 = vector.broadcast %853 : f32 to vector<6x128xf32>
    %855 = arith.mulf %4, %854 : vector<6x128xf32>
    %856 = arith.addf %852, %855 : vector<6x128xf32>
    %c85_181 = arith.constant 85 : index
    %857 = memref.load %arg2[%c85_181] : memref<160xf32, #tpu.memory_space<smem>>
    %858 = vector.broadcast %857 : f32 to vector<6x128xf32>
    %859 = arith.mulf %1, %858 : vector<6x128xf32>
    %c86_182 = arith.constant 86 : index
    %860 = memref.load %arg2[%c86_182] : memref<160xf32, #tpu.memory_space<smem>>
    %861 = vector.broadcast %860 : f32 to vector<6x128xf32>
    %862 = arith.mulf %2, %861 : vector<6x128xf32>
    %863 = arith.addf %859, %862 : vector<6x128xf32>
    %c87_183 = arith.constant 87 : index
    %864 = memref.load %arg2[%c87_183] : memref<160xf32, #tpu.memory_space<smem>>
    %865 = vector.broadcast %864 : f32 to vector<6x128xf32>
    %866 = arith.mulf %3, %865 : vector<6x128xf32>
    %867 = arith.addf %863, %866 : vector<6x128xf32>
    %c88_184 = arith.constant 88 : index
    %868 = memref.load %arg2[%c88_184] : memref<160xf32, #tpu.memory_space<smem>>
    %869 = vector.broadcast %868 : f32 to vector<6x128xf32>
    %870 = arith.mulf %4, %869 : vector<6x128xf32>
    %871 = arith.addf %867, %870 : vector<6x128xf32>
    %c89_185 = arith.constant 89 : index
    %872 = memref.load %arg2[%c89_185] : memref<160xf32, #tpu.memory_space<smem>>
    %873 = vector.broadcast %872 : f32 to vector<6x128xf32>
    %874 = arith.mulf %5, %873 : vector<6x128xf32>
    %875 = arith.addf %871, %874 : vector<6x128xf32>
    %876 = arith.maximumf %856, %875 : vector<6x128xf32>
    %c17_186 = arith.constant 17 : index
    %877 = memref.load %arg3[%c17_186] : memref<32xf32, #tpu.memory_space<smem>>
    %878 = vector.broadcast %877 : f32 to vector<6x128xf32>
    %879 = arith.addf %876, %878 : vector<6x128xf32>
    %cst_187 = arith.constant 0.000000e+00 : f32
    %880 = vector.broadcast %cst_187 : f32 to vector<6x128xf32>
    %881 = arith.maximumf %879, %880 : vector<6x128xf32>
    %c17_188 = arith.constant 17 : index
    %c0_189 = arith.constant 0 : index
    %c0_190 = arith.constant 0 : index
    %882 = vector.load %arg4[%c17_188, %c0_189, %c0_190] : memref<32x6x1xf32, #tpu.memory_space<vmem>>, vector<1x6x1xf32>
    %883 = vector.shape_cast %882 : vector<1x6x1xf32> to vector<6x1xf32>
    %884 = vector.broadcast %883 : vector<6x1xf32> to vector<6x128xf32>
    %885 = arith.mulf %881, %884 : vector<6x128xf32>
    %886 = arith.addf %837, %885 : vector<6x128xf32>
    %c90 = arith.constant 90 : index
    %887 = memref.load %arg2[%c90] : memref<160xf32, #tpu.memory_space<smem>>
    %888 = vector.broadcast %887 : f32 to vector<6x128xf32>
    %889 = arith.mulf %0, %888 : vector<6x128xf32>
    %c91 = arith.constant 91 : index
    %890 = memref.load %arg2[%c91] : memref<160xf32, #tpu.memory_space<smem>>
    %891 = vector.broadcast %890 : f32 to vector<6x128xf32>
    %892 = arith.mulf %1, %891 : vector<6x128xf32>
    %893 = arith.addf %889, %892 : vector<6x128xf32>
    %c92 = arith.constant 92 : index
    %894 = memref.load %arg2[%c92] : memref<160xf32, #tpu.memory_space<smem>>
    %895 = vector.broadcast %894 : f32 to vector<6x128xf32>
    %896 = arith.mulf %2, %895 : vector<6x128xf32>
    %897 = arith.addf %893, %896 : vector<6x128xf32>
    %c93 = arith.constant 93 : index
    %898 = memref.load %arg2[%c93] : memref<160xf32, #tpu.memory_space<smem>>
    %899 = vector.broadcast %898 : f32 to vector<6x128xf32>
    %900 = arith.mulf %3, %899 : vector<6x128xf32>
    %901 = arith.addf %897, %900 : vector<6x128xf32>
    %c94 = arith.constant 94 : index
    %902 = memref.load %arg2[%c94] : memref<160xf32, #tpu.memory_space<smem>>
    %903 = vector.broadcast %902 : f32 to vector<6x128xf32>
    %904 = arith.mulf %4, %903 : vector<6x128xf32>
    %905 = arith.addf %901, %904 : vector<6x128xf32>
    %c90_191 = arith.constant 90 : index
    %906 = memref.load %arg2[%c90_191] : memref<160xf32, #tpu.memory_space<smem>>
    %907 = vector.broadcast %906 : f32 to vector<6x128xf32>
    %908 = arith.mulf %1, %907 : vector<6x128xf32>
    %c91_192 = arith.constant 91 : index
    %909 = memref.load %arg2[%c91_192] : memref<160xf32, #tpu.memory_space<smem>>
    %910 = vector.broadcast %909 : f32 to vector<6x128xf32>
    %911 = arith.mulf %2, %910 : vector<6x128xf32>
    %912 = arith.addf %908, %911 : vector<6x128xf32>
    %c92_193 = arith.constant 92 : index
    %913 = memref.load %arg2[%c92_193] : memref<160xf32, #tpu.memory_space<smem>>
    %914 = vector.broadcast %913 : f32 to vector<6x128xf32>
    %915 = arith.mulf %3, %914 : vector<6x128xf32>
    %916 = arith.addf %912, %915 : vector<6x128xf32>
    %c93_194 = arith.constant 93 : index
    %917 = memref.load %arg2[%c93_194] : memref<160xf32, #tpu.memory_space<smem>>
    %918 = vector.broadcast %917 : f32 to vector<6x128xf32>
    %919 = arith.mulf %4, %918 : vector<6x128xf32>
    %920 = arith.addf %916, %919 : vector<6x128xf32>
    %c94_195 = arith.constant 94 : index
    %921 = memref.load %arg2[%c94_195] : memref<160xf32, #tpu.memory_space<smem>>
    %922 = vector.broadcast %921 : f32 to vector<6x128xf32>
    %923 = arith.mulf %5, %922 : vector<6x128xf32>
    %924 = arith.addf %920, %923 : vector<6x128xf32>
    %925 = arith.maximumf %905, %924 : vector<6x128xf32>
    %c18_196 = arith.constant 18 : index
    %926 = memref.load %arg3[%c18_196] : memref<32xf32, #tpu.memory_space<smem>>
    %927 = vector.broadcast %926 : f32 to vector<6x128xf32>
    %928 = arith.addf %925, %927 : vector<6x128xf32>
    %cst_197 = arith.constant 0.000000e+00 : f32
    %929 = vector.broadcast %cst_197 : f32 to vector<6x128xf32>
    %930 = arith.maximumf %928, %929 : vector<6x128xf32>
    %c18_198 = arith.constant 18 : index
    %c0_199 = arith.constant 0 : index
    %c0_200 = arith.constant 0 : index
    %931 = vector.load %arg4[%c18_198, %c0_199, %c0_200] : memref<32x6x1xf32, #tpu.memory_space<vmem>>, vector<1x6x1xf32>
    %932 = vector.shape_cast %931 : vector<1x6x1xf32> to vector<6x1xf32>
    %933 = vector.broadcast %932 : vector<6x1xf32> to vector<6x128xf32>
    %934 = arith.mulf %930, %933 : vector<6x128xf32>
    %935 = arith.addf %886, %934 : vector<6x128xf32>
    %c95 = arith.constant 95 : index
    %936 = memref.load %arg2[%c95] : memref<160xf32, #tpu.memory_space<smem>>
    %937 = vector.broadcast %936 : f32 to vector<6x128xf32>
    %938 = arith.mulf %0, %937 : vector<6x128xf32>
    %c96 = arith.constant 96 : index
    %939 = memref.load %arg2[%c96] : memref<160xf32, #tpu.memory_space<smem>>
    %940 = vector.broadcast %939 : f32 to vector<6x128xf32>
    %941 = arith.mulf %1, %940 : vector<6x128xf32>
    %942 = arith.addf %938, %941 : vector<6x128xf32>
    %c97 = arith.constant 97 : index
    %943 = memref.load %arg2[%c97] : memref<160xf32, #tpu.memory_space<smem>>
    %944 = vector.broadcast %943 : f32 to vector<6x128xf32>
    %945 = arith.mulf %2, %944 : vector<6x128xf32>
    %946 = arith.addf %942, %945 : vector<6x128xf32>
    %c98 = arith.constant 98 : index
    %947 = memref.load %arg2[%c98] : memref<160xf32, #tpu.memory_space<smem>>
    %948 = vector.broadcast %947 : f32 to vector<6x128xf32>
    %949 = arith.mulf %3, %948 : vector<6x128xf32>
    %950 = arith.addf %946, %949 : vector<6x128xf32>
    %c99 = arith.constant 99 : index
    %951 = memref.load %arg2[%c99] : memref<160xf32, #tpu.memory_space<smem>>
    %952 = vector.broadcast %951 : f32 to vector<6x128xf32>
    %953 = arith.mulf %4, %952 : vector<6x128xf32>
    %954 = arith.addf %950, %953 : vector<6x128xf32>
    %c95_201 = arith.constant 95 : index
    %955 = memref.load %arg2[%c95_201] : memref<160xf32, #tpu.memory_space<smem>>
    %956 = vector.broadcast %955 : f32 to vector<6x128xf32>
    %957 = arith.mulf %1, %956 : vector<6x128xf32>
    %c96_202 = arith.constant 96 : index
    %958 = memref.load %arg2[%c96_202] : memref<160xf32, #tpu.memory_space<smem>>
    %959 = vector.broadcast %958 : f32 to vector<6x128xf32>
    %960 = arith.mulf %2, %959 : vector<6x128xf32>
    %961 = arith.addf %957, %960 : vector<6x128xf32>
    %c97_203 = arith.constant 97 : index
    %962 = memref.load %arg2[%c97_203] : memref<160xf32, #tpu.memory_space<smem>>
    %963 = vector.broadcast %962 : f32 to vector<6x128xf32>
    %964 = arith.mulf %3, %963 : vector<6x128xf32>
    %965 = arith.addf %961, %964 : vector<6x128xf32>
    %c98_204 = arith.constant 98 : index
    %966 = memref.load %arg2[%c98_204] : memref<160xf32, #tpu.memory_space<smem>>
    %967 = vector.broadcast %966 : f32 to vector<6x128xf32>
    %968 = arith.mulf %4, %967 : vector<6x128xf32>
    %969 = arith.addf %965, %968 : vector<6x128xf32>
    %c99_205 = arith.constant 99 : index
    %970 = memref.load %arg2[%c99_205] : memref<160xf32, #tpu.memory_space<smem>>
    %971 = vector.broadcast %970 : f32 to vector<6x128xf32>
    %972 = arith.mulf %5, %971 : vector<6x128xf32>
    %973 = arith.addf %969, %972 : vector<6x128xf32>
    %974 = arith.maximumf %954, %973 : vector<6x128xf32>
    %c19_206 = arith.constant 19 : index
    %975 = memref.load %arg3[%c19_206] : memref<32xf32, #tpu.memory_space<smem>>
    %976 = vector.broadcast %975 : f32 to vector<6x128xf32>
    %977 = arith.addf %974, %976 : vector<6x128xf32>
    %cst_207 = arith.constant 0.000000e+00 : f32
    %978 = vector.broadcast %cst_207 : f32 to vector<6x128xf32>
    %979 = arith.maximumf %977, %978 : vector<6x128xf32>
    %c19_208 = arith.constant 19 : index
    %c0_209 = arith.constant 0 : index
    %c0_210 = arith.constant 0 : index
    %980 = vector.load %arg4[%c19_208, %c0_209, %c0_210] : memref<32x6x1xf32, #tpu.memory_space<vmem>>, vector<1x6x1xf32>
    %981 = vector.shape_cast %980 : vector<1x6x1xf32> to vector<6x1xf32>
    %982 = vector.broadcast %981 : vector<6x1xf32> to vector<6x128xf32>
    %983 = arith.mulf %979, %982 : vector<6x128xf32>
    %984 = arith.addf %935, %983 : vector<6x128xf32>
    %c100 = arith.constant 100 : index
    %985 = memref.load %arg2[%c100] : memref<160xf32, #tpu.memory_space<smem>>
    %986 = vector.broadcast %985 : f32 to vector<6x128xf32>
    %987 = arith.mulf %0, %986 : vector<6x128xf32>
    %c101 = arith.constant 101 : index
    %988 = memref.load %arg2[%c101] : memref<160xf32, #tpu.memory_space<smem>>
    %989 = vector.broadcast %988 : f32 to vector<6x128xf32>
    %990 = arith.mulf %1, %989 : vector<6x128xf32>
    %991 = arith.addf %987, %990 : vector<6x128xf32>
    %c102 = arith.constant 102 : index
    %992 = memref.load %arg2[%c102] : memref<160xf32, #tpu.memory_space<smem>>
    %993 = vector.broadcast %992 : f32 to vector<6x128xf32>
    %994 = arith.mulf %2, %993 : vector<6x128xf32>
    %995 = arith.addf %991, %994 : vector<6x128xf32>
    %c103 = arith.constant 103 : index
    %996 = memref.load %arg2[%c103] : memref<160xf32, #tpu.memory_space<smem>>
    %997 = vector.broadcast %996 : f32 to vector<6x128xf32>
    %998 = arith.mulf %3, %997 : vector<6x128xf32>
    %999 = arith.addf %995, %998 : vector<6x128xf32>
    %c104 = arith.constant 104 : index
    %1000 = memref.load %arg2[%c104] : memref<160xf32, #tpu.memory_space<smem>>
    %1001 = vector.broadcast %1000 : f32 to vector<6x128xf32>
    %1002 = arith.mulf %4, %1001 : vector<6x128xf32>
    %1003 = arith.addf %999, %1002 : vector<6x128xf32>
    %c100_211 = arith.constant 100 : index
    %1004 = memref.load %arg2[%c100_211] : memref<160xf32, #tpu.memory_space<smem>>
    %1005 = vector.broadcast %1004 : f32 to vector<6x128xf32>
    %1006 = arith.mulf %1, %1005 : vector<6x128xf32>
    %c101_212 = arith.constant 101 : index
    %1007 = memref.load %arg2[%c101_212] : memref<160xf32, #tpu.memory_space<smem>>
    %1008 = vector.broadcast %1007 : f32 to vector<6x128xf32>
    %1009 = arith.mulf %2, %1008 : vector<6x128xf32>
    %1010 = arith.addf %1006, %1009 : vector<6x128xf32>
    %c102_213 = arith.constant 102 : index
    %1011 = memref.load %arg2[%c102_213] : memref<160xf32, #tpu.memory_space<smem>>
    %1012 = vector.broadcast %1011 : f32 to vector<6x128xf32>
    %1013 = arith.mulf %3, %1012 : vector<6x128xf32>
    %1014 = arith.addf %1010, %1013 : vector<6x128xf32>
    %c103_214 = arith.constant 103 : index
    %1015 = memref.load %arg2[%c103_214] : memref<160xf32, #tpu.memory_space<smem>>
    %1016 = vector.broadcast %1015 : f32 to vector<6x128xf32>
    %1017 = arith.mulf %4, %1016 : vector<6x128xf32>
    %1018 = arith.addf %1014, %1017 : vector<6x128xf32>
    %c104_215 = arith.constant 104 : index
    %1019 = memref.load %arg2[%c104_215] : memref<160xf32, #tpu.memory_space<smem>>
    %1020 = vector.broadcast %1019 : f32 to vector<6x128xf32>
    %1021 = arith.mulf %5, %1020 : vector<6x128xf32>
    %1022 = arith.addf %1018, %1021 : vector<6x128xf32>
    %1023 = arith.maximumf %1003, %1022 : vector<6x128xf32>
    %c20_216 = arith.constant 20 : index
    %1024 = memref.load %arg3[%c20_216] : memref<32xf32, #tpu.memory_space<smem>>
    %1025 = vector.broadcast %1024 : f32 to vector<6x128xf32>
    %1026 = arith.addf %1023, %1025 : vector<6x128xf32>
    %cst_217 = arith.constant 0.000000e+00 : f32
    %1027 = vector.broadcast %cst_217 : f32 to vector<6x128xf32>
    %1028 = arith.maximumf %1026, %1027 : vector<6x128xf32>
    %c20_218 = arith.constant 20 : index
    %c0_219 = arith.constant 0 : index
    %c0_220 = arith.constant 0 : index
    %1029 = vector.load %arg4[%c20_218, %c0_219, %c0_220] : memref<32x6x1xf32, #tpu.memory_space<vmem>>, vector<1x6x1xf32>
    %1030 = vector.shape_cast %1029 : vector<1x6x1xf32> to vector<6x1xf32>
    %1031 = vector.broadcast %1030 : vector<6x1xf32> to vector<6x128xf32>
    %1032 = arith.mulf %1028, %1031 : vector<6x128xf32>
    %1033 = arith.addf %984, %1032 : vector<6x128xf32>
    %c105 = arith.constant 105 : index
    %1034 = memref.load %arg2[%c105] : memref<160xf32, #tpu.memory_space<smem>>
    %1035 = vector.broadcast %1034 : f32 to vector<6x128xf32>
    %1036 = arith.mulf %0, %1035 : vector<6x128xf32>
    %c106 = arith.constant 106 : index
    %1037 = memref.load %arg2[%c106] : memref<160xf32, #tpu.memory_space<smem>>
    %1038 = vector.broadcast %1037 : f32 to vector<6x128xf32>
    %1039 = arith.mulf %1, %1038 : vector<6x128xf32>
    %1040 = arith.addf %1036, %1039 : vector<6x128xf32>
    %c107 = arith.constant 107 : index
    %1041 = memref.load %arg2[%c107] : memref<160xf32, #tpu.memory_space<smem>>
    %1042 = vector.broadcast %1041 : f32 to vector<6x128xf32>
    %1043 = arith.mulf %2, %1042 : vector<6x128xf32>
    %1044 = arith.addf %1040, %1043 : vector<6x128xf32>
    %c108 = arith.constant 108 : index
    %1045 = memref.load %arg2[%c108] : memref<160xf32, #tpu.memory_space<smem>>
    %1046 = vector.broadcast %1045 : f32 to vector<6x128xf32>
    %1047 = arith.mulf %3, %1046 : vector<6x128xf32>
    %1048 = arith.addf %1044, %1047 : vector<6x128xf32>
    %c109 = arith.constant 109 : index
    %1049 = memref.load %arg2[%c109] : memref<160xf32, #tpu.memory_space<smem>>
    %1050 = vector.broadcast %1049 : f32 to vector<6x128xf32>
    %1051 = arith.mulf %4, %1050 : vector<6x128xf32>
    %1052 = arith.addf %1048, %1051 : vector<6x128xf32>
    %c105_221 = arith.constant 105 : index
    %1053 = memref.load %arg2[%c105_221] : memref<160xf32, #tpu.memory_space<smem>>
    %1054 = vector.broadcast %1053 : f32 to vector<6x128xf32>
    %1055 = arith.mulf %1, %1054 : vector<6x128xf32>
    %c106_222 = arith.constant 106 : index
    %1056 = memref.load %arg2[%c106_222] : memref<160xf32, #tpu.memory_space<smem>>
    %1057 = vector.broadcast %1056 : f32 to vector<6x128xf32>
    %1058 = arith.mulf %2, %1057 : vector<6x128xf32>
    %1059 = arith.addf %1055, %1058 : vector<6x128xf32>
    %c107_223 = arith.constant 107 : index
    %1060 = memref.load %arg2[%c107_223] : memref<160xf32, #tpu.memory_space<smem>>
    %1061 = vector.broadcast %1060 : f32 to vector<6x128xf32>
    %1062 = arith.mulf %3, %1061 : vector<6x128xf32>
    %1063 = arith.addf %1059, %1062 : vector<6x128xf32>
    %c108_224 = arith.constant 108 : index
    %1064 = memref.load %arg2[%c108_224] : memref<160xf32, #tpu.memory_space<smem>>
    %1065 = vector.broadcast %1064 : f32 to vector<6x128xf32>
    %1066 = arith.mulf %4, %1065 : vector<6x128xf32>
    %1067 = arith.addf %1063, %1066 : vector<6x128xf32>
    %c109_225 = arith.constant 109 : index
    %1068 = memref.load %arg2[%c109_225] : memref<160xf32, #tpu.memory_space<smem>>
    %1069 = vector.broadcast %1068 : f32 to vector<6x128xf32>
    %1070 = arith.mulf %5, %1069 : vector<6x128xf32>
    %1071 = arith.addf %1067, %1070 : vector<6x128xf32>
    %1072 = arith.maximumf %1052, %1071 : vector<6x128xf32>
    %c21_226 = arith.constant 21 : index
    %1073 = memref.load %arg3[%c21_226] : memref<32xf32, #tpu.memory_space<smem>>
    %1074 = vector.broadcast %1073 : f32 to vector<6x128xf32>
    %1075 = arith.addf %1072, %1074 : vector<6x128xf32>
    %cst_227 = arith.constant 0.000000e+00 : f32
    %1076 = vector.broadcast %cst_227 : f32 to vector<6x128xf32>
    %1077 = arith.maximumf %1075, %1076 : vector<6x128xf32>
    %c21_228 = arith.constant 21 : index
    %c0_229 = arith.constant 0 : index
    %c0_230 = arith.constant 0 : index
    %1078 = vector.load %arg4[%c21_228, %c0_229, %c0_230] : memref<32x6x1xf32, #tpu.memory_space<vmem>>, vector<1x6x1xf32>
    %1079 = vector.shape_cast %1078 : vector<1x6x1xf32> to vector<6x1xf32>
    %1080 = vector.broadcast %1079 : vector<6x1xf32> to vector<6x128xf32>
    %1081 = arith.mulf %1077, %1080 : vector<6x128xf32>
    %1082 = arith.addf %1033, %1081 : vector<6x128xf32>
    %c110 = arith.constant 110 : index
    %1083 = memref.load %arg2[%c110] : memref<160xf32, #tpu.memory_space<smem>>
    %1084 = vector.broadcast %1083 : f32 to vector<6x128xf32>
    %1085 = arith.mulf %0, %1084 : vector<6x128xf32>
    %c111 = arith.constant 111 : index
    %1086 = memref.load %arg2[%c111] : memref<160xf32, #tpu.memory_space<smem>>
    %1087 = vector.broadcast %1086 : f32 to vector<6x128xf32>
    %1088 = arith.mulf %1, %1087 : vector<6x128xf32>
    %1089 = arith.addf %1085, %1088 : vector<6x128xf32>
    %c112 = arith.constant 112 : index
    %1090 = memref.load %arg2[%c112] : memref<160xf32, #tpu.memory_space<smem>>
    %1091 = vector.broadcast %1090 : f32 to vector<6x128xf32>
    %1092 = arith.mulf %2, %1091 : vector<6x128xf32>
    %1093 = arith.addf %1089, %1092 : vector<6x128xf32>
    %c113 = arith.constant 113 : index
    %1094 = memref.load %arg2[%c113] : memref<160xf32, #tpu.memory_space<smem>>
    %1095 = vector.broadcast %1094 : f32 to vector<6x128xf32>
    %1096 = arith.mulf %3, %1095 : vector<6x128xf32>
    %1097 = arith.addf %1093, %1096 : vector<6x128xf32>
    %c114 = arith.constant 114 : index
    %1098 = memref.load %arg2[%c114] : memref<160xf32, #tpu.memory_space<smem>>
    %1099 = vector.broadcast %1098 : f32 to vector<6x128xf32>
    %1100 = arith.mulf %4, %1099 : vector<6x128xf32>
    %1101 = arith.addf %1097, %1100 : vector<6x128xf32>
    %c110_231 = arith.constant 110 : index
    %1102 = memref.load %arg2[%c110_231] : memref<160xf32, #tpu.memory_space<smem>>
    %1103 = vector.broadcast %1102 : f32 to vector<6x128xf32>
    %1104 = arith.mulf %1, %1103 : vector<6x128xf32>
    %c111_232 = arith.constant 111 : index
    %1105 = memref.load %arg2[%c111_232] : memref<160xf32, #tpu.memory_space<smem>>
    %1106 = vector.broadcast %1105 : f32 to vector<6x128xf32>
    %1107 = arith.mulf %2, %1106 : vector<6x128xf32>
    %1108 = arith.addf %1104, %1107 : vector<6x128xf32>
    %c112_233 = arith.constant 112 : index
    %1109 = memref.load %arg2[%c112_233] : memref<160xf32, #tpu.memory_space<smem>>
    %1110 = vector.broadcast %1109 : f32 to vector<6x128xf32>
    %1111 = arith.mulf %3, %1110 : vector<6x128xf32>
    %1112 = arith.addf %1108, %1111 : vector<6x128xf32>
    %c113_234 = arith.constant 113 : index
    %1113 = memref.load %arg2[%c113_234] : memref<160xf32, #tpu.memory_space<smem>>
    %1114 = vector.broadcast %1113 : f32 to vector<6x128xf32>
    %1115 = arith.mulf %4, %1114 : vector<6x128xf32>
    %1116 = arith.addf %1112, %1115 : vector<6x128xf32>
    %c114_235 = arith.constant 114 : index
    %1117 = memref.load %arg2[%c114_235] : memref<160xf32, #tpu.memory_space<smem>>
    %1118 = vector.broadcast %1117 : f32 to vector<6x128xf32>
    %1119 = arith.mulf %5, %1118 : vector<6x128xf32>
    %1120 = arith.addf %1116, %1119 : vector<6x128xf32>
    %1121 = arith.maximumf %1101, %1120 : vector<6x128xf32>
    %c22_236 = arith.constant 22 : index
    %1122 = memref.load %arg3[%c22_236] : memref<32xf32, #tpu.memory_space<smem>>
    %1123 = vector.broadcast %1122 : f32 to vector<6x128xf32>
    %1124 = arith.addf %1121, %1123 : vector<6x128xf32>
    %cst_237 = arith.constant 0.000000e+00 : f32
    %1125 = vector.broadcast %cst_237 : f32 to vector<6x128xf32>
    %1126 = arith.maximumf %1124, %1125 : vector<6x128xf32>
    %c22_238 = arith.constant 22 : index
    %c0_239 = arith.constant 0 : index
    %c0_240 = arith.constant 0 : index
    %1127 = vector.load %arg4[%c22_238, %c0_239, %c0_240] : memref<32x6x1xf32, #tpu.memory_space<vmem>>, vector<1x6x1xf32>
    %1128 = vector.shape_cast %1127 : vector<1x6x1xf32> to vector<6x1xf32>
    %1129 = vector.broadcast %1128 : vector<6x1xf32> to vector<6x128xf32>
    %1130 = arith.mulf %1126, %1129 : vector<6x128xf32>
    %1131 = arith.addf %1082, %1130 : vector<6x128xf32>
    %c115 = arith.constant 115 : index
    %1132 = memref.load %arg2[%c115] : memref<160xf32, #tpu.memory_space<smem>>
    %1133 = vector.broadcast %1132 : f32 to vector<6x128xf32>
    %1134 = arith.mulf %0, %1133 : vector<6x128xf32>
    %c116 = arith.constant 116 : index
    %1135 = memref.load %arg2[%c116] : memref<160xf32, #tpu.memory_space<smem>>
    %1136 = vector.broadcast %1135 : f32 to vector<6x128xf32>
    %1137 = arith.mulf %1, %1136 : vector<6x128xf32>
    %1138 = arith.addf %1134, %1137 : vector<6x128xf32>
    %c117 = arith.constant 117 : index
    %1139 = memref.load %arg2[%c117] : memref<160xf32, #tpu.memory_space<smem>>
    %1140 = vector.broadcast %1139 : f32 to vector<6x128xf32>
    %1141 = arith.mulf %2, %1140 : vector<6x128xf32>
    %1142 = arith.addf %1138, %1141 : vector<6x128xf32>
    %c118 = arith.constant 118 : index
    %1143 = memref.load %arg2[%c118] : memref<160xf32, #tpu.memory_space<smem>>
    %1144 = vector.broadcast %1143 : f32 to vector<6x128xf32>
    %1145 = arith.mulf %3, %1144 : vector<6x128xf32>
    %1146 = arith.addf %1142, %1145 : vector<6x128xf32>
    %c119 = arith.constant 119 : index
    %1147 = memref.load %arg2[%c119] : memref<160xf32, #tpu.memory_space<smem>>
    %1148 = vector.broadcast %1147 : f32 to vector<6x128xf32>
    %1149 = arith.mulf %4, %1148 : vector<6x128xf32>
    %1150 = arith.addf %1146, %1149 : vector<6x128xf32>
    %c115_241 = arith.constant 115 : index
    %1151 = memref.load %arg2[%c115_241] : memref<160xf32, #tpu.memory_space<smem>>
    %1152 = vector.broadcast %1151 : f32 to vector<6x128xf32>
    %1153 = arith.mulf %1, %1152 : vector<6x128xf32>
    %c116_242 = arith.constant 116 : index
    %1154 = memref.load %arg2[%c116_242] : memref<160xf32, #tpu.memory_space<smem>>
    %1155 = vector.broadcast %1154 : f32 to vector<6x128xf32>
    %1156 = arith.mulf %2, %1155 : vector<6x128xf32>
    %1157 = arith.addf %1153, %1156 : vector<6x128xf32>
    %c117_243 = arith.constant 117 : index
    %1158 = memref.load %arg2[%c117_243] : memref<160xf32, #tpu.memory_space<smem>>
    %1159 = vector.broadcast %1158 : f32 to vector<6x128xf32>
    %1160 = arith.mulf %3, %1159 : vector<6x128xf32>
    %1161 = arith.addf %1157, %1160 : vector<6x128xf32>
    %c118_244 = arith.constant 118 : index
    %1162 = memref.load %arg2[%c118_244] : memref<160xf32, #tpu.memory_space<smem>>
    %1163 = vector.broadcast %1162 : f32 to vector<6x128xf32>
    %1164 = arith.mulf %4, %1163 : vector<6x128xf32>
    %1165 = arith.addf %1161, %1164 : vector<6x128xf32>
    %c119_245 = arith.constant 119 : index
    %1166 = memref.load %arg2[%c119_245] : memref<160xf32, #tpu.memory_space<smem>>
    %1167 = vector.broadcast %1166 : f32 to vector<6x128xf32>
    %1168 = arith.mulf %5, %1167 : vector<6x128xf32>
    %1169 = arith.addf %1165, %1168 : vector<6x128xf32>
    %1170 = arith.maximumf %1150, %1169 : vector<6x128xf32>
    %c23_246 = arith.constant 23 : index
    %1171 = memref.load %arg3[%c23_246] : memref<32xf32, #tpu.memory_space<smem>>
    %1172 = vector.broadcast %1171 : f32 to vector<6x128xf32>
    %1173 = arith.addf %1170, %1172 : vector<6x128xf32>
    %cst_247 = arith.constant 0.000000e+00 : f32
    %1174 = vector.broadcast %cst_247 : f32 to vector<6x128xf32>
    %1175 = arith.maximumf %1173, %1174 : vector<6x128xf32>
    %c23_248 = arith.constant 23 : index
    %c0_249 = arith.constant 0 : index
    %c0_250 = arith.constant 0 : index
    %1176 = vector.load %arg4[%c23_248, %c0_249, %c0_250] : memref<32x6x1xf32, #tpu.memory_space<vmem>>, vector<1x6x1xf32>
    %1177 = vector.shape_cast %1176 : vector<1x6x1xf32> to vector<6x1xf32>
    %1178 = vector.broadcast %1177 : vector<6x1xf32> to vector<6x128xf32>
    %1179 = arith.mulf %1175, %1178 : vector<6x128xf32>
    %1180 = arith.addf %1131, %1179 : vector<6x128xf32>
    %c120 = arith.constant 120 : index
    %1181 = memref.load %arg2[%c120] : memref<160xf32, #tpu.memory_space<smem>>
    %1182 = vector.broadcast %1181 : f32 to vector<6x128xf32>
    %1183 = arith.mulf %0, %1182 : vector<6x128xf32>
    %c121 = arith.constant 121 : index
    %1184 = memref.load %arg2[%c121] : memref<160xf32, #tpu.memory_space<smem>>
    %1185 = vector.broadcast %1184 : f32 to vector<6x128xf32>
    %1186 = arith.mulf %1, %1185 : vector<6x128xf32>
    %1187 = arith.addf %1183, %1186 : vector<6x128xf32>
    %c122 = arith.constant 122 : index
    %1188 = memref.load %arg2[%c122] : memref<160xf32, #tpu.memory_space<smem>>
    %1189 = vector.broadcast %1188 : f32 to vector<6x128xf32>
    %1190 = arith.mulf %2, %1189 : vector<6x128xf32>
    %1191 = arith.addf %1187, %1190 : vector<6x128xf32>
    %c123 = arith.constant 123 : index
    %1192 = memref.load %arg2[%c123] : memref<160xf32, #tpu.memory_space<smem>>
    %1193 = vector.broadcast %1192 : f32 to vector<6x128xf32>
    %1194 = arith.mulf %3, %1193 : vector<6x128xf32>
    %1195 = arith.addf %1191, %1194 : vector<6x128xf32>
    %c124 = arith.constant 124 : index
    %1196 = memref.load %arg2[%c124] : memref<160xf32, #tpu.memory_space<smem>>
    %1197 = vector.broadcast %1196 : f32 to vector<6x128xf32>
    %1198 = arith.mulf %4, %1197 : vector<6x128xf32>
    %1199 = arith.addf %1195, %1198 : vector<6x128xf32>
    %c120_251 = arith.constant 120 : index
    %1200 = memref.load %arg2[%c120_251] : memref<160xf32, #tpu.memory_space<smem>>
    %1201 = vector.broadcast %1200 : f32 to vector<6x128xf32>
    %1202 = arith.mulf %1, %1201 : vector<6x128xf32>
    %c121_252 = arith.constant 121 : index
    %1203 = memref.load %arg2[%c121_252] : memref<160xf32, #tpu.memory_space<smem>>
    %1204 = vector.broadcast %1203 : f32 to vector<6x128xf32>
    %1205 = arith.mulf %2, %1204 : vector<6x128xf32>
    %1206 = arith.addf %1202, %1205 : vector<6x128xf32>
    %c122_253 = arith.constant 122 : index
    %1207 = memref.load %arg2[%c122_253] : memref<160xf32, #tpu.memory_space<smem>>
    %1208 = vector.broadcast %1207 : f32 to vector<6x128xf32>
    %1209 = arith.mulf %3, %1208 : vector<6x128xf32>
    %1210 = arith.addf %1206, %1209 : vector<6x128xf32>
    %c123_254 = arith.constant 123 : index
    %1211 = memref.load %arg2[%c123_254] : memref<160xf32, #tpu.memory_space<smem>>
    %1212 = vector.broadcast %1211 : f32 to vector<6x128xf32>
    %1213 = arith.mulf %4, %1212 : vector<6x128xf32>
    %1214 = arith.addf %1210, %1213 : vector<6x128xf32>
    %c124_255 = arith.constant 124 : index
    %1215 = memref.load %arg2[%c124_255] : memref<160xf32, #tpu.memory_space<smem>>
    %1216 = vector.broadcast %1215 : f32 to vector<6x128xf32>
    %1217 = arith.mulf %5, %1216 : vector<6x128xf32>
    %1218 = arith.addf %1214, %1217 : vector<6x128xf32>
    %1219 = arith.maximumf %1199, %1218 : vector<6x128xf32>
    %c24_256 = arith.constant 24 : index
    %1220 = memref.load %arg3[%c24_256] : memref<32xf32, #tpu.memory_space<smem>>
    %1221 = vector.broadcast %1220 : f32 to vector<6x128xf32>
    %1222 = arith.addf %1219, %1221 : vector<6x128xf32>
    %cst_257 = arith.constant 0.000000e+00 : f32
    %1223 = vector.broadcast %cst_257 : f32 to vector<6x128xf32>
    %1224 = arith.maximumf %1222, %1223 : vector<6x128xf32>
    %c24_258 = arith.constant 24 : index
    %c0_259 = arith.constant 0 : index
    %c0_260 = arith.constant 0 : index
    %1225 = vector.load %arg4[%c24_258, %c0_259, %c0_260] : memref<32x6x1xf32, #tpu.memory_space<vmem>>, vector<1x6x1xf32>
    %1226 = vector.shape_cast %1225 : vector<1x6x1xf32> to vector<6x1xf32>
    %1227 = vector.broadcast %1226 : vector<6x1xf32> to vector<6x128xf32>
    %1228 = arith.mulf %1224, %1227 : vector<6x128xf32>
    %1229 = arith.addf %1180, %1228 : vector<6x128xf32>
    %c125 = arith.constant 125 : index
    %1230 = memref.load %arg2[%c125] : memref<160xf32, #tpu.memory_space<smem>>
    %1231 = vector.broadcast %1230 : f32 to vector<6x128xf32>
    %1232 = arith.mulf %0, %1231 : vector<6x128xf32>
    %c126 = arith.constant 126 : index
    %1233 = memref.load %arg2[%c126] : memref<160xf32, #tpu.memory_space<smem>>
    %1234 = vector.broadcast %1233 : f32 to vector<6x128xf32>
    %1235 = arith.mulf %1, %1234 : vector<6x128xf32>
    %1236 = arith.addf %1232, %1235 : vector<6x128xf32>
    %c127 = arith.constant 127 : index
    %1237 = memref.load %arg2[%c127] : memref<160xf32, #tpu.memory_space<smem>>
    %1238 = vector.broadcast %1237 : f32 to vector<6x128xf32>
    %1239 = arith.mulf %2, %1238 : vector<6x128xf32>
    %1240 = arith.addf %1236, %1239 : vector<6x128xf32>
    %c128 = arith.constant 128 : index
    %1241 = memref.load %arg2[%c128] : memref<160xf32, #tpu.memory_space<smem>>
    %1242 = vector.broadcast %1241 : f32 to vector<6x128xf32>
    %1243 = arith.mulf %3, %1242 : vector<6x128xf32>
    %1244 = arith.addf %1240, %1243 : vector<6x128xf32>
    %c129 = arith.constant 129 : index
    %1245 = memref.load %arg2[%c129] : memref<160xf32, #tpu.memory_space<smem>>
    %1246 = vector.broadcast %1245 : f32 to vector<6x128xf32>
    %1247 = arith.mulf %4, %1246 : vector<6x128xf32>
    %1248 = arith.addf %1244, %1247 : vector<6x128xf32>
    %c125_261 = arith.constant 125 : index
    %1249 = memref.load %arg2[%c125_261] : memref<160xf32, #tpu.memory_space<smem>>
    %1250 = vector.broadcast %1249 : f32 to vector<6x128xf32>
    %1251 = arith.mulf %1, %1250 : vector<6x128xf32>
    %c126_262 = arith.constant 126 : index
    %1252 = memref.load %arg2[%c126_262] : memref<160xf32, #tpu.memory_space<smem>>
    %1253 = vector.broadcast %1252 : f32 to vector<6x128xf32>
    %1254 = arith.mulf %2, %1253 : vector<6x128xf32>
    %1255 = arith.addf %1251, %1254 : vector<6x128xf32>
    %c127_263 = arith.constant 127 : index
    %1256 = memref.load %arg2[%c127_263] : memref<160xf32, #tpu.memory_space<smem>>
    %1257 = vector.broadcast %1256 : f32 to vector<6x128xf32>
    %1258 = arith.mulf %3, %1257 : vector<6x128xf32>
    %1259 = arith.addf %1255, %1258 : vector<6x128xf32>
    %c128_264 = arith.constant 128 : index
    %1260 = memref.load %arg2[%c128_264] : memref<160xf32, #tpu.memory_space<smem>>
    %1261 = vector.broadcast %1260 : f32 to vector<6x128xf32>
    %1262 = arith.mulf %4, %1261 : vector<6x128xf32>
    %1263 = arith.addf %1259, %1262 : vector<6x128xf32>
    %c129_265 = arith.constant 129 : index
    %1264 = memref.load %arg2[%c129_265] : memref<160xf32, #tpu.memory_space<smem>>
    %1265 = vector.broadcast %1264 : f32 to vector<6x128xf32>
    %1266 = arith.mulf %5, %1265 : vector<6x128xf32>
    %1267 = arith.addf %1263, %1266 : vector<6x128xf32>
    %1268 = arith.maximumf %1248, %1267 : vector<6x128xf32>
    %c25_266 = arith.constant 25 : index
    %1269 = memref.load %arg3[%c25_266] : memref<32xf32, #tpu.memory_space<smem>>
    %1270 = vector.broadcast %1269 : f32 to vector<6x128xf32>
    %1271 = arith.addf %1268, %1270 : vector<6x128xf32>
    %cst_267 = arith.constant 0.000000e+00 : f32
    %1272 = vector.broadcast %cst_267 : f32 to vector<6x128xf32>
    %1273 = arith.maximumf %1271, %1272 : vector<6x128xf32>
    %c25_268 = arith.constant 25 : index
    %c0_269 = arith.constant 0 : index
    %c0_270 = arith.constant 0 : index
    %1274 = vector.load %arg4[%c25_268, %c0_269, %c0_270] : memref<32x6x1xf32, #tpu.memory_space<vmem>>, vector<1x6x1xf32>
    %1275 = vector.shape_cast %1274 : vector<1x6x1xf32> to vector<6x1xf32>
    %1276 = vector.broadcast %1275 : vector<6x1xf32> to vector<6x128xf32>
    %1277 = arith.mulf %1273, %1276 : vector<6x128xf32>
    %1278 = arith.addf %1229, %1277 : vector<6x128xf32>
    %c130 = arith.constant 130 : index
    %1279 = memref.load %arg2[%c130] : memref<160xf32, #tpu.memory_space<smem>>
    %1280 = vector.broadcast %1279 : f32 to vector<6x128xf32>
    %1281 = arith.mulf %0, %1280 : vector<6x128xf32>
    %c131 = arith.constant 131 : index
    %1282 = memref.load %arg2[%c131] : memref<160xf32, #tpu.memory_space<smem>>
    %1283 = vector.broadcast %1282 : f32 to vector<6x128xf32>
    %1284 = arith.mulf %1, %1283 : vector<6x128xf32>
    %1285 = arith.addf %1281, %1284 : vector<6x128xf32>
    %c132 = arith.constant 132 : index
    %1286 = memref.load %arg2[%c132] : memref<160xf32, #tpu.memory_space<smem>>
    %1287 = vector.broadcast %1286 : f32 to vector<6x128xf32>
    %1288 = arith.mulf %2, %1287 : vector<6x128xf32>
    %1289 = arith.addf %1285, %1288 : vector<6x128xf32>
    %c133 = arith.constant 133 : index
    %1290 = memref.load %arg2[%c133] : memref<160xf32, #tpu.memory_space<smem>>
    %1291 = vector.broadcast %1290 : f32 to vector<6x128xf32>
    %1292 = arith.mulf %3, %1291 : vector<6x128xf32>
    %1293 = arith.addf %1289, %1292 : vector<6x128xf32>
    %c134 = arith.constant 134 : index
    %1294 = memref.load %arg2[%c134] : memref<160xf32, #tpu.memory_space<smem>>
    %1295 = vector.broadcast %1294 : f32 to vector<6x128xf32>
    %1296 = arith.mulf %4, %1295 : vector<6x128xf32>
    %1297 = arith.addf %1293, %1296 : vector<6x128xf32>
    %c130_271 = arith.constant 130 : index
    %1298 = memref.load %arg2[%c130_271] : memref<160xf32, #tpu.memory_space<smem>>
    %1299 = vector.broadcast %1298 : f32 to vector<6x128xf32>
    %1300 = arith.mulf %1, %1299 : vector<6x128xf32>
    %c131_272 = arith.constant 131 : index
    %1301 = memref.load %arg2[%c131_272] : memref<160xf32, #tpu.memory_space<smem>>
    %1302 = vector.broadcast %1301 : f32 to vector<6x128xf32>
    %1303 = arith.mulf %2, %1302 : vector<6x128xf32>
    %1304 = arith.addf %1300, %1303 : vector<6x128xf32>
    %c132_273 = arith.constant 132 : index
    %1305 = memref.load %arg2[%c132_273] : memref<160xf32, #tpu.memory_space<smem>>
    %1306 = vector.broadcast %1305 : f32 to vector<6x128xf32>
    %1307 = arith.mulf %3, %1306 : vector<6x128xf32>
    %1308 = arith.addf %1304, %1307 : vector<6x128xf32>
    %c133_274 = arith.constant 133 : index
    %1309 = memref.load %arg2[%c133_274] : memref<160xf32, #tpu.memory_space<smem>>
    %1310 = vector.broadcast %1309 : f32 to vector<6x128xf32>
    %1311 = arith.mulf %4, %1310 : vector<6x128xf32>
    %1312 = arith.addf %1308, %1311 : vector<6x128xf32>
    %c134_275 = arith.constant 134 : index
    %1313 = memref.load %arg2[%c134_275] : memref<160xf32, #tpu.memory_space<smem>>
    %1314 = vector.broadcast %1313 : f32 to vector<6x128xf32>
    %1315 = arith.mulf %5, %1314 : vector<6x128xf32>
    %1316 = arith.addf %1312, %1315 : vector<6x128xf32>
    %1317 = arith.maximumf %1297, %1316 : vector<6x128xf32>
    %c26_276 = arith.constant 26 : index
    %1318 = memref.load %arg3[%c26_276] : memref<32xf32, #tpu.memory_space<smem>>
    %1319 = vector.broadcast %1318 : f32 to vector<6x128xf32>
    %1320 = arith.addf %1317, %1319 : vector<6x128xf32>
    %cst_277 = arith.constant 0.000000e+00 : f32
    %1321 = vector.broadcast %cst_277 : f32 to vector<6x128xf32>
    %1322 = arith.maximumf %1320, %1321 : vector<6x128xf32>
    %c26_278 = arith.constant 26 : index
    %c0_279 = arith.constant 0 : index
    %c0_280 = arith.constant 0 : index
    %1323 = vector.load %arg4[%c26_278, %c0_279, %c0_280] : memref<32x6x1xf32, #tpu.memory_space<vmem>>, vector<1x6x1xf32>
    %1324 = vector.shape_cast %1323 : vector<1x6x1xf32> to vector<6x1xf32>
    %1325 = vector.broadcast %1324 : vector<6x1xf32> to vector<6x128xf32>
    %1326 = arith.mulf %1322, %1325 : vector<6x128xf32>
    %1327 = arith.addf %1278, %1326 : vector<6x128xf32>
    %c135 = arith.constant 135 : index
    %1328 = memref.load %arg2[%c135] : memref<160xf32, #tpu.memory_space<smem>>
    %1329 = vector.broadcast %1328 : f32 to vector<6x128xf32>
    %1330 = arith.mulf %0, %1329 : vector<6x128xf32>
    %c136 = arith.constant 136 : index
    %1331 = memref.load %arg2[%c136] : memref<160xf32, #tpu.memory_space<smem>>
    %1332 = vector.broadcast %1331 : f32 to vector<6x128xf32>
    %1333 = arith.mulf %1, %1332 : vector<6x128xf32>
    %1334 = arith.addf %1330, %1333 : vector<6x128xf32>
    %c137 = arith.constant 137 : index
    %1335 = memref.load %arg2[%c137] : memref<160xf32, #tpu.memory_space<smem>>
    %1336 = vector.broadcast %1335 : f32 to vector<6x128xf32>
    %1337 = arith.mulf %2, %1336 : vector<6x128xf32>
    %1338 = arith.addf %1334, %1337 : vector<6x128xf32>
    %c138 = arith.constant 138 : index
    %1339 = memref.load %arg2[%c138] : memref<160xf32, #tpu.memory_space<smem>>
    %1340 = vector.broadcast %1339 : f32 to vector<6x128xf32>
    %1341 = arith.mulf %3, %1340 : vector<6x128xf32>
    %1342 = arith.addf %1338, %1341 : vector<6x128xf32>
    %c139 = arith.constant 139 : index
    %1343 = memref.load %arg2[%c139] : memref<160xf32, #tpu.memory_space<smem>>
    %1344 = vector.broadcast %1343 : f32 to vector<6x128xf32>
    %1345 = arith.mulf %4, %1344 : vector<6x128xf32>
    %1346 = arith.addf %1342, %1345 : vector<6x128xf32>
    %c135_281 = arith.constant 135 : index
    %1347 = memref.load %arg2[%c135_281] : memref<160xf32, #tpu.memory_space<smem>>
    %1348 = vector.broadcast %1347 : f32 to vector<6x128xf32>
    %1349 = arith.mulf %1, %1348 : vector<6x128xf32>
    %c136_282 = arith.constant 136 : index
    %1350 = memref.load %arg2[%c136_282] : memref<160xf32, #tpu.memory_space<smem>>
    %1351 = vector.broadcast %1350 : f32 to vector<6x128xf32>
    %1352 = arith.mulf %2, %1351 : vector<6x128xf32>
    %1353 = arith.addf %1349, %1352 : vector<6x128xf32>
    %c137_283 = arith.constant 137 : index
    %1354 = memref.load %arg2[%c137_283] : memref<160xf32, #tpu.memory_space<smem>>
    %1355 = vector.broadcast %1354 : f32 to vector<6x128xf32>
    %1356 = arith.mulf %3, %1355 : vector<6x128xf32>
    %1357 = arith.addf %1353, %1356 : vector<6x128xf32>
    %c138_284 = arith.constant 138 : index
    %1358 = memref.load %arg2[%c138_284] : memref<160xf32, #tpu.memory_space<smem>>
    %1359 = vector.broadcast %1358 : f32 to vector<6x128xf32>
    %1360 = arith.mulf %4, %1359 : vector<6x128xf32>
    %1361 = arith.addf %1357, %1360 : vector<6x128xf32>
    %c139_285 = arith.constant 139 : index
    %1362 = memref.load %arg2[%c139_285] : memref<160xf32, #tpu.memory_space<smem>>
    %1363 = vector.broadcast %1362 : f32 to vector<6x128xf32>
    %1364 = arith.mulf %5, %1363 : vector<6x128xf32>
    %1365 = arith.addf %1361, %1364 : vector<6x128xf32>
    %1366 = arith.maximumf %1346, %1365 : vector<6x128xf32>
    %c27_286 = arith.constant 27 : index
    %1367 = memref.load %arg3[%c27_286] : memref<32xf32, #tpu.memory_space<smem>>
    %1368 = vector.broadcast %1367 : f32 to vector<6x128xf32>
    %1369 = arith.addf %1366, %1368 : vector<6x128xf32>
    %cst_287 = arith.constant 0.000000e+00 : f32
    %1370 = vector.broadcast %cst_287 : f32 to vector<6x128xf32>
    %1371 = arith.maximumf %1369, %1370 : vector<6x128xf32>
    %c27_288 = arith.constant 27 : index
    %c0_289 = arith.constant 0 : index
    %c0_290 = arith.constant 0 : index
    %1372 = vector.load %arg4[%c27_288, %c0_289, %c0_290] : memref<32x6x1xf32, #tpu.memory_space<vmem>>, vector<1x6x1xf32>
    %1373 = vector.shape_cast %1372 : vector<1x6x1xf32> to vector<6x1xf32>
    %1374 = vector.broadcast %1373 : vector<6x1xf32> to vector<6x128xf32>
    %1375 = arith.mulf %1371, %1374 : vector<6x128xf32>
    %1376 = arith.addf %1327, %1375 : vector<6x128xf32>
    %c140 = arith.constant 140 : index
    %1377 = memref.load %arg2[%c140] : memref<160xf32, #tpu.memory_space<smem>>
    %1378 = vector.broadcast %1377 : f32 to vector<6x128xf32>
    %1379 = arith.mulf %0, %1378 : vector<6x128xf32>
    %c141 = arith.constant 141 : index
    %1380 = memref.load %arg2[%c141] : memref<160xf32, #tpu.memory_space<smem>>
    %1381 = vector.broadcast %1380 : f32 to vector<6x128xf32>
    %1382 = arith.mulf %1, %1381 : vector<6x128xf32>
    %1383 = arith.addf %1379, %1382 : vector<6x128xf32>
    %c142 = arith.constant 142 : index
    %1384 = memref.load %arg2[%c142] : memref<160xf32, #tpu.memory_space<smem>>
    %1385 = vector.broadcast %1384 : f32 to vector<6x128xf32>
    %1386 = arith.mulf %2, %1385 : vector<6x128xf32>
    %1387 = arith.addf %1383, %1386 : vector<6x128xf32>
    %c143 = arith.constant 143 : index
    %1388 = memref.load %arg2[%c143] : memref<160xf32, #tpu.memory_space<smem>>
    %1389 = vector.broadcast %1388 : f32 to vector<6x128xf32>
    %1390 = arith.mulf %3, %1389 : vector<6x128xf32>
    %1391 = arith.addf %1387, %1390 : vector<6x128xf32>
    %c144 = arith.constant 144 : index
    %1392 = memref.load %arg2[%c144] : memref<160xf32, #tpu.memory_space<smem>>
    %1393 = vector.broadcast %1392 : f32 to vector<6x128xf32>
    %1394 = arith.mulf %4, %1393 : vector<6x128xf32>
    %1395 = arith.addf %1391, %1394 : vector<6x128xf32>
    %c140_291 = arith.constant 140 : index
    %1396 = memref.load %arg2[%c140_291] : memref<160xf32, #tpu.memory_space<smem>>
    %1397 = vector.broadcast %1396 : f32 to vector<6x128xf32>
    %1398 = arith.mulf %1, %1397 : vector<6x128xf32>
    %c141_292 = arith.constant 141 : index
    %1399 = memref.load %arg2[%c141_292] : memref<160xf32, #tpu.memory_space<smem>>
    %1400 = vector.broadcast %1399 : f32 to vector<6x128xf32>
    %1401 = arith.mulf %2, %1400 : vector<6x128xf32>
    %1402 = arith.addf %1398, %1401 : vector<6x128xf32>
    %c142_293 = arith.constant 142 : index
    %1403 = memref.load %arg2[%c142_293] : memref<160xf32, #tpu.memory_space<smem>>
    %1404 = vector.broadcast %1403 : f32 to vector<6x128xf32>
    %1405 = arith.mulf %3, %1404 : vector<6x128xf32>
    %1406 = arith.addf %1402, %1405 : vector<6x128xf32>
    %c143_294 = arith.constant 143 : index
    %1407 = memref.load %arg2[%c143_294] : memref<160xf32, #tpu.memory_space<smem>>
    %1408 = vector.broadcast %1407 : f32 to vector<6x128xf32>
    %1409 = arith.mulf %4, %1408 : vector<6x128xf32>
    %1410 = arith.addf %1406, %1409 : vector<6x128xf32>
    %c144_295 = arith.constant 144 : index
    %1411 = memref.load %arg2[%c144_295] : memref<160xf32, #tpu.memory_space<smem>>
    %1412 = vector.broadcast %1411 : f32 to vector<6x128xf32>
    %1413 = arith.mulf %5, %1412 : vector<6x128xf32>
    %1414 = arith.addf %1410, %1413 : vector<6x128xf32>
    %1415 = arith.maximumf %1395, %1414 : vector<6x128xf32>
    %c28_296 = arith.constant 28 : index
    %1416 = memref.load %arg3[%c28_296] : memref<32xf32, #tpu.memory_space<smem>>
    %1417 = vector.broadcast %1416 : f32 to vector<6x128xf32>
    %1418 = arith.addf %1415, %1417 : vector<6x128xf32>
    %cst_297 = arith.constant 0.000000e+00 : f32
    %1419 = vector.broadcast %cst_297 : f32 to vector<6x128xf32>
    %1420 = arith.maximumf %1418, %1419 : vector<6x128xf32>
    %c28_298 = arith.constant 28 : index
    %c0_299 = arith.constant 0 : index
    %c0_300 = arith.constant 0 : index
    %1421 = vector.load %arg4[%c28_298, %c0_299, %c0_300] : memref<32x6x1xf32, #tpu.memory_space<vmem>>, vector<1x6x1xf32>
    %1422 = vector.shape_cast %1421 : vector<1x6x1xf32> to vector<6x1xf32>
    %1423 = vector.broadcast %1422 : vector<6x1xf32> to vector<6x128xf32>
    %1424 = arith.mulf %1420, %1423 : vector<6x128xf32>
    %1425 = arith.addf %1376, %1424 : vector<6x128xf32>
    %c145 = arith.constant 145 : index
    %1426 = memref.load %arg2[%c145] : memref<160xf32, #tpu.memory_space<smem>>
    %1427 = vector.broadcast %1426 : f32 to vector<6x128xf32>
    %1428 = arith.mulf %0, %1427 : vector<6x128xf32>
    %c146 = arith.constant 146 : index
    %1429 = memref.load %arg2[%c146] : memref<160xf32, #tpu.memory_space<smem>>
    %1430 = vector.broadcast %1429 : f32 to vector<6x128xf32>
    %1431 = arith.mulf %1, %1430 : vector<6x128xf32>
    %1432 = arith.addf %1428, %1431 : vector<6x128xf32>
    %c147 = arith.constant 147 : index
    %1433 = memref.load %arg2[%c147] : memref<160xf32, #tpu.memory_space<smem>>
    %1434 = vector.broadcast %1433 : f32 to vector<6x128xf32>
    %1435 = arith.mulf %2, %1434 : vector<6x128xf32>
    %1436 = arith.addf %1432, %1435 : vector<6x128xf32>
    %c148 = arith.constant 148 : index
    %1437 = memref.load %arg2[%c148] : memref<160xf32, #tpu.memory_space<smem>>
    %1438 = vector.broadcast %1437 : f32 to vector<6x128xf32>
    %1439 = arith.mulf %3, %1438 : vector<6x128xf32>
    %1440 = arith.addf %1436, %1439 : vector<6x128xf32>
    %c149 = arith.constant 149 : index
    %1441 = memref.load %arg2[%c149] : memref<160xf32, #tpu.memory_space<smem>>
    %1442 = vector.broadcast %1441 : f32 to vector<6x128xf32>
    %1443 = arith.mulf %4, %1442 : vector<6x128xf32>
    %1444 = arith.addf %1440, %1443 : vector<6x128xf32>
    %c145_301 = arith.constant 145 : index
    %1445 = memref.load %arg2[%c145_301] : memref<160xf32, #tpu.memory_space<smem>>
    %1446 = vector.broadcast %1445 : f32 to vector<6x128xf32>
    %1447 = arith.mulf %1, %1446 : vector<6x128xf32>
    %c146_302 = arith.constant 146 : index
    %1448 = memref.load %arg2[%c146_302] : memref<160xf32, #tpu.memory_space<smem>>
    %1449 = vector.broadcast %1448 : f32 to vector<6x128xf32>
    %1450 = arith.mulf %2, %1449 : vector<6x128xf32>
    %1451 = arith.addf %1447, %1450 : vector<6x128xf32>
    %c147_303 = arith.constant 147 : index
    %1452 = memref.load %arg2[%c147_303] : memref<160xf32, #tpu.memory_space<smem>>
    %1453 = vector.broadcast %1452 : f32 to vector<6x128xf32>
    %1454 = arith.mulf %3, %1453 : vector<6x128xf32>
    %1455 = arith.addf %1451, %1454 : vector<6x128xf32>
    %c148_304 = arith.constant 148 : index
    %1456 = memref.load %arg2[%c148_304] : memref<160xf32, #tpu.memory_space<smem>>
    %1457 = vector.broadcast %1456 : f32 to vector<6x128xf32>
    %1458 = arith.mulf %4, %1457 : vector<6x128xf32>
    %1459 = arith.addf %1455, %1458 : vector<6x128xf32>
    %c149_305 = arith.constant 149 : index
    %1460 = memref.load %arg2[%c149_305] : memref<160xf32, #tpu.memory_space<smem>>
    %1461 = vector.broadcast %1460 : f32 to vector<6x128xf32>
    %1462 = arith.mulf %5, %1461 : vector<6x128xf32>
    %1463 = arith.addf %1459, %1462 : vector<6x128xf32>
    %1464 = arith.maximumf %1444, %1463 : vector<6x128xf32>
    %c29_306 = arith.constant 29 : index
    %1465 = memref.load %arg3[%c29_306] : memref<32xf32, #tpu.memory_space<smem>>
    %1466 = vector.broadcast %1465 : f32 to vector<6x128xf32>
    %1467 = arith.addf %1464, %1466 : vector<6x128xf32>
    %cst_307 = arith.constant 0.000000e+00 : f32
    %1468 = vector.broadcast %cst_307 : f32 to vector<6x128xf32>
    %1469 = arith.maximumf %1467, %1468 : vector<6x128xf32>
    %c29_308 = arith.constant 29 : index
    %c0_309 = arith.constant 0 : index
    %c0_310 = arith.constant 0 : index
    %1470 = vector.load %arg4[%c29_308, %c0_309, %c0_310] : memref<32x6x1xf32, #tpu.memory_space<vmem>>, vector<1x6x1xf32>
    %1471 = vector.shape_cast %1470 : vector<1x6x1xf32> to vector<6x1xf32>
    %1472 = vector.broadcast %1471 : vector<6x1xf32> to vector<6x128xf32>
    %1473 = arith.mulf %1469, %1472 : vector<6x128xf32>
    %1474 = arith.addf %1425, %1473 : vector<6x128xf32>
    %c150 = arith.constant 150 : index
    %1475 = memref.load %arg2[%c150] : memref<160xf32, #tpu.memory_space<smem>>
    %1476 = vector.broadcast %1475 : f32 to vector<6x128xf32>
    %1477 = arith.mulf %0, %1476 : vector<6x128xf32>
    %c151 = arith.constant 151 : index
    %1478 = memref.load %arg2[%c151] : memref<160xf32, #tpu.memory_space<smem>>
    %1479 = vector.broadcast %1478 : f32 to vector<6x128xf32>
    %1480 = arith.mulf %1, %1479 : vector<6x128xf32>
    %1481 = arith.addf %1477, %1480 : vector<6x128xf32>
    %c152 = arith.constant 152 : index
    %1482 = memref.load %arg2[%c152] : memref<160xf32, #tpu.memory_space<smem>>
    %1483 = vector.broadcast %1482 : f32 to vector<6x128xf32>
    %1484 = arith.mulf %2, %1483 : vector<6x128xf32>
    %1485 = arith.addf %1481, %1484 : vector<6x128xf32>
    %c153 = arith.constant 153 : index
    %1486 = memref.load %arg2[%c153] : memref<160xf32, #tpu.memory_space<smem>>
    %1487 = vector.broadcast %1486 : f32 to vector<6x128xf32>
    %1488 = arith.mulf %3, %1487 : vector<6x128xf32>
    %1489 = arith.addf %1485, %1488 : vector<6x128xf32>
    %c154 = arith.constant 154 : index
    %1490 = memref.load %arg2[%c154] : memref<160xf32, #tpu.memory_space<smem>>
    %1491 = vector.broadcast %1490 : f32 to vector<6x128xf32>
    %1492 = arith.mulf %4, %1491 : vector<6x128xf32>
    %1493 = arith.addf %1489, %1492 : vector<6x128xf32>
    %c150_311 = arith.constant 150 : index
    %1494 = memref.load %arg2[%c150_311] : memref<160xf32, #tpu.memory_space<smem>>
    %1495 = vector.broadcast %1494 : f32 to vector<6x128xf32>
    %1496 = arith.mulf %1, %1495 : vector<6x128xf32>
    %c151_312 = arith.constant 151 : index
    %1497 = memref.load %arg2[%c151_312] : memref<160xf32, #tpu.memory_space<smem>>
    %1498 = vector.broadcast %1497 : f32 to vector<6x128xf32>
    %1499 = arith.mulf %2, %1498 : vector<6x128xf32>
    %1500 = arith.addf %1496, %1499 : vector<6x128xf32>
    %c152_313 = arith.constant 152 : index
    %1501 = memref.load %arg2[%c152_313] : memref<160xf32, #tpu.memory_space<smem>>
    %1502 = vector.broadcast %1501 : f32 to vector<6x128xf32>
    %1503 = arith.mulf %3, %1502 : vector<6x128xf32>
    %1504 = arith.addf %1500, %1503 : vector<6x128xf32>
    %c153_314 = arith.constant 153 : index
    %1505 = memref.load %arg2[%c153_314] : memref<160xf32, #tpu.memory_space<smem>>
    %1506 = vector.broadcast %1505 : f32 to vector<6x128xf32>
    %1507 = arith.mulf %4, %1506 : vector<6x128xf32>
    %1508 = arith.addf %1504, %1507 : vector<6x128xf32>
    %c154_315 = arith.constant 154 : index
    %1509 = memref.load %arg2[%c154_315] : memref<160xf32, #tpu.memory_space<smem>>
    %1510 = vector.broadcast %1509 : f32 to vector<6x128xf32>
    %1511 = arith.mulf %5, %1510 : vector<6x128xf32>
    %1512 = arith.addf %1508, %1511 : vector<6x128xf32>
    %1513 = arith.maximumf %1493, %1512 : vector<6x128xf32>
    %c30_316 = arith.constant 30 : index
    %1514 = memref.load %arg3[%c30_316] : memref<32xf32, #tpu.memory_space<smem>>
    %1515 = vector.broadcast %1514 : f32 to vector<6x128xf32>
    %1516 = arith.addf %1513, %1515 : vector<6x128xf32>
    %cst_317 = arith.constant 0.000000e+00 : f32
    %1517 = vector.broadcast %cst_317 : f32 to vector<6x128xf32>
    %1518 = arith.maximumf %1516, %1517 : vector<6x128xf32>
    %c30_318 = arith.constant 30 : index
    %c0_319 = arith.constant 0 : index
    %c0_320 = arith.constant 0 : index
    %1519 = vector.load %arg4[%c30_318, %c0_319, %c0_320] : memref<32x6x1xf32, #tpu.memory_space<vmem>>, vector<1x6x1xf32>
    %1520 = vector.shape_cast %1519 : vector<1x6x1xf32> to vector<6x1xf32>
    %1521 = vector.broadcast %1520 : vector<6x1xf32> to vector<6x128xf32>
    %1522 = arith.mulf %1518, %1521 : vector<6x128xf32>
    %1523 = arith.addf %1474, %1522 : vector<6x128xf32>
    %c155 = arith.constant 155 : index
    %1524 = memref.load %arg2[%c155] : memref<160xf32, #tpu.memory_space<smem>>
    %1525 = vector.broadcast %1524 : f32 to vector<6x128xf32>
    %1526 = arith.mulf %0, %1525 : vector<6x128xf32>
    %c156 = arith.constant 156 : index
    %1527 = memref.load %arg2[%c156] : memref<160xf32, #tpu.memory_space<smem>>
    %1528 = vector.broadcast %1527 : f32 to vector<6x128xf32>
    %1529 = arith.mulf %1, %1528 : vector<6x128xf32>
    %1530 = arith.addf %1526, %1529 : vector<6x128xf32>
    %c157 = arith.constant 157 : index
    %1531 = memref.load %arg2[%c157] : memref<160xf32, #tpu.memory_space<smem>>
    %1532 = vector.broadcast %1531 : f32 to vector<6x128xf32>
    %1533 = arith.mulf %2, %1532 : vector<6x128xf32>
    %1534 = arith.addf %1530, %1533 : vector<6x128xf32>
    %c158 = arith.constant 158 : index
    %1535 = memref.load %arg2[%c158] : memref<160xf32, #tpu.memory_space<smem>>
    %1536 = vector.broadcast %1535 : f32 to vector<6x128xf32>
    %1537 = arith.mulf %3, %1536 : vector<6x128xf32>
    %1538 = arith.addf %1534, %1537 : vector<6x128xf32>
    %c159 = arith.constant 159 : index
    %1539 = memref.load %arg2[%c159] : memref<160xf32, #tpu.memory_space<smem>>
    %1540 = vector.broadcast %1539 : f32 to vector<6x128xf32>
    %1541 = arith.mulf %4, %1540 : vector<6x128xf32>
    %1542 = arith.addf %1538, %1541 : vector<6x128xf32>
    %c155_321 = arith.constant 155 : index
    %1543 = memref.load %arg2[%c155_321] : memref<160xf32, #tpu.memory_space<smem>>
    %1544 = vector.broadcast %1543 : f32 to vector<6x128xf32>
    %1545 = arith.mulf %1, %1544 : vector<6x128xf32>
    %c156_322 = arith.constant 156 : index
    %1546 = memref.load %arg2[%c156_322] : memref<160xf32, #tpu.memory_space<smem>>
    %1547 = vector.broadcast %1546 : f32 to vector<6x128xf32>
    %1548 = arith.mulf %2, %1547 : vector<6x128xf32>
    %1549 = arith.addf %1545, %1548 : vector<6x128xf32>
    %c157_323 = arith.constant 157 : index
    %1550 = memref.load %arg2[%c157_323] : memref<160xf32, #tpu.memory_space<smem>>
    %1551 = vector.broadcast %1550 : f32 to vector<6x128xf32>
    %1552 = arith.mulf %3, %1551 : vector<6x128xf32>
    %1553 = arith.addf %1549, %1552 : vector<6x128xf32>
    %c158_324 = arith.constant 158 : index
    %1554 = memref.load %arg2[%c158_324] : memref<160xf32, #tpu.memory_space<smem>>
    %1555 = vector.broadcast %1554 : f32 to vector<6x128xf32>
    %1556 = arith.mulf %4, %1555 : vector<6x128xf32>
    %1557 = arith.addf %1553, %1556 : vector<6x128xf32>
    %c159_325 = arith.constant 159 : index
    %1558 = memref.load %arg2[%c159_325] : memref<160xf32, #tpu.memory_space<smem>>
    %1559 = vector.broadcast %1558 : f32 to vector<6x128xf32>
    %1560 = arith.mulf %5, %1559 : vector<6x128xf32>
    %1561 = arith.addf %1557, %1560 : vector<6x128xf32>
    %1562 = arith.maximumf %1542, %1561 : vector<6x128xf32>
    %c31_326 = arith.constant 31 : index
    %1563 = memref.load %arg3[%c31_326] : memref<32xf32, #tpu.memory_space<smem>>
    %1564 = vector.broadcast %1563 : f32 to vector<6x128xf32>
    %1565 = arith.addf %1562, %1564 : vector<6x128xf32>
    %cst_327 = arith.constant 0.000000e+00 : f32
    %1566 = vector.broadcast %cst_327 : f32 to vector<6x128xf32>
    %1567 = arith.maximumf %1565, %1566 : vector<6x128xf32>
    %c31_328 = arith.constant 31 : index
    %c0_329 = arith.constant 0 : index
    %c0_330 = arith.constant 0 : index
    %1568 = vector.load %arg4[%c31_328, %c0_329, %c0_330] : memref<32x6x1xf32, #tpu.memory_space<vmem>>, vector<1x6x1xf32>
    %1569 = vector.shape_cast %1568 : vector<1x6x1xf32> to vector<6x1xf32>
    %1570 = vector.broadcast %1569 : vector<6x1xf32> to vector<6x128xf32>
    %1571 = arith.mulf %1567, %1570 : vector<6x128xf32>
    %1572 = arith.addf %1523, %1571 : vector<6x128xf32>
    %cst_331 = arith.constant dense<0.000000e+00> : vector<128xf32>
    %1573 = vector.multi_reduction <add>, %1572, %cst_331 [0] : vector<6x128xf32> to vector<128xf32>
    %1574 = vector.shape_cast %1573 : vector<128xf32> to vector<1x128xf32>
    %c0_332 = arith.constant 0 : index
    %1575 = memref.load %arg5[%c0_332] : memref<1xf32, #tpu.memory_space<smem>>
    %1576 = vector.broadcast %1575 : f32 to vector<1x128xf32>
    %1577 = arith.addf %1574, %1576 : vector<1x128xf32>
    %c0_333 = arith.constant 0 : index
    %c0_334 = arith.constant 0 : index
    %1578 = vector.load %arg6[%c0_333, %c0_334] : memref<1x128xf32, #tpu.memory_space<vmem>>, vector<1x128xf32>
    tpu.vector_store %arg6[%c0_333, %c0_334], %1577 {strides = array<i32>} : memref<1x128xf32, #tpu.memory_space<vmem>>, vector<1x128xf32>,
    return
  }
  func.func @transform_0(%arg0: i32) -> (i32, i32) {
    %c0_i32 = arith.constant 0 : i32
    %c0_i32_0 = arith.constant 0 : i32
    return %c0_i32, %arg0 : i32, i32
  }
  func.func @transform_1(%arg0: i32) -> i32 {
    %c0_i32 = arith.constant 0 : i32
    %c0_i32_0 = arith.constant 0 : i32
    return %c0_i32 : i32
  }
  func.func @transform_2(%arg0: i32) -> i32 {
    %c0_i32 = arith.constant 0 : i32
    %c0_i32_0 = arith.constant 0 : i32
    return %c0_i32 : i32
  }
  func.func @transform_3(%arg0: i32) -> (i32, i32, i32) {
    %c0_i32 = arith.constant 0 : i32
    %c0_i32_0 = arith.constant 0 : i32
    %c0_i32_1 = arith.constant 0 : i32
    %c0_i32_2 = arith.constant 0 : i32
    return %c0_i32, %c0_i32_0, %c0_i32_1 : i32, i32, i32
  }
  func.func @transform_4(%arg0: i32) -> i32 {
    %c0_i32 = arith.constant 0 : i32
    %c0_i32_0 = arith.constant 0 : i32
    return %c0_i32 : i32
  }
  func.func @transform_5(%arg0: i32) -> (i32, i32) {
    %c0_i32 = arith.constant 0 : i32
    %c0_i32_0 = arith.constant 0 : i32
    return %c0_i32, %arg0 : i32, i32
  }
}

</mosaic_0001>

<bundles_post_ra>
// kernel: tpu_custom_call.1
= control target key start
LH: loop header
LB: loop body
LE: loop exit
PB: predicated region body
PF: predicated region fallthrough
CT: control target
= control target key end

     0   :  { %11 = vsyncpa [#allocation5], 0  ;;  %s2970_s0 = inlined_call_operand.vmem [shape: f32[16,128], index: 0, kind: input, shape index: {}]   ;;  %s2971_s1 = inlined_call_operand.vmem [shape: f32[160], index: 1, kind: input, shape index: {}]   ;;  %s2972_s2 = inlined_call_operand.vmem [shape: f32[32], index: 2, kind: input, shape index: {}]   ;;  %s2973_s3 = inlined_call_operand.vmem [shape: f32[32,6,1], index: 3, kind: input, shape index: {}]   ;;  %s2974_s4 = inlined_call_operand.<no memory space> [shape: f32[1], index: 4, kind: input, shape index: {}]   ;;  %s2975_s5 = inlined_call_operand.hbm [shape: f32[1,128], index: 5, kind: output, shape index: {}]  }
   0x1   :  { %12 = vsyncpa [#allocation7], 0 }
   0x2   :  { %13 = vsyncpa [#allocation4], 0  ;;  %s21_s20 = sshll.u32 %s2971_s1, 4  ;;  %s30_s23 = sshll.u32 %s2972_s2, 4  ;;  %s22_s20 = int_to_ptr.vmem [resolvable:$true] %s21_s20  ;;  %s31_s23 = int_to_ptr.vmem [resolvable:$true] %s30_s23 }
   0x3   :  { %s1729_s24 = smov [#allocation3]   ;;  %s1730_s25 = smov [#allocation6]  }
   0x4   :  { %24 = dma.vmem_to_smem %s22_s20, 32, %s1729_s24, [#allocation5]  }
   0x5   :  { %33 = dma.vmem_to_smem %s31_s23, 16, %s1730_s25, [#allocation7]  }
   0x6   :  { %1723 = dma.done.wait [#allocation5], 32  }
   0x7   :  { %1724 = vsyncadd [#allocation5], 4294967264 }
   0x8   :  { %1725 = dma.done.wait [#allocation7], 16  }
   0x9   :  { %1726 = vsyncadd [#allocation7], 4294967280 }
   0xa   :  { %46 = sfence }
   0xb   :  { %v1466_v0 = vld [vmem:[%s2973_s3 + $0x20] sm:$0x3f]  ;;  %v1452_v1 = vld [vmem:[%s2973_s3 + $0x10] sm:$0x3f]  ;;  %v1731_v2 = vmov 0   ;;  %s1832_s14 = sld [smem:[#allocation3 + $0x14]] }
   0xc   :  { %1662 = vset.pattern.permute.xlu2 %v1731_v2  ;;  %1661 = vset.pattern.permute.xlu1 %v1731_v2  ;;  %v91_v3 = vld [vmem:[%s2973_s3] sm:$0x3f]  ;;  %v1473_v4 = vld [vmem:[%s2973_s3 + $0x28] sm:$0x3f]  ;;  %v1459_v5 = vld [vmem:[%s2973_s3 + $0x18] sm:$0x3f] }
   0xd   :  { %1660 = vset.pattern.permute.xlu0 %v1731_v2  ;;  %261 = vperm.xlu2 %1662, %v1466_v0   ;;  %v1445_v6 = vld [vmem:[%s2973_s3 + $0x8] sm:$0x3f]  ;;  %v1494_v7 = vld [vmem:[%s2973_s3 + $0x40] sm:$0x3f]  ;;  %v1487_v8 = vld [vmem:[%s2973_s3 + $0x38] sm:$0x3f] }
   0xe   :  { %177 = vperm.xlu1 %1661, %v1452_v1   ;;  %94 = vperm.xlu0 %1660, %v91_v3   ;;  %v1480_v9 = vld [vmem:[%s2973_s3 + $0x30] sm:$0x3f]  ;;  %v1515_v10 = vld [vmem:[%s2973_s3 + $0x58] sm:$0x3f]  ;;  %v1501_v12 = vld [vmem:[%s2973_s3 + $0x48] sm:$0x3f] }
   0xf   :  { %v1508_v11 = vld [vmem:[%s2973_s3 + $0x50] sm:$0x3f]  ;;  %v1529_v14 = vld [vmem:[%s2973_s3 + $0x68] sm:$0x3f]  ;;  %v1522_v15 = vld [vmem:[%s2973_s3 + $0x60] sm:$0x3f] }
  0x10   :  { %v1536_v13 = vld [vmem:[%s2973_s3 + $0x70] sm:$0x3f]  ;;  %v1557_v16 = vld [vmem:[%s2973_s3 + $0x88] sm:$0x3f]  ;;  %v1550_v17 = vld [vmem:[%s2973_s3 + $0x80] sm:$0x3f] }
  0x11   :  { %v1543_v18 = vld [vmem:[%s2973_s3 + $0x78] sm:$0x3f]  ;;  %v1578_v19 = vld [vmem:[%s2973_s3 + $0xa0] sm:$0x3f]  ;;  %v1564_v21 = vld [vmem:[%s2973_s3 + $0x90] sm:$0x3f]  ;;  %v225_v25 = vstv %s1832_s14 }
  0x12   :  { %v1571_v20 = vld [vmem:[%s2973_s3 + $0x98] sm:$0x3f]  ;;  %s1834_s15 = sld [smem:[#allocation3 + $0x15]]  ;;  %v1592_v23 = vld [vmem:[%s2973_s3 + $0xb0] sm:$0x3f]  ;;  %vm1400_vm0 = vcmask 1045504  }
  0x13   :  { %s1836_s16 = sld [smem:[#allocation3 + $0x16]]  ;;  %v1599_v22 = vld [vmem:[%s2973_s3 + $0xb8] sm:$0x3f]  ;;  %v1585_v24 = vld [vmem:[%s2973_s3 + $0xa8] sm:$0x3f] }
  0x14   :  { %s1838_s17 = sld [smem:[#allocation3 + $0x17]]  ;;  %v1872_v29 = vld [vmem:[%s2970_s0] ss:$2 sm:$0x3f]  ;;  %v1620_v39 = vld [vmem:[%s2973_s3 + $0xd0] sm:$0x3f] }
  0x15   :  { %303 = vperm.xlu2 %1662, %v1473_v4   ;;  %s1840_s18 = sld [smem:[#allocation3 + $0x18]]  ;;  %v1877_v30 = vld [vmem:[%s2970_s0 + $0x1] ss:$2 sm:$0x3f]  ;;  %v226_v33 = vmul.f32 %v225_v25, %v1872_v29 }
  0x16   :  { %219 = vperm.xlu1 %1661, %v1459_v5   ;;  %135 = vperm.xlu0 %1660, %v1445_v6   ;;  %s1842_s19 = sld [smem:[#allocation6 + $0x4]]  ;;  %v1882_v31 = vld [vmem:[%s2970_s0 + $0x2] ss:$2 sm:$0x3f]  ;;  %v243_v35 = vmul.f32 %v1877_v30, %v225_v25  ;;  %v1627_v6 = vld [vmem:[%s2973_s3 + $0xd8] sm:$0x3f] }
  0x17   :  { %s1844_s20 = sld [smem:[#allocation3 + $0x19]]  ;;  %v1887_v32 = vld [vmem:[%s2970_s0 + $0x3] ss:$2 sm:$0x3f] }
  0x18   :  { %s1849_s23 = sld [smem:[#allocation3 + $0x1a]]  ;;  %v228_v26 = vstv %s1834_s15  ;;  %v1903_v40 = vld [vmem:[%s2970_s0 + $0x4] ss:$2 sm:$0x3f] }
  0x19   :  { %s1857_s1 = sld [smem:[#allocation3 + $0x1b]]  ;;  %v232_v27 = vstv %s1836_s16  ;;  %v229_v34 = vmul.f32 %v1877_v30, %v228_v26  ;;  %v244_v37 = vmul.f32 %v1882_v31, %v228_v26  ;;  %v1613_v43 = vld [vmem:[%s2973_s3 + $0xc8] sm:$0x3f]  ;;  %v1606_v44 = vld [vmem:[%s2973_s3 + $0xc0] sm:$0x3f] }
  0x1a   :  { %s1859_s28 = sld [smem:[#allocation3 + $0x1c]]  ;;  %v236_v28 = vstv %s1838_s17  ;;  %v233_v36 = vmul.f32 %v1882_v31, %v232_v27  ;;  %v246_v38 = vmul.f32 %v1887_v32, %v232_v27  ;;  %v1924_v52 = vld [vmem:[%s2970_s0 + $0x5] ss:$2 sm:$0x3f] }
  0x1b   :  { %s1863_s2 = sld [smem:[#allocation3 + $0x1d]]  ;;  %v230_v41 = vadd.f32 %v229_v34, %v226_v33  ;;  %v237_v42 = vmul.f32 %v1887_v32, %v236_v28  ;;  %v240_v45 = vstv %s1840_s18  ;;  %v245_v46 = vadd.f32 %v244_v37, %v243_v35  ;;  %v1641_v2 = vld [vmem:[%s2973_s3 + $0xe8] sm:$0x3f]  ;;  %v1634_v5 = vld [vmem:[%s2973_s3 + $0xe0] sm:$0x3f] }
  0x1c   :  { %s1866_s29 = sld [smem:[#allocation6 + $0x5]]  ;;  %v248_v47 = vmul.f32 %v1903_v40, %v236_v28  ;;  %v241_v55 = vmul.f32 %v1903_v40, %v240_v45  ;;  %v250_v56 = vmul.f32 %v1924_v52, %v240_v45 }
  0x1d   :  { %429 = vperm.xlu2 %1662, %v1494_v7   ;;  %s1895_s13 = sld [smem:[#allocation3 + $0x28]]  ;;  %v234_v48 = vadd.f32 %v233_v36, %v230_v41  ;;  %v267_v49 = vstv %s1844_s20  ;;  %v247_v53 = vadd.f32 %v246_v38, %v245_v46  ;;  %v1648_v41 = vld [vmem:[%s2973_s3 + $0xf0] sm:$0x3f] }
  0x1e   :  { %387 = vperm.xlu1 %1661, %v1487_v8   ;;  %345 = vperm.xlu0 %1660, %v1480_v9   ;;  %s1914_s26 = sld [smem:[#allocation3 + $0x29]]  ;;  %v270_v50 = vstv %s1849_s23  ;;  %v268_v58 = vmul.f32 %v267_v49, %v1872_v29  ;;  %v285_v62 = vmul.f32 %v1877_v30, %v267_v49 }
  0x1f   :  { %v274_v51 = vstv %s1857_s1  ;;  %s1919_s27 = sld [smem:[#allocation3 + $0x2a]]  ;;  %v238_v54 = vadd.f32 %v237_v42, %v234_v48  ;;  %v249_v57 = vadd.f32 %v248_v47, %v247_v53  ;;  %v271_v59 = vmul.f32 %v1877_v30, %v270_v50 }
  0x20   :  { %s1926_s18 = sld [smem:[#allocation3 + $0x2b]]  ;;  %v275_v60 = vmul.f32 %v1882_v31, %v274_v51  ;;  %v278_v61 = vstv %s1859_s28  ;;  %v286_v0 = vmul.f32 %v1882_v31, %v270_v50  ;;  %v288_v1 = vmul.f32 %v1887_v32, %v274_v51 }
  0x21   :  { %s1930_s20 = sld [smem:[#allocation3 + $0x2c]]  ;;  %v272_v63 = vadd.f32 %v271_v59, %v268_v58  ;;  %v1948_v3 = vadd.f32 %v241_v55, %v238_v54  ;;  %v282_v4 = vstv %s1863_s2  ;;  %v1959_v7 = vadd.f32 %v250_v56, %v249_v57 }
  0x22   :  { %s1935_s23 = sld [smem:[#allocation3 + $0x37]]  ;;  %v279_v9 = vmul.f32 %v1887_v32, %v278_v61 }
  0x23   :  { %s1939_s1 = sld [smem:[#allocation3 + $0x38]]  ;;  %v276_v8 = vadd.f32 %v275_v60, %v272_v63 }
  0x24   :  { %s1943_s7 = sld [smem:[#allocation3 + $0x39]] }
  0x25   :  { %555 = vperm.xlu2 %1662, %v1515_v10   ;;  %s1951_s28 = sld [smem:[#allocation3 + $0xa]]  ;;  %v287_v10 = vadd.f32 %v286_v0, %v285_v62 }
  0x26   :  { %513 = vperm.xlu1 %1661, %v1508_v11   ;;  %471 = vperm.xlu0 %1660, %v1501_v12   ;;  %s1962_s15 = sld [smem:[#allocation3 + $0x3a]]  ;;  %v290_v11 = vmul.f32 %v1903_v40, %v278_v61  ;;  %v393_v12 = vstv %s1895_s13 }
  0x27   :  { %s1966_s2 = sld [smem:[#allocation3 + $0xb]]  ;;  %v411_v27 = vmul.f32 %v1877_v30, %v393_v12  ;;  %v408_v35 = vstv %s1930_s20 }
  0x28   :  { %s1970_s16 = sld [smem:[#allocation3 + $0xc]]  ;;  %v519_v33 = vstv %s1935_s23  ;;  %v409_v50 = vmul.f32 %v1903_v40, %v408_v35  ;;  %v418_v0 = vmul.f32 %v1924_v52, %v408_v35 }
  0x29   :  { %s1975_s17 = sld [smem:[#allocation3 + $0x3b]]  ;;  %v522_v34 = vstv %s1939_s1  ;;  %v520_v48 = vmul.f32 %v519_v33, %v1872_v29  ;;  %v537_v61 = vmul.f32 %v1877_v30, %v519_v33 }
  0x2a   :  { %s1984_s13 = sld [smem:[#allocation3 + $0xd]]  ;;  %v526_v37 = vstv %s1943_s7  ;;  %v523_v49 = vmul.f32 %v1877_v30, %v522_v34  ;;  %v538_v62 = vmul.f32 %v1882_v31, %v522_v34 }
  0x2b   :  { %v141_v38 = vstv %s1951_s28  ;;  %v527_v51 = vmul.f32 %v1882_v31, %v526_v37  ;;  %s2022_s30 = sld [smem:[#allocation3 + $0x1]] }
  0x2c   :  { %v530_v56 = vstv %s1962_s15  ;;  %v524_v58 = vadd.f32 %v523_v49, %v520_v48  ;;  %s2027_s6 = sld [smem:[#allocation6 + $0xb]] }
  0x2d   :  { %681 = vperm.xlu2 %1662, %v1536_v13   ;;  %v289_v13 = vadd.f32 %v288_v1, %v287_v10  ;;  %v144_v53 = vstv %s1966_s2  ;;  %v540_v1 = vmul.f32 %v1887_v32, %v526_v37  ;;  %v142_v10 = vmul.f32 %v141_v38, %v1872_v29  ;;  %s2039_s20 = sld [smem:[#allocation3 + $0x3]] }
  0x2e   :  { %639 = vperm.xlu1 %1661, %v1529_v14   ;;  %597 = vperm.xlu0 %1660, %v1522_v15   ;;  %v396_v14 = vstv %s1914_s26  ;;  %v400_v15 = vstv %s1919_s27  ;;  %s2003_s26 = sld [smem:[#allocation3 + $0xe]]  ;;  %v148_v54 = vstv %s1970_s16 }
  0x2f   :  { %v397_v25 = vmul.f32 %v1877_v30, %v396_v14  ;;  %v401_v26 = vmul.f32 %v1882_v31, %v400_v15  ;;  %v412_v28 = vmul.f32 %v1882_v31, %v396_v14  ;;  %v414_v45 = vmul.f32 %v1887_v32, %v400_v15  ;;  %s2009_s27 = sld [smem:[#allocation6 + $0x8]] }
  0x30   :  { %v534_v57 = vstv %s1975_s17  ;;  %s2044_s23 = sld [smem:[#allocation6 + $0x2]] }
  0x31   :  { %s2049_s1 = sld [smem:[#allocation3 + $0x4]] }
  0x32   :  { %s2053_s7 = sld [smem:[#allocation6]] }
  0x33   :  { %s2057_s8 = sld [smem:[#allocation3 + $0x46]] }
  0x34   :  { %s2062_s9 = sld [smem:[#allocation3 + $0x47]] }
  0x35   :  { %807 = vperm.xlu2 %1662, %v1557_v16   ;;  %v254_v16 = vstv %s1842_s19  ;;  %s2066_s28 = sld [smem:[#allocation3 + $0x48]] }
  0x36   :  { %765 = vperm.xlu1 %1661, %v1550_v17   ;;  %723 = vperm.xlu0 %1660, %v1543_v18   ;;  %v296_v17 = vstv %s1866_s29  ;;  %v283_v18 = vmul.f32 %v1903_v40, %v282_v4  ;;  %s2070_s10 = sld [smem:[#allocation3 + $0x49]] }
  0x37   :  { %s2074_s11 = sld [smem:[#allocation3 + $0x4a]] }
  0x38   :  { %s2087_s12 = sld [smem:[#allocation6 + $0xe]] }
  0x39   :  { %s2091_s19 = sld [smem:[#allocation3 + $0xf]] }
  0x3a   :  { %s2096_s29 = sld [smem:[#allocation3 + $0x10]] }
  0x3b   :  { %s2100_s14 = sld [smem:[#allocation3 + $0x11]] }
  0x3c   :  { %s2105_s15 = sld [smem:[#allocation3 + $0x12]] }
  0x3d   :  { %933 = vperm.xlu2 %1662, %v1578_v19   ;;  %v252_v19 = vmax.f32 %v1948_v3, %v1959_v7  ;;  %v548_v7 = vstv %s2027_s6  ;;  %s2110_s2 = sld [smem:[#allocation3 + $0x13]] }
  0x3e   :  { %891 = vperm.xlu1 %1661, %v1571_v20   ;;  %849 = vperm.xlu0 %1660, %v1564_v21   ;;  %v280_v20 = vadd.f32 %v279_v9, %v276_v8  ;;  %v292_v21 = vmul.f32 %v1924_v52, %v282_v4  ;;  %v528_v4 = vadd.f32 %v527_v51, %v524_v58  ;;  %s2117_s16 = sld [smem:[#allocation6 + $0x3]] }
  0x3f   :  { %v542_v8 = vmul.f32 %v1903_v40, %v530_v56  ;;  %v535_v9 = vmul.f32 %v1903_v40, %v534_v57  ;;  %s2121_s17 = sld [smem:[#allocation3 + $0x5]] }
  0x40   :  { %v1999_v42 = vadd.f32 %v283_v18, %v280_v20  ;;  %v156_v18 = vstv %s2003_s26  ;;  %s2134_s21 = sld [smem:[#allocation3 + $0x7]] }
  0x41   :  { %v157_v37 = vmul.f32 %v1903_v40, %v156_v18  ;;  %s2139_s22 = sld [smem:[#allocation3 + $0x8]] }
  0x42   :  { %s2151_s24 = sld [smem:[#allocation3 + $0x9]] }
  0x43   :  { %s2159_s25 = sld [smem:[#allocation3 + $0x55]] }
  0x44   :  { %s2163_s26 = sld [smem:[#allocation3 + $0x56]] }
  0x45   :  { %1059 = vperm.xlu2 %1662, %v1599_v22   ;;  %v394_v22 = vmul.f32 %v393_v12, %v1872_v29  ;;  %v149_v12 = vmul.f32 %v1882_v31, %v148_v54  ;;  %s2189_s6 = sld [smem:[#allocation3 + $0x59]] }
  0x46   :  { %1017 = vperm.xlu1 %1661, %v1592_v23   ;;  %975 = vperm.xlu0 %1660, %v1585_v24   ;;  %v291_v23 = vadd.f32 %v290_v11, %v289_v13  ;;  %v404_v24 = vstv %s1926_s18  ;;  %s2033_s18 = sld [smem:[#allocation3 + $0x2]]  ;;  %v145_v11 = vmul.f32 %v1877_v30, %v144_v53 }
  0x47   :  { %v398_v36 = vadd.f32 %v397_v25, %v394_v22  ;;  %v416_v55 = vmul.f32 %v1903_v40, %v404_v24  ;;  %v159_v22 = vmul.f32 %v1877_v30, %v141_v38 }
  0x48   :  { %v2005_v46 = vadd.f32 %v292_v21, %v291_v23  ;;  %v146_v20 = vadd.f32 %v145_v11, %v142_v10  ;;  %v160_v23 = vmul.f32 %v1882_v31, %v144_v53  ;;  %v652_v11 = vstv %s2066_s28  ;;  %s2236_s28 = sld [smem:[#allocation3 + $0x20]] }
  0x49   :  { %v402_v47 = vadd.f32 %v401_v26, %v398_v36  ;;  %v544_v26 = vmul.f32 %v1924_v52, %v534_v57 }
  0x4a   :  { %v294_v63 = vmax.f32 %v1999_v42, %v2005_v46  ;;  %v161_v33 = vadd.f32 %v160_v23, %v159_v22  ;;  %v656_v22 = vstv %s2070_s10  ;;  %s2241_s10 = sld [smem:[#allocation3 + $0x21]] }
  0x4c   :  { %v66_v48 = vstv %s2033_s18  ;;  %s2193_s18 = sld [smem:[#allocation3 + $0x23]] }
  0x4d   :  { %1185 = vperm.xlu2 %1662, %v1620_v39   ;;  %v1655_v39 = vld [vmem:[%s2973_s3 + $0xf8] sm:$0x3f]  ;;  %s2018_s3 = sld [smem:[#allocation3]]  ;;  %v67_v53 = vmul.f32 %v1882_v31, %v66_v48  ;;  %v80_v3 = vmul.f32 %v1887_v32, %v66_v48 }
  0x4e   :  { %1143 = vperm.xlu1 %1661, %v1613_v43   ;;  %1101 = vperm.xlu0 %1660, %v1606_v44   ;;  %v405_v43 = vmul.f32 %v1887_v32, %v404_v24  ;;  %v413_v44 = vadd.f32 %v412_v28, %v411_v27  ;;  %v162_v27 = vmul.f32 %v1887_v32, %v148_v54  ;;  %v70_v54 = vstv %s2039_s20  ;;  %s2198_s20 = sld [smem:[#allocation3 + $0x24]] }
  0x4f   :  { %v150_v28 = vadd.f32 %v149_v12, %v146_v20 }
  0x50   :  { %v406_v59 = vadd.f32 %v405_v43, %v402_v47  ;;  %v415_v60 = vadd.f32 %v414_v45, %v413_v44  ;;  %v163_v42 = vadd.f32 %v162_v27, %v161_v33  ;;  %v166_v43 = vmul.f32 %v1924_v52, %v156_v18 }
  0x51   :  { %v422_v45 = vstv %s2009_s27  ;;  %s2168_s27 = sld [smem:[#allocation3 + $0x57]] }
  0x52   :  { %v2041_v13 = vadd.f32 %v409_v50, %v406_v59  ;;  %v417_v14 = vadd.f32 %v416_v55, %v415_v60  ;;  %v255_v55 = vadd.f32 %v254_v16, %v252_v19  ;;  %v74_v19 = vstv %s2049_s1  ;;  %s2213_s1 = sld [smem:[#allocation3 + $0x26]] }
  0x53   :  { %v59_v35 = vstv %s2018_s3  ;;  %s2174_s3 = sld [smem:[#allocation6 + $0x1]] }
  0x54   :  { %v419_v36 = vadd.f32 %v418_v0, %v417_v14  ;;  %v60_v38 = vmul.f32 %v59_v35, %v1872_v29  ;;  %v77_v58 = vmul.f32 %v1877_v30, %v59_v35  ;;  %v82_v0 = vmul.f32 %v1903_v40, %v70_v54 }
  0x55   :  { %1311 = vperm.xlu2 %1662, %v1641_v2   ;;  %v152_v2 = vstv %s1984_s13  ;;  %s2126_s13 = sld [smem:[#allocation3 + $0x6]]  ;;  %v183_v35 = vstv %s2091_s19 }
  0x56   :  { %1269 = vperm.xlu1 %1661, %v1634_v5   ;;  %1227 = vperm.xlu0 %1660, %v1627_v6   ;;  %v531_v5 = vmul.f32 %v1887_v32, %v530_v56  ;;  %v539_v6 = vadd.f32 %v538_v62, %v537_v61  ;;  %v153_v21 = vmul.f32 %v1887_v32, %v152_v2  ;;  %s2265_s19 = sld [smem:[#allocation3 + $0x64]] }
  0x57   :  { %v164_v34 = vmul.f32 %v1903_v40, %v152_v2  ;;  %v2083_v56 = vadd.f32 %v296_v17, %v294_v63  ;;  %v420_v57 = vmax.f32 %v2041_v13, %v419_v36  ;;  %v71_v17 = vmul.f32 %v1887_v32, %v70_v54 }
  0x58   :  { %v541_v15 = vadd.f32 %v540_v1, %v539_v6  ;;  %v532_v24 = vadd.f32 %v531_v5, %v528_v4  ;;  %v645_v1 = vstv %s2057_s8  ;;  %v256_v2 = vmax.f32 %v255_v55, 0.0  ;;  %s2220_s8 = sld [smem:[#allocation3 + $0x1e]] }
  0x59   :  { %v165_v50 = vadd.f32 %v164_v34, %v163_v42  ;;  %v298_v4 = vmax.f32 %v2083_v56, 0.0  ;;  %v170_v5 = vstv %s2044_s23  ;;  %v648_v6 = vstv %s2062_s9  ;;  %s2208_s23 = sld [smem:[#allocation3 + $0x25]] }
  0x5a   :  { %v543_v25 = vadd.f32 %v542_v8, %v541_v15  ;;  %v536_v46 = vadd.f32 %v535_v9, %v532_v24  ;;  %v2107_v8 = vadd.f32 %v422_v45, %v420_v57  ;;  %v75_v13 = vmul.f32 %v1903_v40, %v74_v19  ;;  %s2232_s9 = sld [smem:[#allocation3 + $0x1f]] }
  0x5b   :  { %v167_v60 = vadd.f32 %v166_v43, %v165_v50  ;;  %v646_v14 = vmul.f32 %v645_v1, %v1872_v29  ;;  %v649_v15 = vmul.f32 %v1877_v30, %v648_v6  ;;  %v653_v24 = vmul.f32 %v1882_v31, %v652_v11 }
  0x5c   :  { %v545_v47 = vadd.f32 %v544_v26, %v543_v25  ;;  %v663_v25 = vmul.f32 %v1877_v30, %v645_v1  ;;  %v664_v26 = vmul.f32 %v1882_v31, %v648_v6  ;;  %v424_v33 = vmax.f32 %v2107_v8, 0.0 }
  0x5d   :  { %v650_v23 = vadd.f32 %v649_v15, %v646_v14  ;;  %v660_v43 = vstv %s2074_s11  ;;  %v668_v56 = vmul.f32 %v1903_v40, %v656_v22  ;;  %s2252_s11 = sld [smem:[#allocation3 + $0x22]] }
  0x5e   :  { %1395 = vperm.xlu1 %1661, %v1655_v39   ;;  %1353 = vperm.xlu0 %1660, %v1648_v41   ;;  %v62_v39 = vstv %s2022_s30  ;;  %v154_v41 = vadd.f32 %v153_v21, %v150_v28  ;;  %v546_v16 = vmax.f32 %v536_v46, %v545_v47  ;;  %v84_v21 = vmul.f32 %v1924_v52, %v74_v19  ;;  %s2182_s30 = sld [smem:[#allocation3 + $0x58]] }
  0x5f   :  { %v63_v44 = vmul.f32 %v1877_v30, %v62_v39  ;;  %v78_v61 = vmul.f32 %v1882_v31, %v62_v39  ;;  %v186_v39 = vstv %s2096_s29  ;;  %v654_v45 = vadd.f32 %v653_v24, %v650_v23  ;;  %s2269_s29 = sld [smem:[#allocation3 + $0x65]] }
  0x60   :  { %v158_v59 = vadd.f32 %v157_v37, %v154_v41  ;;  %v2112_v12 = vadd.f32 %v548_v7, %v546_v16  ;;  %v665_v37 = vadd.f32 %v664_v26, %v663_v25  ;;  %v190_v46 = vstv %s2100_s14  ;;  %s2271_s14 = sld [smem:[#allocation6 + $0x7]] }
  0x61   :  { %v64_v51 = vadd.f32 %v63_v44, %v60_v38  ;;  %v79_v63 = vadd.f32 %v78_v61, %v77_v58  ;;  %v666_v38 = vmul.f32 %v1887_v32, %v652_v11  ;;  %v657_v44 = vmul.f32 %v1887_v32, %v656_v22 }
  0x62   :  { %v168_v9 = vmax.f32 %v158_v59, %v167_v60  ;;  %v550_v36 = vmax.f32 %v2112_v12, 0.0  ;;  %v184_v47 = vmul.f32 %v183_v35, %v1872_v29  ;;  %v187_v48 = vmul.f32 %v1877_v30, %v186_v39 }
  0x63   :  { %v68_v62 = vadd.f32 %v67_v53, %v64_v51  ;;  %v81_v10 = vadd.f32 %v80_v3, %v79_v63  ;;  %v88_v51 = vstv %s2053_s7  ;;  %v674_v53 = vstv %s2087_s12  ;;  %s2218_s7 = sld [smem:[#allocation3 + $0x27]] }
  0x64   :  { %v2131_v34 = vadd.f32 %v170_v5, %v168_v9  ;;  %v661_v54 = vmul.f32 %v1903_v40, %v660_v43  ;;  %v667_v55 = vadd.f32 %v666_v38, %v665_v37  ;;  %v670_v57 = vmul.f32 %v1924_v52, %v660_v43  ;;  %s2257_s12 = sld [smem:[#allocation6 + $0x11]] }
  0x65   :  { %v72_v18 = vadd.f32 %v71_v17, %v68_v62  ;;  %v83_v20 = vadd.f32 %v82_v0, %v81_v10  ;;  %v188_v58 = vadd.f32 %v187_v48, %v184_v47  ;;  %v191_v59 = vmul.f32 %v1882_v31, %v190_v46 }
  0x66   :  { %v172_v50 = vmax.f32 %v2131_v34, 0.0  ;;  %v201_v60 = vmul.f32 %v1877_v30, %v183_v35  ;;  %v202_v61 = vmul.f32 %v1882_v31, %v186_v39  ;;  %v658_v7 = vadd.f32 %v657_v44, %v654_v45 }
  0x67   :  { %v262_v49 = vpop.permute.xlu2 %261  ;;  %v76_v41 = vadd.f32 %v75_v13, %v72_v18  ;;  %v85_v42 = vadd.f32 %v84_v21, %v83_v20  ;;  %v194_v16 = vstv %s2105_s15  ;;  %v204_v17 = vmul.f32 %v1887_v32, %v190_v46  ;;  %s2278_s15 = sld [smem:[#allocation3 + $0x66]] }
  0x68   :  { %v2128_v27 = vmul.f32 %v262_v49, %v256_v2  ;;  %v203_v19 = vadd.f32 %v202_v61, %v201_v60  ;;  %v99_v62 = vstv %s2121_s17  ;;  %v102_v63 = vstv %s2126_s13  ;;  %s2292_s17 = sld [smem:[#allocation3 + $0x68]] }
  0x69   :  { %v86_v3 = vmax.f32 %v76_v41, %v85_v42  ;;  %v106_v0 = vstv %s2134_s21  ;;  %v669_v1 = vadd.f32 %v668_v56, %v667_v55  ;;  %v198_v2 = vstv %s2110_s2  ;;  %s2282_s2 = sld [smem:[#allocation6 + $0x6]] }
  0x6a   :  { %v110_v5 = vstv %s2139_s22  ;;  %v192_v9 = vadd.f32 %v191_v59, %v188_v58  ;;  %v195_v10 = vmul.f32 %v1887_v32, %v194_v16  ;;  %v100_v11 = vmul.f32 %v99_v62, %v1872_v29  ;;  %s2295_s13 = sld [smem:[#allocation3 + $0x32]] }
  0x6b   :  { %v103_v13 = vmul.f32 %v1877_v30, %v102_v63  ;;  %v2178_v14 = vadd.f32 %v88_v51, %v86_v3  ;;  %v205_v15 = vadd.f32 %v204_v17, %v203_v19  ;;  %v206_v18 = vmul.f32 %v1903_v40, %v194_v16  ;;  %s2300_s21 = sld [smem:[#allocation3 + $0x33]] }
  0x6c   :  { %v107_v20 = vmul.f32 %v1882_v31, %v106_v0  ;;  %v662_v21 = vadd.f32 %v661_v54, %v658_v7  ;;  %v114_v22 = vstv %s2151_s24  ;;  %v111_v24 = vmul.f32 %v1887_v32, %v110_v5  ;;  %s2305_s22 = sld [smem:[#allocation3 + $0x34]] }
  0x6d   :  { %v104_v23 = vadd.f32 %v103_v13, %v100_v11  ;;  %v671_v25 = vadd.f32 %v670_v57, %v669_v1  ;;  %v199_v26 = vmul.f32 %v1903_v40, %v198_v2  ;;  %v117_v35 = vmul.f32 %v1877_v30, %v99_v62  ;;  %s2309_s24 = sld [smem:[#allocation3 + $0x35]] }
  0x6e   :  { %v196_v37 = vadd.f32 %v195_v10, %v192_v9  ;;  %v118_v39 = vmul.f32 %v1882_v31, %v102_v63  ;;  %v120_v41 = vmul.f32 %v1887_v32, %v106_v0  ;;  %v207_v42 = vadd.f32 %v206_v18, %v205_v15 }
  0x6f   :  { %v304_v28 = vpop.permute.xlu2 %303  ;;  %v108_v38 = vadd.f32 %v107_v20, %v104_v23  ;;  %v115_v43 = vmul.f32 %v1903_v40, %v114_v22  ;;  %v771_v44 = vstv %s2159_s25  ;;  %v774_v45 = vstv %s2163_s26  ;;  %s2316_s25 = sld [smem:[#allocation3 + $0x36]] }
  0x70   :  { %v2146_v49 = vmul.f32 %v304_v28, %v298_v4  ;;  %v212_v4 = vstv %s2117_s16  ;;  %v208_v28 = vmul.f32 %v1924_v52, %v198_v2  ;;  %v119_v47 = vadd.f32 %v118_v39, %v117_v35  ;;  %s2287_s16 = sld [smem:[#allocation3 + $0x67]] }
  0x71   :  { %v112_v46 = vadd.f32 %v111_v24, %v108_v38  ;;  %v122_v48 = vmul.f32 %v1903_v40, %v110_v5  ;;  %v778_v51 = vstv %s2168_s27  ;;  %v90_v56 = vmax.f32 %v2178_v14, 0.0  ;;  %s2321_s26 = sld [smem:[#allocation3 + $0x2d]] }
  0x72   :  { %v672_v57 = vmax.f32 %v662_v21, %v671_v25  ;;  %v772_v58 = vmul.f32 %v771_v44, %v1872_v29  ;;  %v128_v59 = vstv %s2174_s3  ;;  %v121_v60 = vadd.f32 %v120_v41, %v119_v47  ;;  %s2325_s27 = sld [smem:[#allocation3 + $0x2e]] }
  0x73   :  { %v124_v61 = vmul.f32 %v1924_v52, %v114_v22  ;;  %v775_v3 = vmul.f32 %v1877_v30, %v774_v45  ;;  %v200_v8 = vadd.f32 %v199_v26, %v196_v37  ;;  %v779_v7 = vmul.f32 %v1882_v31, %v778_v51  ;;  %s2330_s3 = sld [smem:[#allocation3 + $0x2f]] }
  0x74   :  { %v789_v16 = vmul.f32 %v1877_v30, %v771_v44  ;;  %v209_v19 = vadd.f32 %v208_v28, %v207_v42  ;;  %v116_v62 = vadd.f32 %v115_v43, %v112_v46  ;;  %v123_v63 = vadd.f32 %v122_v48, %v121_v60 }
  0x75   :  { %v776_v0 = vadd.f32 %v775_v3, %v772_v58  ;;  %v2228_v2 = vadd.f32 %v674_v53, %v672_v57  ;;  %v790_v5 = vmul.f32 %v1882_v31, %v774_v45  ;;  %v351_v13 = vstv %s2193_s18  ;;  %s2349_s18 = sld [smem:[#allocation3 + $0x31]] }
  0x76   :  { %v125_v9 = vadd.f32 %v124_v61, %v123_v63  ;;  %v354_v15 = vstv %s2198_s20  ;;  %v210_v21 = vmax.f32 %v200_v8, %v209_v19  ;;  %v358_v24 = vstv %s2208_s23  ;;  %s2357_s20 = sld [smem:[#allocation3 + $0x73]] }
  0x77   :  { %v430_v6 = vpop.permute.xlu2 %429  ;;  %v780_v10 = vadd.f32 %v779_v7, %v776_v0  ;;  %v791_v14 = vadd.f32 %v790_v5, %v789_v16  ;;  %v352_v25 = vmul.f32 %v351_v13, %v1872_v29  ;;  %v355_v26 = vmul.f32 %v1877_v30, %v354_v15  ;;  %s2361_s23 = sld [smem:[#allocation3 + $0x74]] }
  0x78   :  { %v2204_v54 = vmul.f32 %v430_v6, %v424_v33  ;;  %v782_v33 = vstv %s2182_s30  ;;  %v792_v6 = vmul.f32 %v1887_v32, %v778_v51  ;;  %v126_v22 = vmax.f32 %v116_v62, %v125_v9  ;;  %s2338_s30 = sld [smem:[#allocation3 + $0x30]] }
  0x79   :  { %v783_v11 = vmul.f32 %v1887_v32, %v782_v33  ;;  %v794_v53 = vmul.f32 %v1903_v40, %v782_v33  ;;  %v362_v39 = vstv %s2213_s1  ;;  %v369_v41 = vmul.f32 %v1877_v30, %v351_v13  ;;  %s2365_s1 = sld [smem:[#allocation3 + $0x75]] }
  0x7a   :  { %v793_v23 = vadd.f32 %v792_v6, %v791_v14  ;;  %v129_v28 = vadd.f32 %v128_v59, %v126_v22  ;;  %v370_v42 = vmul.f32 %v1882_v31, %v354_v15  ;;  %v356_v44 = vadd.f32 %v355_v26, %v352_v25 }
  0x7b   :  { %v784_v35 = vadd.f32 %v783_v11, %v780_v10  ;;  %v359_v45 = vmul.f32 %v1882_v31, %v358_v24  ;;  %v372_v46 = vmul.f32 %v1887_v32, %v358_v24  ;;  %v213_v47 = vadd.f32 %v212_v4, %v210_v21 }
  0x7c   :  { %v795_v38 = vadd.f32 %v794_v53, %v793_v23  ;;  %v130_v43 = vmax.f32 %v129_v28, 0.0  ;;  %v366_v48 = vstv %s2218_s7  ;;  %v371_v51 = vadd.f32 %v370_v42, %v369_v41  ;;  %s2370_s7 = sld [smem:[#allocation6 + $0xa]] }
  0x7d   :  { %v312_v58 = vstv %s2232_s9  ;;  %v316_v59 = vstv %s2236_s28  ;;  %v363_v61 = vmul.f32 %v1887_v32, %v362_v39  ;;  %v374_v3 = vmul.f32 %v1903_v40, %v362_v39  ;;  %s2381_s9 = sld [smem:[#allocation3 + $0x77]] }
  0x7e   :  { %v320_v4 = vstv %s2241_s10  ;;  %v360_v8 = vadd.f32 %v359_v45, %v356_v44  ;;  %v373_v33 = vadd.f32 %v372_v46, %v371_v51  ;;  %v313_v16 = vmul.f32 %v1877_v30, %v312_v58  ;;  %s2385_s28 = sld [smem:[#allocation3 + $0x41]] }
  0x7f   :  { %v556_v17 = vpop.permute.xlu2 %555  ;;  %v214_v19 = vmax.f32 %v213_v47, 0.0  ;;  %v367_v62 = vmul.f32 %v1903_v40, %v366_v48  ;;  %v317_v63 = vmul.f32 %v1882_v31, %v316_v59  ;;  %v324_v5 = vstv %s2252_s11  ;;  %s2389_s10 = sld [smem:[#allocation3 + $0x42]] }
  0x80   :  { %v95_v55 = vpop.permute.xlu0 %94  ;;  %v2224_v1 = vmul.f32 %v556_v17, %v550_v36  ;;  %v178_v12 = vpop.permute.xlu1 %177  ;;  %v786_v36 = vstv %s2189_s6  ;;  %v676_v17 = vmax.f32 %v2228_v2, 0.0  ;;  %v321_v9 = vmul.f32 %v1887_v32, %v320_v4  ;;  %s2340_s6 = sld [smem:[#allocation6 + $0x14]] }
  0x81   :  { %v2245_v18 = vmul.f32 %v178_v12, %v172_v50  ;;  %v97_v20 = vmul.f32 %v95_v55, %v90_v56  ;;  %v787_v37 = vmul.f32 %v1903_v40, %v786_v36  ;;  %v796_v34 = vmul.f32 %v1924_v52, %v786_v36  ;;  %s2393_s11 = sld [smem:[#allocation3 + $0x43]] }
  0x82   :  { %v309_v55 = vstv %s2220_s8  ;;  %v376_v11 = vmul.f32 %v1924_v52, %v366_v48  ;;  %v328_v12 = vmul.f32 %v1882_v31, %v312_v58  ;;  %v364_v14 = vadd.f32 %v363_v61, %v360_v8  ;;  %s2376_s8 = sld [smem:[#allocation3 + $0x76]] }
  0x83   :  { %v788_v57 = vadd.f32 %v787_v37, %v784_v35  ;;  %v797_v60 = vadd.f32 %v796_v34, %v795_v38  ;;  %v310_v7 = vmul.f32 %v309_v55, %v1872_v29  ;;  %v327_v13 = vmul.f32 %v1877_v30, %v309_v55 }
  0x84   :  { %v375_v53 = vadd.f32 %v374_v3, %v373_v33  ;;  %v800_v21 = vstv %s2257_s12  ;;  %v325_v22 = vmul.f32 %v1903_v40, %v324_v5  ;;  %v332_v24 = vmul.f32 %v1903_v40, %v320_v4  ;;  %s2395_s12 = sld [smem:[#allocation6 + $0x9]] }
  0x85   :  { %v314_v6 = vadd.f32 %v313_v16, %v310_v7  ;;  %v798_v10 = vmax.f32 %v788_v57, %v797_v60  ;;  %v329_v23 = vadd.f32 %v328_v12, %v327_v13  ;;  %v897_v28 = vstv %s2265_s19  ;;  %s2401_s19 = sld [smem:[#allocation6 + $0x17]] }
  0x86   :  { %v900_v35 = vstv %s2269_s29  ;;  %v380_v34 = vstv %s2271_s14  ;;  %v334_v38 = vmul.f32 %v1924_v52, %v324_v5  ;;  %v368_v41 = vadd.f32 %v367_v62, %v364_v14  ;;  %s2518_s29 = sld [smem:[#allocation3 + $0x52]] }
  0x87   :  { %v318_v15 = vadd.f32 %v317_v63, %v314_v6  ;;  %v2311_v39 = vadd.f32 %v800_v21, %v798_v10  ;;  %v377_v42 = vadd.f32 %v376_v11, %v375_v53  ;;  %v898_v45 = vmul.f32 %v897_v28, %v1872_v29  ;;  %s2522_s14 = sld [smem:[#allocation3 + $0x53]] }
  0x88   :  { %v136_v50 = vpop.permute.xlu0 %135  ;;  %v220_v36 = vpop.permute.xlu1 %219  ;;  %v901_v46 = vmul.f32 %v1877_v30, %v900_v35  ;;  %v338_v48 = vstv %s2282_s2  ;;  %v908_v51 = vstv %s2287_s16  ;;  %v915_v55 = vmul.f32 %v1877_v30, %v897_v28  ;;  %s2415_s16 = sld [smem:[#allocation3 + $0x44]] }
  0x89   :  { %v138_v56 = vmul.f32 %v136_v50, %v130_v43  ;;  %v322_v26 = vadd.f32 %v321_v9, %v318_v15  ;;  %v222_v37 = vmul.f32 %v220_v36, %v214_v19  ;;  %v904_v43 = vstv %s2278_s15  ;;  %s2527_s15 = sld [smem:[#allocation3 + $0x54]] }
  0x8a   :  { %v902_v57 = vadd.f32 %v901_v46, %v898_v45  ;;  %v905_v58 = vmul.f32 %v1882_v31, %v904_v43  ;;  %v802_v60 = vmax.f32 %v2311_v39, 0.0  ;;  %v378_v61 = vmax.f32 %v368_v41, %v377_v42  ;;  %s2543_s2 = sld [smem:[#allocation3 + $0x4b]] }
  0x8b   :  { %v139_v0 = vadd.f32 %v138_v56, %v97_v20  ;;  %v330_v20 = vmul.f32 %v1887_v32, %v316_v59  ;;  %v916_v59 = vmul.f32 %v1882_v31, %v900_v35  ;;  %v918_v3 = vmul.f32 %v1887_v32, %v904_v43 }
  0x8c   :  { %v477_v4 = vstv %s2295_s13  ;;  %v912_v33 = vstv %s2292_s17  ;;  %v480_v16 = vstv %s2300_s21  ;;  %v909_v62 = vmul.f32 %v1887_v32, %v908_v51  ;;  %s2427_s21 = sld [smem:[#allocation3 + $0x45]] }
  0x8d   :  { %v181_v25 = vadd.f32 %v2245_v18, %v139_v0  ;;  %v331_v50 = vadd.f32 %v330_v20, %v329_v23  ;;  %v326_v18 = vadd.f32 %v325_v22, %v322_v26  ;;  %v917_v7 = vadd.f32 %v916_v59, %v915_v55  ;;  %s2551_s17 = sld [smem:[#allocation3 + $0x4d]] }
  0x8e   :  { %v920_v63 = vmul.f32 %v1903_v40, %v908_v51  ;;  %v484_v0 = vstv %s2305_s22  ;;  %v906_v5 = vadd.f32 %v905_v58, %v902_v57  ;;  %v488_v9 = vstv %s2309_s24  ;;  %s2430_s22 = sld [smem:[#allocation3 + $0x3c]] }
  0x8f   :  { %v333_v44 = vadd.f32 %v332_v24, %v331_v50  ;;  %v223_v47 = vadd.f32 %v222_v37, %v181_v25  ;;  %v919_v6 = vadd.f32 %v918_v3, %v917_v7  ;;  %v478_v10 = vmul.f32 %v477_v4, %v1872_v29  ;;  %s2556_s13 = sld [smem:[#allocation3 + $0x4e]] }
  0x90   :  { %v2344_v11 = vadd.f32 %v380_v34, %v378_v61  ;;  %v913_v13 = vmul.f32 %v1903_v40, %v912_v33  ;;  %v485_v12 = vmul.f32 %v1882_v31, %v484_v0  ;;  %v922_v14 = vmul.f32 %v1924_v52, %v912_v33  ;;  %s2574_s24 = sld [smem:[#allocation6 + $0x10]] }
  0x91   :  { %v335_v56 = vadd.f32 %v334_v38, %v333_v44  ;;  %v265_v19 = vadd.f32 %v2128_v27, %v223_v47  ;;  %v481_v27 = vmul.f32 %v1877_v30, %v480_v16  ;;  %v492_v53 = vstv %s2316_s25  ;;  %s2582_s25 = sld [smem:[#allocation3 + $0x91]] }
  0x92   :  { %v495_v15 = vmul.f32 %v1877_v30, %v477_v4  ;;  %v489_v21 = vmul.f32 %v1887_v32, %v488_v9  ;;  %v496_v22 = vmul.f32 %v1882_v31, %v480_v16  ;;  %v498_v23 = vmul.f32 %v1887_v32, %v484_v0 }
  0x93   :  { %v336_v8 = vmax.f32 %v326_v18, %v335_v56  ;;  %v482_v20 = vadd.f32 %v481_v27, %v478_v10  ;;  %v910_v24 = vadd.f32 %v909_v62, %v906_v5  ;;  %v921_v25 = vadd.f32 %v920_v63, %v919_v6  ;;  %v346_v18 = vpop.permute.xlu0 %345 }
  0x94   :  { %v500_v26 = vmul.f32 %v1903_v40, %v488_v9  ;;  %v435_v28 = vstv %s2321_s26  ;;  %v497_v37 = vadd.f32 %v496_v22, %v495_v15  ;;  %v438_v34 = vstv %s2325_s27  ;;  %s2440_s26 = sld [smem:[#allocation3 + $0x3d]] }
  0x95   :  { %v339_v36 = vadd.f32 %v338_v48, %v336_v8  ;;  %v486_v35 = vadd.f32 %v485_v12, %v482_v20  ;;  %v442_v50 = vstv %s2330_s3  ;;  %v307_v38 = vadd.f32 %v2146_v49, %v265_v19  ;;  %v388_v8 = vpop.permute.xlu1 %387  ;;  %s2444_s27 = sld [smem:[#allocation3 + $0x3e]] }
  0x96   :  { %v493_v42 = vmul.f32 %v1903_v40, %v492_v53  ;;  %v502_v43 = vmul.f32 %v1924_v52, %v492_v53  ;;  %v499_v45 = vadd.f32 %v498_v23, %v497_v37  ;;  %v446_v46 = vstv %s2338_s30  ;;  %s2448_s3 = sld [smem:[#allocation3 + $0x3f]] }
  0x97   :  { %v340_v41 = vmax.f32 %v339_v36, 0.0  ;;  %v490_v44 = vadd.f32 %v489_v21, %v486_v35  ;;  %v436_v47 = vmul.f32 %v435_v28, %v1872_v29  ;;  %v914_v48 = vadd.f32 %v913_v13, %v910_v24  ;;  %v2406_v36 = vld [vmem:[%s2970_s0] ss:$2 sm:$0x3f]  ;;  %s2599_s30 = sld [smem:[#allocation3 + $0x94]] }
  0x98   :  { %v923_v51 = vadd.f32 %v922_v14, %v921_v25  ;;  %v439_v55 = vmul.f32 %v1877_v30, %v438_v34  ;;  %v443_v49 = vmul.f32 %v1882_v31, %v442_v50  ;;  %v382_v56 = vmax.f32 %v2344_v11, 0.0  ;;  %v2412_v14 = vld [vmem:[%s2970_s0 + $0x1] ss:$2 sm:$0x3f] }
  0x99   :  { %v926_v57 = vstv %s2340_s6  ;;  %v501_v58 = vadd.f32 %v500_v26, %v499_v45  ;;  %v450_v59 = vstv %s2349_s18  ;;  %v348_v61 = vmul.f32 %v346_v18, %v340_v41  ;;  %v2424_v21 = vld [vmem:[%s2970_s0 + $0x2] ss:$2 sm:$0x3f]  ;;  %s2458_s18 = sld [smem:[#allocation6 + $0xd]] }
  0x9a   :  { %v440_v3 = vadd.f32 %v439_v55, %v436_v47  ;;  %v447_v29 = vmul.f32 %v1887_v32, %v446_v46  ;;  %v453_v4 = vmul.f32 %v1877_v30, %v435_v28  ;;  %v494_v33 = vadd.f32 %v493_v42, %v490_v44  ;;  %v2455_v55 = vld [vmem:[%s2970_s0 + $0x4] ss:$2 sm:$0x3f]  ;;  %s2603_s6 = sld [smem:[#allocation3 + $0x95]] }
  0x9b   :  { %v503_v7 = vadd.f32 %v502_v43, %v501_v58  ;;  %v454_v16 = vmul.f32 %v1882_v31, %v438_v34  ;;  %v456_v19 = vmul.f32 %v1887_v32, %v442_v50  ;;  %v924_v62 = vmax.f32 %v914_v48, %v923_v51  ;;  %v2437_v34 = vld [vmem:[%s2970_s0 + $0x3] ss:$2 sm:$0x3f] }
  0x9c   :  { %v444_v63 = vadd.f32 %v443_v49, %v440_v3  ;;  %v451_v0 = vmul.f32 %v1903_v40, %v450_v59  ;;  %v1023_v5 = vstv %s2357_s20  ;;  %v458_v6 = vmul.f32 %v1903_v40, %v446_v46  ;;  %s2468_s20 = sld [smem:[#allocation3 + $0x40]] }
  0x9d   :  { %v455_v30 = vadd.f32 %v454_v16, %v453_v4  ;;  %v1026_v9 = vstv %s2361_s23  ;;  %v1030_v31 = vstv %s2365_s1  ;;  %v390_v10 = vmul.f32 %v388_v8, %v382_v56  ;;  %s2615_s23 = sld [smem:[#allocation3 + $0x61]] }
  0x9e   :  { %v349_v32 = vadd.f32 %v348_v61, %v307_v38  ;;  %v448_v11 = vadd.f32 %v447_v29, %v444_v63  ;;  %v460_v13 = vmul.f32 %v1924_v52, %v450_v59  ;;  %v504_v27 = vmax.f32 %v494_v33, %v503_v7  ;;  %s2620_s1 = sld [smem:[#allocation3 + $0x62]] }
  0x9f   :  { %v457_v12 = vadd.f32 %v456_v19, %v455_v30  ;;  %v1024_v40 = vmul.f32 %v2406_v36, %v1023_v5  ;;  %v1027_v53 = vmul.f32 %v2412_v14, %v1026_v9  ;;  %v2417_v52 = vadd.f32 %v926_v57, %v924_v62 }
  0xa0   :  { %v506_v15 = vstv %s2370_s7  ;;  %v1034_v20 = vstv %s2376_s8  ;;  %v1031_v22 = vmul.f32 %v2424_v21, %v1030_v31  ;;  %v452_v23 = vadd.f32 %v451_v0, %v448_v11  ;;  %s2479_s7 = sld [smem:[#allocation3 + $0x82]] }
  0xa1   :  { %v459_v24 = vadd.f32 %v458_v6, %v457_v12  ;;  %v1028_v25 = vadd.f32 %v1027_v53, %v1024_v40  ;;  %v1041_v26 = vmul.f32 %v2412_v14, %v1023_v5  ;;  %v391_v28 = vadd.f32 %v390_v10, %v349_v32  ;;  %s2483_s8 = sld [smem:[#allocation3 + $0x83]] }
  0xa2   :  { %v1038_v35 = vstv %s2381_s9  ;;  %v1042_v37 = vmul.f32 %v2424_v21, %v1026_v9  ;;  %v1044_v50 = vmul.f32 %v2437_v34, %v1030_v31  ;;  %v507_v38 = vadd.f32 %v506_v15, %v504_v27  ;;  %v514_v31 = vpop.permute.xlu1 %513  ;;  %s2489_s9 = sld [smem:[#allocation3 + $0x84]]  ;;  %v2491_v27 = vpop.permute.xlu2 %681 }
  0xa3   :  { %v461_v41 = vadd.f32 %v460_v13, %v459_v24  ;;  %v1035_v42 = vmul.f32 %v2437_v34, %v1034_v20  ;;  %v603_v43 = vstv %s2385_s28  ;;  %v1032_v18 = vadd.f32 %v1031_v22, %v1028_v25  ;;  %s2495_s28 = sld [smem:[#allocation3 + $0x85]] }
  0xa4   :  { %v1043_v44 = vadd.f32 %v1042_v37, %v1041_v26  ;;  %v606_v45 = vstv %s2389_s10  ;;  %v610_v46 = vstv %s2393_s11  ;;  %v928_v47 = vmax.f32 %v2417_v52, 0.0  ;;  %s2497_s10 = sld [smem:[#allocation6 + $0xc]]  ;;  %v472_v26 = vpop.permute.xlu0 %471 }
  0xa5   :  { %v464_v48 = vstv %s2395_s12  ;;  %v462_v51 = vmax.f32 %v452_v23, %v461_v41  ;;  %v1046_v49 = vmul.f32 %v2455_v55, %v1034_v20  ;;  %v604_v57 = vmul.f32 %v2406_v36, %v603_v43  ;;  %s2505_s11 = sld [smem:[#allocation3 + $0x86]] }
  0xa6   :  { %v1045_v56 = vadd.f32 %v1044_v50, %v1043_v44  ;;  %v607_v58 = vmul.f32 %v2412_v14, %v606_v45  ;;  %v611_v59 = vmul.f32 %v2424_v21, %v610_v46  ;;  %v508_v61 = vmax.f32 %v507_v38, 0.0  ;;  %s2510_s12 = sld [smem:[#allocation3 + $0x50]] }
  0xa7   :  { %v2464_v3 = vadd.f32 %v2204_v54, %v391_v28  ;;  %v1039_v29 = vmul.f32 %v2455_v55, %v1038_v35  ;;  %v614_v4 = vstv %s2415_s16  ;;  %v1036_v8 = vadd.f32 %v1035_v42, %v1032_v18  ;;  %v2475_v54 = vld [vmem:[%s2970_s0 + $0x5] ss:$2 sm:$0x3f]  ;;  %s2547_s16 = sld [smem:[#allocation3 + $0x4c]] }
  0xa8   :  { %v608_v33 = vadd.f32 %v607_v58, %v604_v57  ;;  %v621_v7 = vmul.f32 %v2412_v14, %v603_v43  ;;  %v622_v16 = vmul.f32 %v2424_v21, %v606_v45  ;;  %v465_v19 = vadd.f32 %v464_v48, %v462_v51 }
  0xa9   :  { %v1047_v62 = vadd.f32 %v1046_v49, %v1045_v56  ;;  %v1048_v63 = vmul.f32 %v2475_v54, %v1038_v35  ;;  %v624_v0 = vmul.f32 %v2437_v34, %v610_v46  ;;  %v615_v30 = vmul.f32 %v2437_v34, %v614_v4 }
  0xaa   :  { %v612_v5 = vadd.f32 %v611_v59, %v608_v33  ;;  %v623_v6 = vadd.f32 %v622_v16, %v621_v7  ;;  %v561_v9 = vstv %s2430_s22  ;;  %v1052_v10 = vstv %s2401_s19  ;;  %s2515_s19 = sld [smem:[#allocation3 + $0x51]] }
  0xab   :  { %v618_v32 = vstv %s2427_s21  ;;  %v564_v11 = vstv %s2440_s26  ;;  %v568_v13 = vstv %s2444_s27  ;;  %v1040_v12 = vadd.f32 %v1039_v29, %v1036_v8  ;;  %s2560_s21 = sld [smem:[#allocation6 + $0x1a]] }
  0xac   :  { %v625_v40 = vadd.f32 %v624_v0, %v623_v6  ;;  %v626_v53 = vmul.f32 %v2455_v55, %v614_v4  ;;  %v572_v15 = vstv %s2448_s3  ;;  %v466_v20 = vmax.f32 %v465_v19, 0.0  ;;  %s2568_s22 = sld [smem:[#allocation3 + $0x4f]] }
  0xad   :  { %v1049_v22 = vadd.f32 %v1048_v63, %v1047_v62  ;;  %v562_v23 = vmul.f32 %v2406_v36, %v561_v9  ;;  %v565_v24 = vmul.f32 %v2412_v14, %v564_v11  ;;  %v2501_v25 = vmul.f32 %v514_v31, %v508_v61  ;;  %s2587_s26 = sld [smem:[#allocation3 + $0x92]] }
  0xae   :  { %v616_v28 = vadd.f32 %v615_v30, %v612_v5  ;;  %v619_v35 = vmul.f32 %v2455_v55, %v618_v32  ;;  %v569_v37 = vmul.f32 %v2424_v21, %v568_v13  ;;  %v632_v50 = vstv %s2458_s18  ;;  %v2535_v30 = vpop.permute.xlu2 %807  ;;  %s2590_s27 = sld [smem:[#allocation6 + $0xf]] }
  0xaf   :  { %v576_v38 = vstv %s2468_s20  ;;  %v566_v41 = vadd.f32 %v565_v24, %v562_v23  ;;  %v573_v42 = vmul.f32 %v2437_v34, %v572_v15  ;;  %v627_v43 = vadd.f32 %v626_v53, %v625_v40  ;;  %s2595_s3 = sld [smem:[#allocation3 + $0x93]] }
  0xb0   :  { %v628_v18 = vmul.f32 %v2475_v54, %v618_v32  ;;  %v579_v44 = vmul.f32 %v2412_v14, %v561_v9  ;;  %v580_v45 = vmul.f32 %v2424_v21, %v564_v11  ;;  %v474_v46 = vmul.f32 %v472_v26, %v466_v20  ;;  %s2607_s18 = sld [smem:[#allocation3 + $0x5f]] }
  0xb1   :  { %v1050_v48 = vmax.f32 %v1040_v12, %v1049_v22  ;;  %v570_v51 = vadd.f32 %v569_v37, %v566_v41  ;;  %v582_v49 = vmul.f32 %v2437_v34, %v568_v13  ;;  %v620_v56 = vadd.f32 %v619_v35, %v616_v28  ;;  %s2611_s20 = sld [smem:[#allocation3 + $0x60]] }
  0xb2   :  { %v577_v57 = vmul.f32 %v2455_v55, %v576_v38  ;;  %v581_v58 = vadd.f32 %v580_v45, %v579_v44  ;;  %v584_v59 = vmul.f32 %v2455_v55, %v572_v15  ;;  %v1149_v29 = vstv %s2479_s7  ;;  %s2625_s7 = sld [smem:[#allocation3 + $0x63]] }
  0xb3   :  { %v574_v61 = vadd.f32 %v573_v42, %v570_v51  ;;  %v1152_v4 = vstv %s2483_s8  ;;  %v1156_v8 = vstv %s2489_s9  ;;  %v629_v33 = vadd.f32 %v628_v18, %v627_v43  ;;  %s2647_s8 = sld [smem:[#allocation3 + $0x5a]] }
  0xb4   :  { %v583_v7 = vadd.f32 %v582_v49, %v581_v58  ;;  %v586_v16 = vmul.f32 %v2475_v54, %v576_v38  ;;  %v1160_v19 = vstv %s2495_s28  ;;  %v475_v62 = vadd.f32 %v474_v46, %v2464_v3  ;;  %s2653_s9 = sld [smem:[#allocation3 + $0x5b]] }
  0xb5   :  { %v590_v63 = vstv %s2497_s10  ;;  %v1150_v0 = vmul.f32 %v2406_v36, %v1149_v29  ;;  %v1153_v5 = vmul.f32 %v2412_v14, %v1152_v4  ;;  %v2537_v6 = vadd.f32 %v1052_v10, %v1050_v48  ;;  %s2658_s28 = sld [smem:[#allocation3 + $0x5c]] }
  0xb6   :  { %v578_v9 = vadd.f32 %v577_v57, %v574_v61  ;;  %v585_v31 = vadd.f32 %v584_v59, %v583_v7  ;;  %v1157_v32 = vmul.f32 %v2424_v21, %v1156_v8  ;;  %v1161_v13 = vmul.f32 %v2437_v34, %v1160_v19  ;;  %v2578_v7 = vpop.permute.xlu2 %933  ;;  %s2662_s10 = sld [smem:[#allocation3 + $0x5d]] }
  0xb7   :  { %v1154_v11 = vadd.f32 %v1153_v5, %v1150_v0  ;;  %v1167_v3 = vmul.f32 %v2412_v14, %v1149_v29  ;;  %v1168_v12 = vmul.f32 %v2424_v21, %v1152_v4  ;;  %v630_v40 = vmax.f32 %v620_v56, %v629_v33  ;;  %v598_v4 = vpop.permute.xlu0 %597 }
  0xb8   :  { %v587_v10 = vadd.f32 %v586_v16, %v585_v31  ;;  %v1164_v53 = vstv %s2505_s11  ;;  %v1170_v15 = vmul.f32 %v2437_v34, %v1156_v8  ;;  %v1172_v23 = vmul.f32 %v2455_v55, %v1160_v19  ;;  %s2672_s11 = sld [smem:[#allocation3 + $0x5e]] }
  0xb9   :  { %v1158_v20 = vadd.f32 %v1157_v32, %v1154_v11  ;;  %v1169_v22 = vadd.f32 %v1168_v12, %v1167_v3  ;;  %v729_v24 = vstv %s2510_s12  ;;  %v732_v28 = vstv %s2515_s19  ;;  %s2677_s12 = sld [smem:[#allocation6 + $0x13]] }
  0xba   :  { %v588_v26 = vmax.f32 %v578_v9, %v587_v10  ;;  %v736_v35 = vstv %s2518_s29  ;;  %v740_v37 = vstv %s2522_s14  ;;  %v1165_v41 = vmul.f32 %v2455_v55, %v1164_v53  ;;  %s2683_s19 = sld [smem:[#allocation6 + $0x12]] }
  0xbb   :  { %v1162_v38 = vadd.f32 %v1161_v13, %v1158_v20  ;;  %v1171_v42 = vadd.f32 %v1170_v15, %v1169_v22  ;;  %v744_v43 = vstv %s2527_s15  ;;  %v730_v44 = vmul.f32 %v2406_v36, %v729_v24  ;;  %s2687_s29 = sld [smem:[#allocation3 + $0x6e]] }
  0xbc   :  { %v591_v18 = vadd.f32 %v590_v63, %v588_v26  ;;  %v733_v45 = vmul.f32 %v2412_v14, %v732_v28  ;;  %v737_v46 = vmul.f32 %v2424_v21, %v736_v35  ;;  %v517_v48 = vadd.f32 %v2501_v25, %v475_v62  ;;  %s2691_s14 = sld [smem:[#allocation3 + $0x6f]] }
  0xbd   :  { %v1173_v51 = vadd.f32 %v1172_v23, %v1171_v42  ;;  %v1174_v49 = vmul.f32 %v2475_v54, %v1164_v53  ;;  %v741_v56 = vmul.f32 %v2437_v34, %v740_v37  ;;  %v747_v59 = vmul.f32 %v2412_v14, %v729_v24  ;;  %v640_v53 = vpop.permute.xlu1 %639  ;;  %s2698_s15 = sld [smem:[#allocation3 + $0x70]] }
  0xbe   :  { %v592_v57 = vmax.f32 %v591_v18, 0.0  ;;  %v734_v58 = vadd.f32 %v733_v45, %v730_v44  ;;  %v748_v61 = vmul.f32 %v2424_v21, %v732_v28  ;;  %v633_v29 = vadd.f32 %v632_v50, %v630_v40 }
  0xbf   :  { %v1166_v25 = vadd.f32 %v1165_v41, %v1162_v38  ;;  %v745_v8 = vmul.f32 %v2455_v55, %v744_v43  ;;  %v750_v33 = vmul.f32 %v2437_v34, %v736_v35  ;;  %v752_v62 = vmul.f32 %v2455_v55, %v740_v37 }
  0xc0   :  { %v738_v16 = vadd.f32 %v737_v46, %v734_v58  ;;  %v749_v19 = vadd.f32 %v748_v61, %v747_v59  ;;  %v687_v63 = vstv %s2543_s2  ;;  %v1175_v0 = vadd.f32 %v1174_v49, %v1173_v51  ;;  %v1060_v59 = vpop.permute.xlu2 %1059  ;;  %s2702_s2 = sld [smem:[#allocation3 + $0x71]] }
  0xc1   :  { %v754_v50 = vmul.f32 %v2475_v54, %v744_v43  ;;  %v690_v5 = vstv %s2547_s16  ;;  %v694_v9 = vstv %s2551_s17  ;;  %v600_v31 = vmul.f32 %v598_v4, %v592_v57  ;;  %s2707_s16 = sld [smem:[#allocation3 + $0x72]] }
  0xc2   :  { %v742_v32 = vadd.f32 %v741_v56, %v738_v16  ;;  %v751_v11 = vadd.f32 %v750_v33, %v749_v19  ;;  %v698_v13 = vstv %s2556_s13  ;;  %v634_v3 = vmax.f32 %v633_v29, 0.0  ;;  %s2710_s17 = sld [smem:[#allocation3 + $0x69]] }
  0xc3   :  { %v559_v12 = vadd.f32 %v2224_v1, %v517_v48  ;;  %v688_v40 = vmul.f32 %v2406_v36, %v687_v63  ;;  %v691_v10 = vmul.f32 %v2412_v14, %v690_v5  ;;  %v1178_v15 = vstv %s2560_s21  ;;  %s2714_s13 = sld [smem:[#allocation3 + $0x6a]] }
  0xc4   :  { %v746_v20 = vadd.f32 %v745_v8, %v742_v32  ;;  %v753_v22 = vadd.f32 %v752_v62, %v751_v11  ;;  %v695_v23 = vmul.f32 %v2424_v21, %v694_v9  ;;  %v1176_v24 = vmax.f32 %v1166_v25, %v1175_v0  ;;  %s2719_s21 = sld [smem:[#allocation3 + $0x6b]] }
  0xc5   :  { %v702_v26 = vstv %s2568_s22  ;;  %v692_v28 = vadd.f32 %v691_v10, %v688_v40  ;;  %v699_v1 = vmul.f32 %v2437_v34, %v698_v13  ;;  %v601_v35 = vadd.f32 %v600_v31, %v559_v12  ;;  %v766_v31 = vpop.permute.xlu1 %765  ;;  %s2725_s22 = sld [smem:[#allocation3 + $0x6c]] }
  0xc6   :  { %v755_v37 = vadd.f32 %v754_v50, %v753_v22  ;;  %v705_v38 = vmul.f32 %v2412_v14, %v687_v63  ;;  %v706_v41 = vmul.f32 %v2424_v21, %v690_v5  ;;  %v642_v42 = vmul.f32 %v640_v53, %v634_v3 }
  0xc7   :  { %v758_v43 = vstv %s2574_s24  ;;  %v696_v18 = vadd.f32 %v695_v23, %v692_v28  ;;  %v708_v44 = vmul.f32 %v2437_v34, %v694_v9  ;;  %v703_v46 = vmul.f32 %v2455_v55, %v702_v26  ;;  %s2729_s24 = sld [smem:[#allocation3 + $0x6d]] }
  0xc8   :  { %v756_v45 = vmax.f32 %v746_v20, %v755_v37  ;;  %v707_v48 = vadd.f32 %v706_v41, %v705_v38  ;;  %v710_v51 = vmul.f32 %v2455_v55, %v698_v13  ;;  %v1054_v49 = vmax.f32 %v2537_v6, 0.0 }
  0xc9   :  { %v700_v56 = vadd.f32 %v699_v1, %v696_v18  ;;  %v1275_v57 = vstv %s2582_s25  ;;  %v1278_v58 = vstv %s2587_s26  ;;  %v643_v61 = vadd.f32 %v642_v42, %v601_v35  ;;  %s2745_s25 = sld [smem:[#allocation3 + $0x7d]] }
  0xca   :  { %v2622_v29 = vadd.f32 %v1178_v15, %v1176_v24  ;;  %v709_v4 = vadd.f32 %v708_v44, %v707_v48  ;;  %v712_v25 = vmul.f32 %v2475_v54, %v702_v26  ;;  %v684_v6 = vmul.f32 %v2491_v27, %v676_v17  ;;  %s2750_s26 = sld [smem:[#allocation3 + $0x7e]] }
  0xcb   :  { %v2633_v8 = vmul.f32 %v2535_v30, %v802_v60  ;;  %v759_v33 = vadd.f32 %v758_v43, %v756_v45  ;;  %v1282_v16 = vstv %s2595_s3  ;;  %v704_v19 = vadd.f32 %v703_v46, %v700_v56  ;;  %s2762_s3 = sld [smem:[#allocation3 + $0x80]] }
  0xcc   :  { %v711_v62 = vadd.f32 %v710_v51, %v709_v4  ;;  %v1276_v63 = vmul.f32 %v2406_v36, %v1275_v57  ;;  %v1279_v0 = vmul.f32 %v2412_v14, %v1278_v58  ;;  %v2641_v2 = vmul.f32 %v2578_v7, %v928_v47 }
  0xcd   :  { %v2643_v17 = vmul.f32 %v1060_v59, %v1054_v49  ;;  %v716_v39 = vstv %s2590_s27  ;;  %v1286_v60 = vstv %s2599_s30  ;;  %v1180_v27 = vmax.f32 %v2622_v29, 0.0  ;;  %v724_v59 = vpop.permute.xlu0 %723  ;;  %s2755_s27 = sld [smem:[#allocation3 + $0x7f]] }
  0xce   :  { %v2650_v30 = vadd.f32 %v684_v6, %v643_v61  ;;  %v713_v50 = vadd.f32 %v712_v25, %v711_v62  ;;  %v1290_v5 = vstv %s2603_s6  ;;  %v760_v52 = vmax.f32 %v759_v33, 0.0  ;;  %s2764_s30 = sld [smem:[#allocation6 + $0x16]] }
  0xcf   :  { %v1283_v47 = vmul.f32 %v2424_v21, %v1282_v16  ;;  %v855_v7 = vstv %s2607_s18  ;;  %v858_v9 = vstv %s2611_s20  ;;  %v1280_v11 = vadd.f32 %v1279_v0, %v1276_v63  ;;  %s2770_s6 = sld [smem:[#allocation6 + $0x15]] }
  0xd0   :  { %v714_v32 = vmax.f32 %v704_v19, %v713_v50  ;;  %v1287_v13 = vmul.f32 %v2437_v34, %v1286_v60  ;;  %v862_v3 = vstv %s2615_s23  ;;  %v1293_v12 = vmul.f32 %v2412_v14, %v1275_v57  ;;  %s2775_s18 = sld [smem:[#allocation3 + $0x81]] }
  0xd1   :  { %v1294_v40 = vmul.f32 %v2424_v21, %v1278_v58  ;;  %v866_v10 = vstv %s2620_s1  ;;  %v856_v53 = vmul.f32 %v2406_v36, %v855_v7  ;;  %v1291_v15 = vmul.f32 %v2455_v55, %v1290_v5  ;;  %s2780_s20 = sld [smem:[#allocation3 + $0x78]] }
  0xd2   :  { %v870_v20 = vstv %s2625_s7  ;;  %v859_v22 = vmul.f32 %v2412_v14, %v858_v9  ;;  %v863_v23 = vmul.f32 %v2424_v21, %v862_v3  ;;  %v2674_v24 = vmul.f32 %v766_v31, %v760_v52  ;;  %s2783_s23 = sld [smem:[#allocation3 + $0x79]] }
  0xd3   :  { %v717_v26 = vadd.f32 %v716_v39, %v714_v32  ;;  %v1296_v28 = vmul.f32 %v2437_v34, %v1282_v16  ;;  %v873_v1 = vmul.f32 %v2412_v14, %v855_v7  ;;  %v867_v37 = vmul.f32 %v2437_v34, %v866_v10  ;;  %s2788_s1 = sld [smem:[#allocation3 + $0x7a]] }
  0xd4   :  { %v860_v35 = vadd.f32 %v859_v22, %v856_v53  ;;  %v874_v38 = vmul.f32 %v2424_v21, %v858_v9  ;;  %v876_v41 = vmul.f32 %v2437_v34, %v862_v3  ;;  %v1284_v42 = vadd.f32 %v1283_v47, %v1280_v11  ;;  %s2796_s7 = sld [smem:[#allocation3 + $0x7b]] }
  0xd5   :  { %v1295_v43 = vadd.f32 %v1294_v40, %v1293_v12  ;;  %v871_v18 = vmul.f32 %v2455_v55, %v870_v20  ;;  %v878_v44 = vmul.f32 %v2455_v55, %v866_v10  ;;  %v813_v48 = vstv %s2647_s8  ;;  %s2803_s8 = sld [smem:[#allocation3 + $0x7c]] }
  0xd6   :  { %v864_v45 = vadd.f32 %v863_v23, %v860_v35  ;;  %v875_v46 = vadd.f32 %v874_v38, %v873_v1  ;;  %v816_v51 = vstv %s2653_s9  ;;  %v718_v49 = vmax.f32 %v717_v26, 0.0  ;;  %s2805_s9 = sld [smem:[#allocation6 + $0x1d]] }
  0xd7   :  { %v1298_v56 = vmul.f32 %v2455_v55, %v1286_v60  ;;  %v2695_v57 = vmul.f32 %v2475_v54, %v1290_v5  ;;  %v820_v58 = vstv %s2658_s28  ;;  %v880_v25 = vmul.f32 %v2475_v54, %v870_v20  ;;  %s2811_s28 = sld [smem:[#allocation3 + $0x8c]] }
  0xd8   :  { %v868_v61 = vadd.f32 %v867_v37, %v864_v45  ;;  %v877_v4 = vadd.f32 %v876_v41, %v875_v46  ;;  %v824_v6 = vstv %s2662_s10  ;;  %v1288_v33 = vadd.f32 %v1287_v13, %v1284_v42  ;;  %s2815_s10 = sld [smem:[#allocation3 + $0x8d]] }
  0xd9   :  { %v814_v16 = vmul.f32 %v2406_v36, %v813_v48  ;;  %v817_v19 = vmul.f32 %v2412_v14, %v816_v51  ;;  %v821_v62 = vmul.f32 %v2424_v21, %v820_v58  ;;  %v1297_v63 = vadd.f32 %v1296_v28, %v1295_v43 }
  0xda   :  { %v872_v0 = vadd.f32 %v871_v18, %v868_v61  ;;  %v879_v39 = vadd.f32 %v878_v44, %v877_v4  ;;  %v828_v60 = vstv %s2672_s11  ;;  %v726_v50 = vmul.f32 %v724_v59, %v718_v49  ;;  %s2818_s11 = sld [smem:[#allocation3 + $0x8e]] }
  0xdb   :  { %v818_v5 = vadd.f32 %v817_v19, %v814_v16  ;;  %v825_v52 = vmul.f32 %v2437_v34, %v824_v6  ;;  %v831_v47 = vmul.f32 %v2412_v14, %v813_v48  ;;  %v884_v7 = vstv %s2677_s12  ;;  %s2820_s12 = sld [smem:[#allocation6 + $0x19]] }
  0xdc   :  { %v881_v9 = vadd.f32 %v880_v25, %v879_v39  ;;  %v832_v31 = vmul.f32 %v2424_v21, %v816_v51  ;;  %v834_v32 = vmul.f32 %v2437_v34, %v820_v58  ;;  %v2721_v11 = vadd.f32 %v1291_v15, %v1288_v33 }
  0xdd   :  { %v822_v13 = vadd.f32 %v821_v62, %v818_v5  ;;  %v829_v3 = vmul.f32 %v2455_v55, %v828_v60  ;;  %v836_v12 = vmul.f32 %v2455_v55, %v824_v6  ;;  %v981_v53 = vstv %s2687_s29  ;;  %s2832_s29 = sld [smem:[#allocation3 + $0x8f]] }
  0xde   :  { %v882_v40 = vmax.f32 %v872_v0, %v881_v9  ;;  %v833_v10 = vadd.f32 %v832_v31, %v831_v47  ;;  %v984_v20 = vstv %s2691_s14  ;;  %v727_v22 = vadd.f32 %v726_v50, %v2650_v30  ;;  %s2836_s14 = sld [smem:[#allocation3 + $0x90]] }
  0xdf   :  { %v2732_v15 = vadd.f32 %v1298_v56, %v1297_v63  ;;  %v826_v23 = vadd.f32 %v825_v52, %v822_v13  ;;  %v988_v26 = vstv %s2698_s15  ;;  %v838_v1 = vmul.f32 %v2475_v54, %v828_v60  ;;  %s2840_s15 = sld [smem:[#allocation6 + $0x1c]] }
  0xe0   :  { %v835_v28 = vadd.f32 %v834_v32, %v833_v10  ;;  %v992_v35 = vstv %s2702_s2  ;;  %v982_v37 = vmul.f32 %v2406_v36, %v981_v53  ;;  %v842_v38 = vstv %s2683_s19  ;;  %v850_v10 = vpop.permute.xlu0 %849  ;;  %s2827_s19 = sld [smem:[#allocation6 + $0x18]] }
  0xe1   :  { %v996_v41 = vstv %s2707_s16  ;;  %v985_v42 = vmul.f32 %v2412_v14, %v984_v20  ;;  %v989_v43 = vmul.f32 %v2424_v21, %v988_v26  ;;  %v2742_v18 = vadd.f32 %v884_v7, %v882_v40  ;;  %s2844_s2 = sld [smem:[#allocation3 + $0x87]] }
  0xe2   :  { %v830_v30 = vadd.f32 %v829_v3, %v826_v23  ;;  %v837_v44 = vadd.f32 %v836_v12, %v835_v28  ;;  %v999_v45 = vmul.f32 %v2412_v14, %v981_v53  ;;  %v993_v48 = vmul.f32 %v2437_v34, %v992_v35  ;;  %s2848_s16 = sld [smem:[#allocation3 + $0x88]] }
  0xe3   :  { %v986_v46 = vadd.f32 %v985_v42, %v982_v37  ;;  %v1000_v51 = vmul.f32 %v2424_v21, %v984_v20  ;;  %v1002_v49 = vmul.f32 %v2437_v34, %v988_v26  ;;  %v997_v58 = vmul.f32 %v2455_v55, %v996_v41 }
  0xe4   :  { %v839_v56 = vadd.f32 %v838_v1, %v837_v44  ;;  %v1004_v59 = vmul.f32 %v2455_v55, %v992_v35  ;;  %v939_v61 = vstv %s2710_s17  ;;  %v942_v6 = vstv %s2714_s13  ;;  %s2853_s17 = sld [smem:[#allocation3 + $0x89]] }
  0xe5   :  { %v990_v4 = vadd.f32 %v989_v43, %v986_v46  ;;  %v1001_v25 = vadd.f32 %v1000_v51, %v999_v45  ;;  %v946_v33 = vstv %s2719_s21  ;;  %v1006_v19 = vmul.f32 %v2475_v54, %v996_v41  ;;  %s2859_s13 = sld [smem:[#allocation3 + $0x8a]] }
  0xe6   :  { %v840_v16 = vmax.f32 %v830_v30, %v839_v56  ;;  %v950_v62 = vstv %s2725_s22  ;;  %v954_v63 = vstv %s2729_s24  ;;  %v940_v60 = vmul.f32 %v2406_v36, %v939_v61  ;;  %s2863_s21 = sld [smem:[#allocation3 + $0x8b]] }
  0xe7   :  { %v994_v0 = vadd.f32 %v993_v48, %v990_v4  ;;  %v1003_v39 = vadd.f32 %v1002_v49, %v1001_v25  ;;  %v943_v50 = vmul.f32 %v2412_v14, %v942_v6  ;;  %v769_v5 = vadd.f32 %v2674_v24, %v727_v22  ;;  %s2872_s22 = sld [smem:[#allocation3 + $0x9b]] }
  0xe8   :  { %v886_v52 = vmax.f32 %v2742_v18, 0.0  ;;  %v843_v47 = vadd.f32 %v842_v38, %v840_v16  ;;  %v947_v7 = vmul.f32 %v2424_v21, %v946_v33  ;;  %v951_v32 = vmul.f32 %v2437_v34, %v950_v62  ;;  %v892_v38 = vpop.permute.xlu1 %891  ;;  %s2876_s24 = sld [smem:[#allocation3 + $0x9c]] }
  0xe9   :  { %v1005_v9 = vadd.f32 %v1004_v59, %v1003_v39  ;;  %v944_v31 = vadd.f32 %v943_v50, %v940_v60  ;;  %v957_v13 = vmul.f32 %v2412_v14, %v939_v61  ;;  %v955_v24 = vmul.f32 %v2455_v55, %v954_v63 }
  0xea   :  { %v844_v3 = vmax.f32 %v843_v47, 0.0  ;;  %v958_v12 = vmul.f32 %v2424_v21, %v942_v6  ;;  %v960_v40 = vmul.f32 %v2437_v34, %v946_v33  ;;  %v998_v53 = vadd.f32 %v997_v58, %v994_v0 }
  0xeb   :  { %v1007_v20 = vadd.f32 %v1006_v19, %v1005_v9  ;;  %v948_v22 = vadd.f32 %v947_v7, %v944_v31  ;;  %v1107_v23 = vstv %s2745_s25  ;;  %v962_v28 = vmul.f32 %v2455_v55, %v950_v62  ;;  %s2880_s25 = sld [smem:[#allocation3 + $0x9d]] }
  0xec   :  { %v959_v26 = vadd.f32 %v958_v12, %v957_v13  ;;  %v1110_v1 = vstv %s2750_s26  ;;  %v1114_v35 = vstv %s2755_s27  ;;  %v2792_v37 = vadd.f32 %v2695_v57, %v2732_v15  ;;  %s2887_s26 = sld [smem:[#allocation3 + $0x9e]] }
  0xed   :  { %v811_v41 = vadd.f32 %v2633_v8, %v769_v5  ;;  %v952_v42 = vadd.f32 %v951_v32, %v948_v22  ;;  %v964_v43 = vmul.f32 %v2475_v54, %v954_v63  ;;  %v852_v18 = vmul.f32 %v850_v10, %v844_v3  ;;  %s2894_s27 = sld [smem:[#allocation3 + $0x9f]] }
  0xee   :  { %v961_v30 = vadd.f32 %v960_v40, %v959_v26  ;;  %v1118_v44 = vstv %s2762_s3  ;;  %v1108_v45 = vmul.f32 %v2406_v36, %v1107_v23  ;;  %v1010_v46 = vstv %s2764_s30  ;;  %s2896_s3 = sld [smem:[#allocation6 + $0x1b]] }
  0xef   :  { %v1008_v48 = vmax.f32 %v998_v53, %v1007_v20  ;;  %v1111_v57 = vmul.f32 %v2412_v14, %v1110_v1  ;;  %v1115_v15 = vmul.f32 %v2424_v21, %v1114_v35  ;;  %v894_v8 = vmul.f32 %v892_v38, %v886_v52  ;;  %v976_v38 = vpop.permute.xlu0 %975 }
  0xf0   :  { %v968_v51 = vstv %s2770_s6  ;;  %v956_v49 = vadd.f32 %v955_v24, %v952_v42  ;;  %v963_v56 = vadd.f32 %v962_v28, %v961_v30  ;;  %v1119_v59 = vmul.f32 %v2437_v34, %v1118_v44  ;;  %v1018_v30 = vpop.permute.xlu1 %1017 }
  0xf1   :  { %v1112_v58 = vadd.f32 %v1111_v57, %v1108_v45  ;;  %v1125_v61 = vmul.f32 %v2412_v14, %v1107_v23  ;;  %v1126_v4 = vmul.f32 %v2424_v21, %v1110_v1  ;;  %v853_v25 = vadd.f32 %v852_v18, %v811_v41 }
  0xf2   :  { %v965_v6 = vadd.f32 %v964_v43, %v963_v56  ;;  %v1122_v33 = vstv %s2775_s18  ;;  %v1128_v16 = vmul.f32 %v2437_v34, %v1114_v35  ;;  %v1011_v19 = vadd.f32 %v1010_v46, %v1008_v48  ;;  %s2909_s18 = sld [smem:[#allocation3 + $0x96]] }
  0xf3   :  { %v1116_v62 = vadd.f32 %v1115_v15, %v1112_v58  ;;  %v1127_v63 = vadd.f32 %v1126_v4, %v1125_v61  ;;  %v1130_v0 = vmul.f32 %v2455_v55, %v1118_v44  ;;  %v1065_v60 = vstv %s2780_s20  ;;  %s2913_s20 = sld [smem:[#allocation3 + $0x97]] }
  0xf4   :  { %v966_v39 = vmax.f32 %v956_v49, %v965_v6  ;;  %v1068_v50 = vstv %s2783_s23  ;;  %v1072_v5 = vstv %s2788_s1  ;;  %v1123_v47 = vmul.f32 %v2455_v55, %v1122_v33  ;;  %s2917_s23 = sld [smem:[#allocation3 + $0x98]] }
  0xf5   :  { %v1120_v52 = vadd.f32 %v1119_v59, %v1116_v62  ;;  %v1129_v7 = vadd.f32 %v1128_v16, %v1127_v63  ;;  %v1076_v9 = vstv %s2796_s7  ;;  %v1132_v32 = vmul.f32 %v2475_v54, %v1122_v33  ;;  %s2920_s1 = sld [smem:[#allocation3 + $0x99]] }
  0xf6   :  { %v969_v31 = vadd.f32 %v968_v51, %v966_v39  ;;  %v1066_v13 = vmul.f32 %v2406_v36, %v1065_v60  ;;  %v1069_v3 = vmul.f32 %v2412_v14, %v1068_v50  ;;  %v895_v24 = vadd.f32 %v894_v8, %v853_v25 }
  0xf7   :  { %v1131_v12 = vadd.f32 %v1130_v0, %v1129_v7  ;;  %v1080_v40 = vstv %s2803_s8  ;;  %v1073_v10 = vmul.f32 %v2424_v21, %v1072_v5  ;;  %v1012_v53 = vmax.f32 %v1011_v19, 0.0 }
  0xf8   :  { %v1070_v20 = vadd.f32 %v1069_v3, %v1066_v13  ;;  %v1077_v22 = vmul.f32 %v2437_v34, %v1076_v9  ;;  %v1083_v23 = vmul.f32 %v2412_v14, %v1065_v60  ;;  %v970_v26 = vmax.f32 %v969_v31, 0.0 }
  0xf9   :  { %v1124_v28 = vadd.f32 %v1123_v47, %v1120_v52  ;;  %v1084_v1 = vmul.f32 %v2424_v21, %v1068_v50  ;;  %v1086_v35 = vmul.f32 %v2437_v34, %v1072_v5  ;;  %v1133_v41 = vadd.f32 %v1132_v32, %v1131_v12 }
  0xfa   :  { %v1074_v42 = vadd.f32 %v1073_v10, %v1070_v20  ;;  %v1081_v43 = vmul.f32 %v2455_v55, %v1080_v40  ;;  %v1233_v18 = vstv %s2811_s28  ;;  %v1088_v45 = vmul.f32 %v2455_v55, %v1076_v9  ;;  %s2927_s28 = sld [smem:[#allocation3 + $0x9a]] }
  0xfb   :  { %v1085_v44 = vadd.f32 %v1084_v1, %v1083_v23  ;;  %v1236_v46 = vstv %s2815_s10  ;;  %v1240_v48 = vstv %s2818_s11  ;;  %v1304_v57 = vstv %s2805_s9 }
  0xfc   :  { %v1302_v15 = vmax.f32 %v2721_v11, %v2792_v37  ;;  %v1136_v8 = vstv %s2820_s12  ;;  %v1078_v51 = vadd.f32 %v1077_v22, %v1074_v42  ;;  %v978_v49 = vmul.f32 %v976_v38, %v970_v26 }
  0xfd   :  { %v1087_v56 = vadd.f32 %v1086_v35, %v1085_v44  ;;  %v1090_v58 = vmul.f32 %v2475_v54, %v1080_v40  ;;  %v1234_v59 = vmul.f32 %v2406_v36, %v1233_v18  ;;  %v1020_v61 = vmul.f32 %v1018_v30, %v1012_v53 }
  0xfe   :  { %v937_v4 = vadd.f32 %v2641_v2, %v895_v24  ;;  %v1237_v25 = vmul.f32 %v2412_v14, %v1236_v46  ;;  %v1241_v6 = vmul.f32 %v2424_v21, %v1240_v48  ;;  %v1134_v33 = vmax.f32 %v1124_v28, %v1133_v41 }
  0xff   :  { %v1082_v16 = vadd.f32 %v1081_v43, %v1078_v51  ;;  %v1089_v19 = vadd.f32 %v1088_v45, %v1087_v56  ;;  %v1244_v62 = vstv %s2832_s29  ;;  %v1094_v63 = vstv %s2827_s19 }
 0x100   :  { %v1238_v0 = vadd.f32 %v1237_v25, %v1234_v59  ;;  %v1251_v39 = vmul.f32 %v2412_v14, %v1233_v18  ;;  %v1252_v60 = vmul.f32 %v2424_v21, %v1236_v46  ;;  %v979_v2 = vadd.f32 %v978_v49, %v937_v4  ;;  %v1144_v59 = vpop.permute.xlu1 %1143 }
 0x101   :  { %v1091_v50 = vadd.f32 %v1090_v58, %v1089_v19  ;;  %v1248_v5 = vstv %s2836_s14  ;;  %v1254_v52 = vmul.f32 %v2437_v34, %v1240_v48  ;;  %v1245_v7 = vmul.f32 %v2437_v34, %v1244_v62 }
 0x102   :  { %v1242_v47 = vadd.f32 %v1241_v6, %v1238_v0  ;;  %v1253_v9 = vadd.f32 %v1252_v60, %v1251_v39  ;;  %v1191_v31 = vstv %s2844_s2  ;;  %v1137_v32 = vadd.f32 %v1136_v8, %v1134_v33 }
 0x103   :  { %v1092_v13 = vmax.f32 %v1082_v16, %v1091_v50  ;;  %v1194_v3 = vstv %s2848_s16  ;;  %v1198_v24 = vstv %s2853_s17  ;;  %v1262_v12 = vstv %s2840_s15  ;;  %v1670_v16 = vld [vmem:[%s2970_s0] ss:$2 sm:$0x3f]  ;;  %s2953_s17 = sld [smem:[#allocation6 + $0x1f]] }
 0x104   :  { %v1255_v40 = vadd.f32 %v1254_v52, %v1253_v9  ;;  %v1256_v10 = vmul.f32 %v2455_v55, %v1244_v62  ;;  %v1202_v53 = vstv %s2859_s13  ;;  %v1206_v20 = vstv %s2863_s21  ;;  %s1732_s13 = smov [#allocation8]  }
 0x105   :  { %v1192_v22 = vmul.f32 %v2406_v36, %v1191_v31  ;;  %v1195_v23 = vmul.f32 %v2412_v14, %v1194_v3  ;;  %v1199_v26 = vmul.f32 %v2424_v21, %v1198_v24  ;;  %v1021_v28 = vadd.f32 %v1020_v61, %v979_v2  ;;  %v2902_v36 = vld [vmem:[%s2970_s0 + $0x1] ss:$2 sm:$0x3f]  ;;  %v1102_v61 = vpop.permute.xlu0 %1101  ;;  %s1417_s21 = sshll.u32 %s1732_s13, 4  ;;  %s1418_s21 = int_to_ptr.vmem [resolvable:$true] %s1417_s21 }
 0x106   :  { %v1095_v1 = vadd.f32 %v1094_v63, %v1092_v13  ;;  %v1246_v35 = vadd.f32 %v1245_v7, %v1242_v47  ;;  %v1249_v38 = vmul.f32 %v2455_v55, %v1248_v5  ;;  %v1203_v42 = vmul.f32 %v2437_v34, %v1202_v53  ;;  %v1672_v7 = vld [vmem:[%s2970_s0 + $0x3] ss:$2 sm:$0x3f] }
 0x107   :  { %v1196_v41 = vadd.f32 %v1195_v23, %v1192_v22  ;;  %v1209_v14 = vmul.f32 %v2902_v36, %v1191_v31  ;;  %v1210_v43 = vmul.f32 %v2424_v21, %v1194_v3  ;;  %v1257_v18 = vadd.f32 %v1256_v10, %v1255_v40 }
 0x108   :  { %v1258_v30 = vmul.f32 %v2475_v54, %v1248_v5  ;;  %v1207_v44 = vmul.f32 %v2455_v55, %v1206_v20  ;;  %v1212_v45 = vmul.f32 %v2437_v34, %v1198_v24  ;;  %v1214_v8 = vmul.f32 %v2455_v55, %v1202_v53  ;;  %v1673_v53 = vld [vmem:[%s2970_s0 + $0x4] ss:$2 sm:$0x3f] }
 0x109   :  { %v1200_v46 = vadd.f32 %v1199_v26, %v1196_v41  ;;  %v1211_v48 = vadd.f32 %v1210_v43, %v1209_v14  ;;  %v1359_v51 = vstv %s2872_s22  ;;  %v1138_v49 = vmax.f32 %v1137_v32, 0.0  ;;  %v1674_v14 = vld [vmem:[%s2970_s0 + $0x5] ss:$2 sm:$0x3f] }
 0x10a   :  { %v1096_v56 = vmax.f32 %v1095_v1, 0.0  ;;  %v1362_v21 = vstv %s2876_s24  ;;  %v1366_v58 = vstv %s2880_s25  ;;  %v1250_v4 = vadd.f32 %v1249_v38, %v1246_v35  ;;  %s1419_s25 = sshll.u32 %s2975_s5, 4  ;;  %s1420_s25 = int_to_ptr.hbm [resolvable:$true] %s1419_s25 }
 0x10b   :  { %v1204_v34 = vadd.f32 %v1203_v42, %v1200_v46  ;;  %v1213_v25 = vadd.f32 %v1212_v45, %v1211_v48  ;;  %v1216_v6 = vmul.f32 %v2475_v54, %v1206_v20  ;;  %v1259_v55 = vadd.f32 %v1258_v30, %v1257_v18  ;;  %v1671_v54 = vld [vmem:[%s2970_s0 + $0x2] ss:$2 sm:$0x3f]  ;;  %s1647_s0 = sld [smem:[#allocation6 + $0x1e]] }
 0x10c   :  { %v1370_v33 = vstv %s2887_s26  ;;  %v1360_v19 = vmul.f32 %v1670_v16, %v1359_v51  ;;  %v1363_v62 = vmul.f32 %v2902_v36, %v1362_v21  ;;  %v1063_v63 = vadd.f32 %v2643_v17, %v1021_v28 }
 0x10d   :  { %v1208_v0 = vadd.f32 %v1207_v44, %v1204_v34  ;;  %v1215_v39 = vadd.f32 %v1214_v8, %v1213_v25  ;;  %v1367_v60 = vmul.f32 %v1671_v54, %v1366_v58  ;;  %v1146_v2 = vmul.f32 %v1144_v59, %v1138_v49 }
 0x10e   :  { %v1104_v50 = vmul.f32 %v1102_v61, %v1096_v56  ;;  %v1374_v5 = vstv %s2894_s27  ;;  %v1364_v52 = vadd.f32 %v1363_v62, %v1360_v19  ;;  %v1371_v17 = vmul.f32 %v1672_v7, %v1370_v33  ;;  %v1228_v61 = vpop.permute.xlu0 %1227 }
 0x10f   :  { %v1217_v47 = vadd.f32 %v1216_v6, %v1215_v39  ;;  %v1377_v9 = vmul.f32 %v2902_v36, %v1359_v51  ;;  %v1378_v31 = vmul.f32 %v1671_v54, %v1362_v21  ;;  %v1260_v32 = vmax.f32 %v1250_v4, %v1259_v55  ;;  %v1186_v51 = vpop.permute.xlu2 %1185  ;;  %v1270_v39 = vpop.permute.xlu1 %1269 }
 0x110   :  { %v1220_v13 = vstv %s2896_s3  ;;  %v1368_v3 = vadd.f32 %v1367_v60, %v1364_v52  ;;  %v1380_v24 = vmul.f32 %v1672_v7, %v1366_v58  ;;  %v1382_v20 = vmul.f32 %v1673_v53, %v1370_v33 }
 0x111   :  { %v1218_v40 = vmax.f32 %v1208_v0, %v1217_v47  ;;  %v1379_v10 = vadd.f32 %v1378_v31, %v1377_v9  ;;  %v1317_v22 = vstv %s2909_s18  ;;  %v1105_v23 = vadd.f32 %v1104_v50, %v1063_v63 }
 0x112   :  { %v1375_v26 = vmul.f32 %v1673_v53, %v1374_v5  ;;  %v1320_v28 = vstv %s2913_s20  ;;  %v1324_v1 = vstv %s2917_s23  ;;  %v1372_v38 = vadd.f32 %v1371_v17, %v1368_v3 }
 0x113   :  { %v1221_v35 = vadd.f32 %v1220_v13, %v1218_v40  ;;  %v1381_v41 = vadd.f32 %v1380_v24, %v1379_v10  ;;  %v1328_v42 = vstv %s2920_s1  ;;  %v1384_v43 = vmul.f32 %v1674_v14, %v1374_v5 }
 0x114   :  { %v1332_v18 = vstv %s2927_s28  ;;  %v1318_v30 = vmul.f32 %v1670_v16, %v1317_v22  ;;  %v1321_v44 = vmul.f32 %v2902_v36, %v1320_v28  ;;  %v1263_v45 = vadd.f32 %v1262_v12, %v1260_v32 }
 0x115   :  { %v1222_v46 = vmax.f32 %v1221_v35, 0.0  ;;  %v1383_v48 = vadd.f32 %v1382_v20, %v1381_v41  ;;  %v1325_v8 = vmul.f32 %v1671_v54, %v1324_v1  ;;  %v1329_v56 = vmul.f32 %v1672_v7, %v1328_v42 }
 0x116   :  { %v1322_v49 = vadd.f32 %v1321_v44, %v1318_v30  ;;  %v1335_v21 = vmul.f32 %v2902_v36, %v1317_v22  ;;  %v1336_v58 = vmul.f32 %v1671_v54, %v1320_v28  ;;  %v1147_v59 = vadd.f32 %v1146_v2, %v1105_v23  ;;  %v1354_v11 = vpop.permute.xlu0 %1353 }
 0x117   :  { %v1376_v4 = vadd.f32 %v1375_v26, %v1372_v38  ;;  %v1333_v34 = vmul.f32 %v1673_v53, %v1332_v18  ;;  %v1338_v25 = vmul.f32 %v1672_v7, %v1324_v1  ;;  %v1385_v6 = vadd.f32 %v1384_v43, %v1383_v48  ;;  %v1312_v32 = vpop.permute.xlu2 %1311  ;;  %v1396_v24 = vpop.permute.xlu1 %1395 }
 0x118   :  { %v1326_v12 = vadd.f32 %v1325_v8, %v1322_v49  ;;  %v1337_v55 = vadd.f32 %v1336_v58, %v1335_v21  ;;  %v1340_v33 = vmul.f32 %v1673_v53, %v1328_v42  ;;  %v1188_v16 = vmul.f32 %v1186_v51, %v1180_v27 }
 0x119   :  { %v1230_v19 = vmul.f32 %v1228_v61, %v1222_v46  ;;  %v1342_v36 = vmul.f32 %v1674_v14, %v1332_v18  ;;  %v1305_v0 = vadd.f32 %v1304_v57, %v1302_v15  ;;  %v1264_v54 = vmax.f32 %v1263_v45, 0.0 }
 0x11a   :  { %v1330_v62 = vadd.f32 %v1329_v56, %v1326_v12  ;;  %v1339_v63 = vadd.f32 %v1338_v25, %v1337_v55  ;;  %v1189_v60 = vadd.f32 %v1188_v16, %v1147_v59  ;;  %v1386_v2 = vmax.f32 %v1376_v4, %v1385_v6 }
 0x11b   :  { %v1388_v52 = vstv %s2953_s17  ;;  %v1346_v29 = vstv %s1647_s0  ;;  %v1306_v27 = vmax.f32 %v1305_v0, 0.0  ;;  %v1272_v17 = vmul.f32 %v1270_v39, %v1264_v54 }
 0x11c   :  { %v1334_v50 = vadd.f32 %v1333_v34, %v1330_v62  ;;  %v1341_v5 = vadd.f32 %v1340_v33, %v1339_v63  ;;  %v1231_v47 = vadd.f32 %v1230_v19, %v1189_v60  ;;  %v1389_v9 = vadd.f32 %v1388_v52, %v1386_v2 }
 0x11d   :  { %v1314_v37 = vmul.f32 %v1312_v32, %v1306_v27  ;;  %v1409_v41 = vstv %s2974_s4 }
 0x11e   :  { %v1343_v7 = vadd.f32 %v1342_v36, %v1341_v5  ;;  %v1273_v13 = vadd.f32 %v1272_v17, %v1231_v47  ;;  %v1390_v57 = vmax.f32 %v1389_v9, 0.0 }
 0x120   :  { %v1344_v31 = vmax.f32 %v1334_v50, %v1343_v7  ;;  %v1315_v40 = vadd.f32 %v1314_v37, %v1273_v13  ;;  %v1398_v53 = vmul.f32 %v1396_v24, %v1390_v57 }
 0x122   :  { %v1347_v3 = vadd.f32 %v1346_v29, %v1344_v31 }
 0x124   :  { %v1348_v15 = vmax.f32 %v1347_v3, 0.0 }
 0x126   :  { %v1356_v10 = vmul.f32 %v1354_v11, %v1348_v15 }
 0x128   :  { %v1357_v20 = vadd.f32 %v1356_v10, %v1315_v40 }
 0x12a   :  { %v1399_v22 = vadd.f32 %v1398_v53, %v1357_v20 }
 0x12c   :  { %v1401_v23 = vsel %vm1400_vm0, %v1399_v22, 0.0 }
 0x12d   :  { %v1402_v26 = vrot.slane %v1401_v23, 4 }
 0x12f   :  { %v1403_v28 = vadd.f32 %v1402_v26, %v1401_v23 }
 0x131   :  { %v1404_v1 = vrot.slane %v1403_v28, 2 }
 0x133   :  { %v1405_v35 = vadd.f32 %v1404_v1, %v1403_v28 }
 0x135   :  { %v1406_v38 = vrot.slane %v1405_v35, 1 }
 0x137   :  { %v1407_v42 = vadd.f32 %v1406_v38, %v1405_v35 }
 0x139   :  { %v1410_v14 = vadd.f32 %v1409_v41, %v1407_v42 }
 0x13b   :  { %1411 = vst [vmem:[#allocation8] sm:$0x1] %v1410_v14 }
 0x13c   :  { %1422 = dma.vmem_to_hbm [thread:$0]  %s1418_s21, 16, %s1420_s25, [#allocation4]  }
 0x13d   :  { %1727 = dma.done.wait [#allocation4], 16  }
 0x13e   :  { %1728 = vsyncadd [#allocation4], 4294967280 }
 0x13f   :  { %1427 = vsyncpa [#allocation4], 1 }
 0x140   :  { %1428 = vsyncpa [#allocation5], 1 }
 0x141   :  { %1429 = vsyncpa [#allocation7], 1 }

</bundles_post_ra>
